<compile_context>
chip_gen: v5e
topology: v5e:2x2
jax: 0.10.0
libtpu: 0.0.40
codegen_flags: <defaults>
</compile_context>

<pallas_src>
import jax
import jax.numpy as jnp
from jax.experimental import pallas as pl
from jax.experimental.pallas import tpu as pltpu

HIDDEN = 2056          # logical hidden size (fixed by the PyTorch module)
H1_PAD = 2176          # layer-1 output width, padded to a multiple of 128
H2_PAD = 2304          # layer-2 output width, padded to 6 lane-aligned tiles
TN = 384               # W2 output-column tile width (multiple of 128)
NT = H2_PAD // TN      # 6 tiles -> 3 per TensorCore on v7x megacore
L_PAD = 16             # padded label count for the transposed W3 slab
BN_EPS = 1e-5


def _mlp_kernel(x_ref, w1_ref, bn1_ref, w2_ref, bn2_ref, w3t_ref, o_ref):
    x = x_ref[...]                       # [B, F] f32
    inv_b = 1.0 / x.shape[0]

    # ---- hidden_layer_1 + batch_norm_1 + relu (full width; cheap, recomputed
    #      per tile so every grid step is independent / megacore-splittable) ----
    b1 = bn1_ref[0:1, :]
    g1 = bn1_ref[1:2, :]
    beta1 = bn1_ref[2:3, :]
    h = jnp.dot(x.astype(jnp.bfloat16), w1_ref[...],
                preferred_element_type=jnp.float32) + b1
    mean1 = jnp.sum(h, axis=0, keepdims=True) * inv_b
    hc = h - mean1
    var1 = jnp.sum(hc * hc, axis=0, keepdims=True) * inv_b      # centered, >= 0
    scale1 = g1 * jax.lax.rsqrt(var1 + BN_EPS)
    h = jnp.maximum(hc * scale1 + beta1, 0.0).astype(jnp.bfloat16)

    # ---- hidden_layer_2 (this tile's output columns) + batch_norm_2 + relu ----
    b2 = bn2_ref[0:1, :]
    g2 = bn2_ref[1:2, :]
    beta2 = bn2_ref[2:3, :]
    h2 = jnp.dot(h, w2_ref[...], preferred_element_type=jnp.float32) + b2
    mean2 = jnp.sum(h2, axis=0, keepdims=True) * inv_b
    h2c = h2 - mean2
    var2 = jnp.sum(h2c * h2c, axis=0, keepdims=True) * inv_b
    scale2 = g2 * jax.lax.rsqrt(var2 + BN_EPS)
    h2 = jnp.maximum(h2c * scale2 + beta2, 0.0).astype(jnp.bfloat16)

    # ---- output layer: partial contribution of this column tile ----
    # W3 is stored transposed ([L_PAD, TN] per tile) for contiguous DMA rows.
    part = jax.lax.dot_general(
        h2, w3t_ref[...],
        dimension_numbers=(((1,), (1,)), ((), ())),
        preferred_element_type=jnp.float32)
    o_ref[0] = part


def multiclass_classification_forward(x, prep):
    """x: [B, num_features] f32; prep: dict from prepare_params (padded / bf16)."""
    B, F = x.shape
    num_labels = prep["b3"].shape[1]

    partials = pl.pallas_call(
        _mlp_kernel,
        out_shape=jax.ShapeDtypeStruct((NT, B, L_PAD), jnp.float32),
        grid_spec=pltpu.PrefetchScalarGridSpec(
            num_scalar_prefetch=0,
            grid=(NT,),
            in_specs=[
                pl.BlockSpec((B, F), lambda j: (0, 0)),            # x (fetched once)
                pl.BlockSpec((F, H1_PAD), lambda j: (0, 0)),       # W1 bf16
                pl.BlockSpec((8, H1_PAD), lambda j: (0, 0)),       # [b1; g1; beta1]
                pl.BlockSpec((H1_PAD, TN), lambda j: (0, j)),      # W2 column tile
                pl.BlockSpec((8, TN), lambda j: (0, j)),           # [b2; g2; beta2] tile
                pl.BlockSpec((L_PAD, TN), lambda j: (0, j)),       # W3^T tile
            ],
            out_specs=pl.BlockSpec((1, B, L_PAD), lambda j: (j, 0, 0)),
        ),
        compiler_params=pltpu.CompilerParams(
            dimension_semantics=("parallel",),      # megacore split on v7x
            vmem_limit_bytes=32 << 20,              # need is <4 MB; leave headroom
        ),
    )(x, prep["w1"], prep["bn1"], prep["w2"], prep["bn2"], prep["w3t"])

    # Tiny epilogue: sum the 6 per-tile partials, drop label padding, add b3 once.
    return partials.sum(axis=0)[:, :num_labels] + prep["b3"]


def init_params(key, num_features, num_labels):
    """Logical (unpadded) f32 parameters, PyTorch-style init; weights are [in, out]."""
    ks = jax.random.split(key, 6)
    scale1 = 1.0 / jnp.sqrt(num_features)
    scale2 = 1.0 / jnp.sqrt(HIDDEN)
    return {
        "w1": jax.random.uniform(ks[0], (num_features, HIDDEN), jnp.float32,
                                 -scale1, scale1),
        "b1": jax.random.uniform(ks[1], (1, HIDDEN), jnp.float32, -scale1, scale1),
        "w2": jax.random.uniform(ks[2], (HIDDEN, HIDDEN), jnp.float32,
                                 -scale2, scale2),
        "b2": jax.random.uniform(ks[3], (1, HIDDEN), jnp.float32, -scale2, scale2),
        "w3": jax.random.uniform(ks[4], (HIDDEN, num_labels), jnp.float32,
                                 -scale2, scale2),
        "b3": jax.random.uniform(ks[5], (1, num_labels), jnp.float32,
                                 -scale2, scale2),
        "g1": jnp.ones((1, HIDDEN), jnp.float32),
        "beta1": jnp.zeros((1, HIDDEN), jnp.float32),
        "g2": jnp.ones((1, HIDDEN), jnp.float32),
        "beta2": jnp.zeros((1, HIDDEN), jnp.float32),
    }


def prepare_params(p):
    """Pad / repack parameters for the kernel.

    - W1 columns zero-padded to H1_PAD; W2 rows to H1_PAD, columns to H2_PAD;
      W3 transposed and zero-padded to [L_PAD, H2_PAD]. All weights bf16.
    - BN/bias vectors packed into [8, H] f32 slabs (rows: bias, gamma, beta).
      Pad entries are exactly 0 (gamma=0 keeps pad columns at 0 through BN+ReLU,
      zero pad rows of W2/W3 contribute nothing), so results are unchanged.
    """
    F = p["w1"].shape[0]
    L = p["w3"].shape[1]

    w1 = jnp.pad(p["w1"], ((0, 0), (0, H1_PAD - HIDDEN))).astype(jnp.bfloat16)

    bn1 = jnp.zeros((8, H1_PAD), jnp.float32)
    bn1 = bn1.at[0, :HIDDEN].set(p["b1"][0])
    bn1 = bn1.at[1, :HIDDEN].set(p["g1"][0])
    bn1 = bn1.at[2, :HIDDEN].set(p["beta1"][0])

    w2 = jnp.pad(p["w2"], ((0, H1_PAD - HIDDEN),
                           (0, H2_PAD - HIDDEN))).astype(jnp.bfloat16)

    bn2 = jnp.zeros((8, H2_PAD), jnp.float32)
    bn2 = bn2.at[0, :HIDDEN].set(p["b2"][0])
    bn2 = bn2.at[1, :HIDDEN].set(p["g2"][0])
    bn2 = bn2.at[2, :HIDDEN].set(p["beta2"][0])

    w3t = jnp.pad(p["w3"].T, ((0, L_PAD - L),
                              (0, H2_PAD - HIDDEN))).astype(jnp.bfloat16)

    return {"w1": w1, "bn1": bn1, "w2": w2, "bn2": bn2, "w3t": w3t,
            "b3": p["b3"], "num_features": F}


def _bf16_round(a):
    return a.astype(jnp.bfloat16).astype(jnp.float32)


def _reference_forward(x, p):
    """Pure-JAX reference: PyTorch training-mode forward with bf16 matmul inputs
    (matching the kernel's mixed-precision matmuls); BN math in f32."""
    h = _bf16_round(x) @ _bf16_round(p["w1"]) + p["b1"]
    m = h.mean(0, keepdims=True)
    v = ((h - m) ** 2).mean(0, keepdims=True)
    h = (h - m) / jnp.sqrt(v + BN_EPS) * p["g1"] + p["beta1"]
    h = jnp.maximum(h, 0.0)

    h = _bf16_round(h) @ _bf16_round(p["w2"]) + p["b2"]
    m = h.mean(0, keepdims=True)
    v = ((h - m) ** 2).mean(0, keepdims=True)
    h = (h - m) / jnp.sqrt(v + BN_EPS) * p["g2"] + p["beta2"]
    h = jnp.maximum(h, 0.0)

    return _bf16_round(h) @ _bf16_round(p["w3"]) + p["b3"]


if __name__ == "__main__":
    num_features = 32
    num_labels = 10
    batch = 8

    key = jax.random.PRNGKey(0)
    k_x, k_p = jax.random.split(key)
    x = jax.random.normal(k_x, (batch, num_features), jnp.float32)
    params = init_params(k_p, num_features, num_labels)
    prep = prepare_params(params)

    out = multiclass_classification_forward(x, prep)
    out = jax.block_until_ready(out)

    ref = _reference_forward(x, params)
    assert out.shape == (batch, num_labels)
    assert bool(jnp.allclose(out, ref, atol=2e-2, rtol=2e-2)), "mismatch vs reference"

    print("KERNEL_OK")
</pallas_src>

<mosaic_0001>
module attributes {stable_mosaic.version = 11 : i64} {
  func.func @_mlp_kernel(%arg0: i32, %arg1: memref<8x32xf32, #tpu.memory_space<vmem>>, %arg2: memref<32x2176xbf16, #tpu.memory_space<vmem>>, %arg3: memref<8x2176xf32, #tpu.memory_space<vmem>>, %arg4: memref<2176x384xbf16, #tpu.memory_space<vmem>>, %arg5: memref<8x384xf32, #tpu.memory_space<vmem>>, %arg6: memref<16x384xbf16, #tpu.memory_space<vmem>>, %arg7: memref<1x8x16xf32, #tpu.memory_space<vmem>>) attributes {dimension_semantics = [#tpu.dimension_semantics<parallel>], iteration_bounds = array<i64: 6>, scalar_prefetch = 0 : i64, scratch_operands = 0 : i64, tpu.core_type = #tpu.core_type<tc>, window_params = [{pipeline_mode = #tpu.pipeline_mode<synchronous>, transform_indices = @transform_0, window_bounds = array<i64: 8, 32>}, {pipeline_mode = #tpu.pipeline_mode<synchronous>, transform_indices = @transform_1, window_bounds = array<i64: 32, 2176>}, {pipeline_mode = #tpu.pipeline_mode<synchronous>, transform_indices = @transform_2, window_bounds = array<i64: 8, 2176>}, {transform_indices = @transform_3, window_bounds = array<i64: 2176, 384>}, {transform_indices = @transform_4, window_bounds = array<i64: 8, 384>}, {transform_indices = @transform_5, window_bounds = array<i64: 16, 384>}, {transform_indices = @transform_6, window_bounds = array<i64: 1, 8, 16>}]} {
    %c0 = arith.constant 0 : index
    %c0_0 = arith.constant 0 : index
    %0 = vector.load %arg1[%c0, %c0_0] : memref<8x32xf32, #tpu.memory_space<vmem>>, vector<8x32xf32>
    %c0_1 = arith.constant 0 : index
    %c0_2 = arith.constant 0 : index
    %1 = vector.load %arg3[%c0_1, %c0_2] : memref<8x2176xf32, #tpu.memory_space<vmem>>, vector<1x2176xf32>
    %c1 = arith.constant 1 : index
    %c0_3 = arith.constant 0 : index
    %2 = vector.load %arg3[%c1, %c0_3] : memref<8x2176xf32, #tpu.memory_space<vmem>>, vector<1x2176xf32>
    %c2 = arith.constant 2 : index
    %c0_4 = arith.constant 0 : index
    %3 = vector.load %arg3[%c2, %c0_4] : memref<8x2176xf32, #tpu.memory_space<vmem>>, vector<1x2176xf32>
    %4 = arith.truncf %0 : vector<8x32xf32> to vector<8x32xbf16>
    %c0_5 = arith.constant 0 : index
    %c0_6 = arith.constant 0 : index
    %5 = vector.load %arg2[%c0_5, %c0_6] : memref<32x2176xbf16, #tpu.memory_space<vmem>>, vector<32x2176xbf16>
    %cst = arith.constant dense<0.000000e+00> : vector<8x2176xf32>
    %6 = tpu.matmul %4, %5, %cst {dimension_numbers = #tpu.dot_dimension_numbers<[1], [0], [0], [1], [0, 0, 1, 1], [], []>} : vector<8x32xbf16>, vector<32x2176xbf16>, vector<8x2176xf32> -> vector<8x2176xf32>
    %7 = vector.broadcast %1 : vector<1x2176xf32> to vector<8x2176xf32>
    %8 = arith.addf %6, %7 : vector<8x2176xf32>
    %cst_7 = arith.constant dense<0.000000e+00> : vector<2176xf32>
    %9 = vector.multi_reduction <add>, %8, %cst_7 [0] : vector<8x2176xf32> to vector<2176xf32>
    %10 = vector.shape_cast %9 : vector<2176xf32> to vector<1x2176xf32>
    %cst_8 = arith.constant 1.250000e-01 : f32
    %11 = vector.broadcast %cst_8 : f32 to vector<1x2176xf32>
    %12 = arith.mulf %10, %11 : vector<1x2176xf32>
    %13 = vector.broadcast %12 : vector<1x2176xf32> to vector<8x2176xf32>
    %14 = arith.subf %8, %13 : vector<8x2176xf32>
    %15 = arith.mulf %14, %14 : vector<8x2176xf32>
    %cst_9 = arith.constant dense<0.000000e+00> : vector<2176xf32>
    %16 = vector.multi_reduction <add>, %15, %cst_9 [0] : vector<8x2176xf32> to vector<2176xf32>
    %17 = vector.shape_cast %16 : vector<2176xf32> to vector<1x2176xf32>
    %cst_10 = arith.constant 1.250000e-01 : f32
    %18 = vector.broadcast %cst_10 : f32 to vector<1x2176xf32>
    %19 = arith.mulf %17, %18 : vector<1x2176xf32>
    %cst_11 = arith.constant 9.99999974E-6 : f32
    %20 = vector.broadcast %cst_11 : f32 to vector<1x2176xf32>
    %21 = arith.addf %19, %20 : vector<1x2176xf32>
    %22 = math.rsqrt %21 : vector<1x2176xf32>
    %23 = arith.mulf %2, %22 : vector<1x2176xf32>
    %24 = vector.broadcast %23 : vector<1x2176xf32> to vector<8x2176xf32>
    %25 = arith.mulf %14, %24 : vector<8x2176xf32>
    %26 = vector.broadcast %3 : vector<1x2176xf32> to vector<8x2176xf32>
    %27 = arith.addf %25, %26 : vector<8x2176xf32>
    %cst_12 = arith.constant 0.000000e+00 : f32
    %28 = vector.broadcast %cst_12 : f32 to vector<8x2176xf32>
    %29 = arith.maximumf %27, %28 : vector<8x2176xf32>
    %30 = arith.truncf %29 : vector<8x2176xf32> to vector<8x2176xbf16>
    %c0_13 = arith.constant 0 : index
    %c0_14 = arith.constant 0 : index
    %31 = vector.load %arg5[%c0_13, %c0_14] : memref<8x384xf32, #tpu.memory_space<vmem>>, vector<1x384xf32>
    %c1_15 = arith.constant 1 : index
    %c0_16 = arith.constant 0 : index
    %32 = vector.load %arg5[%c1_15, %c0_16] : memref<8x384xf32, #tpu.memory_space<vmem>>, vector<1x384xf32>
    %c2_17 = arith.constant 2 : index
    %c0_18 = arith.constant 0 : index
    %33 = vector.load %arg5[%c2_17, %c0_18] : memref<8x384xf32, #tpu.memory_space<vmem>>, vector<1x384xf32>
    %c0_19 = arith.constant 0 : index
    %c0_20 = arith.constant 0 : index
    %34 = vector.load %arg4[%c0_19, %c0_20] : memref<2176x384xbf16, #tpu.memory_space<vmem>>, vector<2176x384xbf16>
    %cst_21 = arith.constant dense<0.000000e+00> : vector<8x384xf32>
    %35 = tpu.matmul %30, %34, %cst_21 {dimension_numbers = #tpu.dot_dimension_numbers<[1], [0], [0], [1], [0, 0, 1, 1], [], []>} : vector<8x2176xbf16>, vector<2176x384xbf16>, vector<8x384xf32> -> vector<8x384xf32>
    %36 = vector.broadcast %31 : vector<1x384xf32> to vector<8x384xf32>
    %37 = arith.addf %35, %36 : vector<8x384xf32>
    %cst_22 = arith.constant dense<0.000000e+00> : vector<384xf32>
    %38 = vector.multi_reduction <add>, %37, %cst_22 [0] : vector<8x384xf32> to vector<384xf32>
    %39 = vector.shape_cast %38 : vector<384xf32> to vector<1x384xf32>
    %cst_23 = arith.constant 1.250000e-01 : f32
    %40 = vector.broadcast %cst_23 : f32 to vector<1x384xf32>
    %41 = arith.mulf %39, %40 : vector<1x384xf32>
    %42 = vector.broadcast %41 : vector<1x384xf32> to vector<8x384xf32>
    %43 = arith.subf %37, %42 : vector<8x384xf32>
    %44 = arith.mulf %43, %43 : vector<8x384xf32>
    %cst_24 = arith.constant dense<0.000000e+00> : vector<384xf32>
    %45 = vector.multi_reduction <add>, %44, %cst_24 [0] : vector<8x384xf32> to vector<384xf32>
    %46 = vector.shape_cast %45 : vector<384xf32> to vector<1x384xf32>
    %cst_25 = arith.constant 1.250000e-01 : f32
    %47 = vector.broadcast %cst_25 : f32 to vector<1x384xf32>
    %48 = arith.mulf %46, %47 : vector<1x384xf32>
    %cst_26 = arith.constant 9.99999974E-6 : f32
    %49 = vector.broadcast %cst_26 : f32 to vector<1x384xf32>
    %50 = arith.addf %48, %49 : vector<1x384xf32>
    %51 = math.rsqrt %50 : vector<1x384xf32>
    %52 = arith.mulf %32, %51 : vector<1x384xf32>
    %53 = vector.broadcast %52 : vector<1x384xf32> to vector<8x384xf32>
    %54 = arith.mulf %43, %53 : vector<8x384xf32>
    %55 = vector.broadcast %33 : vector<1x384xf32> to vector<8x384xf32>
    %56 = arith.addf %54, %55 : vector<8x384xf32>
    %cst_27 = arith.constant 0.000000e+00 : f32
    %57 = vector.broadcast %cst_27 : f32 to vector<8x384xf32>
    %58 = arith.maximumf %56, %57 : vector<8x384xf32>
    %59 = arith.truncf %58 : vector<8x384xf32> to vector<8x384xbf16>
    %c0_28 = arith.constant 0 : index
    %c0_29 = arith.constant 0 : index
    %60 = vector.load %arg6[%c0_28, %c0_29] : memref<16x384xbf16, #tpu.memory_space<vmem>>, vector<16x384xbf16>
    %cst_30 = arith.constant dense<0.000000e+00> : vector<8x16xf32>
    %61 = tpu.matmul %59, %60, %cst_30 {dimension_numbers = #tpu.dot_dimension_numbers<[1], [1], [0], [0], [0, 0, 1, 0], [], []>} : vector<8x384xbf16>, vector<16x384xbf16>, vector<8x16xf32> -> vector<8x16xf32>
    %c0_31 = arith.constant 0 : index
    %c0_32 = arith.constant 0 : index
    %c0_33 = arith.constant 0 : index
    %62 = vector.load %arg7[%c0_31, %c0_32, %c0_33] : memref<1x8x16xf32, #tpu.memory_space<vmem>>, vector<1x8x16xf32>
    %63 = vector.shape_cast %62 : vector<1x8x16xf32> to vector<8x16xf32>
    %64 = vector.shape_cast %61 : vector<8x16xf32> to vector<1x8x16xf32>
    tpu.vector_store %arg7[%c0_31, %c0_32, %c0_33], %64 {strides = array<i32>} : memref<1x8x16xf32, #tpu.memory_space<vmem>>, vector<1x8x16xf32>,
    return
  }
  func.func @transform_0(%arg0: i32) -> (i32, i32) {
    %c0_i32 = arith.constant 0 : i32
    %c0_i32_0 = arith.constant 0 : i32
    %c0_i32_1 = arith.constant 0 : i32
    return %c0_i32, %c0_i32_0 : i32, i32
  }
  func.func @transform_1(%arg0: i32) -> (i32, i32) {
    %c0_i32 = arith.constant 0 : i32
    %c0_i32_0 = arith.constant 0 : i32
    %c0_i32_1 = arith.constant 0 : i32
    return %c0_i32, %c0_i32_0 : i32, i32
  }
  func.func @transform_2(%arg0: i32) -> (i32, i32) {
    %c0_i32 = arith.constant 0 : i32
    %c0_i32_0 = arith.constant 0 : i32
    %c0_i32_1 = arith.constant 0 : i32
    return %c0_i32, %c0_i32_0 : i32, i32
  }
  func.func @transform_3(%arg0: i32) -> (i32, i32) {
    %c0_i32 = arith.constant 0 : i32
    %c0_i32_0 = arith.constant 0 : i32
    return %c0_i32, %arg0 : i32, i32
  }
  func.func @transform_4(%arg0: i32) -> (i32, i32) {
    %c0_i32 = arith.constant 0 : i32
    %c0_i32_0 = arith.constant 0 : i32
    return %c0_i32, %arg0 : i32, i32
  }
  func.func @transform_5(%arg0: i32) -> (i32, i32) {
    %c0_i32 = arith.constant 0 : i32
    %c0_i32_0 = arith.constant 0 : i32
    return %c0_i32, %arg0 : i32, i32
  }
  func.func @transform_6(%arg0: i32) -> (i32, i32, i32) {
    %c0_i32 = arith.constant 0 : i32
    %c0_i32_0 = arith.constant 0 : i32
    %c0_i32_1 = arith.constant 0 : i32
    return %arg0, %c0_i32, %c0_i32_0 : i32, i32, i32
  }
}

</mosaic_0001>

<bundles_post_ra>
// kernel: tpu_custom_call.1
= control target key start
LH: loop header
LB: loop body
LE: loop exit
PB: predicated region body
PF: predicated region fallthrough
CT: control target
= control target key end

     0   :  { %s10004_s0 = inlined_call_operand.hbm [shape: f32[8,32], index: 0, kind: input, shape index: {}]   ;;  %s10005_s1 = inlined_call_operand.hbm [shape: bf16[32,2176], index: 1, kind: input, shape index: {}]   ;;  %s10006_s2 = inlined_call_operand.hbm [shape: f32[8,2176], index: 2, kind: input, shape index: {}]   ;;  %s10007_s3 = inlined_call_operand.hbm [shape: bf16[2176,2304], index: 3, kind: input, shape index: {}]   ;;  %s10008_s4 = inlined_call_operand.hbm [shape: f32[8,2304], index: 4, kind: input, shape index: {}]   ;;  %s10009_s5 = inlined_call_operand.hbm [shape: bf16[16,2304], index: 5, kind: input, shape index: {}]   ;;  %s10010_s6 = inlined_call_operand.hbm [shape: f32[6,8,16], index: 6, kind: output, shape index: {}]  }
   0x1   :  { %10020 = sst [smem:[#allocation24_spill]] %s10005_s1 }
   0x2   :  { %10021 = sst [smem:[#allocation25_spill]] %s10007_s3 }
   0x3   :  { %11 = vsyncpa [#allocation3], 0 }
   0x4   :  { %12 = vsyncpa [#allocation6], 0 }
   0x5   :  { %13 = vsyncpa [#allocation9], 0 }
   0x6   :  { %15 = vsyncpa [#allocation9 + $0x1], 0 }
   0x7   :  { %16 = vsyncpa [#allocation12], 0 }
   0x8   :  { %18 = vsyncpa [#allocation12 + $0x1], 0 }
   0x9   :  { %19 = vsyncpa [#allocation4], 0 }
   0xa   :  { %21 = vsyncpa [#allocation4 + $0x1], 0  ;;  %s7999_s21 = smov 0   ;;  %s8001_s22 = smov 0  }
   0xb   :  { %s8003_s23 = smov 0   ;;  %s8005_s24 = smov 0  }
   0xc LB: > { %10022 = sst [smem:[#allocation19_spill]] %s7942_s21  ;;  %s8020_s25 = sadd.s32 4294967295, %s7954_s24   ;;  %s7954_s24 = sphi %s8005_s24, %s10062_s24   ;;  %s7950_s23 = sphi %s8003_s23, %s10064_s23   ;;  %s7946_s22 = sphi %s8001_s22, %s10066_s22   ;;  %s7942_s21 = sphi %s7999_s21, %s10065_s21  }
   0xd   : > { %10023 = sst [smem:[#allocation20_spill]] %s7950_s23  ;;  %s5291_s26 = sadd.s32 4294967294, %s7954_s24  }
   0xe   : > { %p110_p0 = scmp.ne.s32.totalorder %s7946_s22, %s7942_s21  ;;  %p10011_p1 = scmp.eq.s32.totalorder %s8020_s25, 0 }
   0xf   : > { %p186_p2 = scmp.eq.s32.totalorder %s8020_s25, 5  ;;  %p192_p3 = scmp.eq.s32.totalorder %s5291_s26, 5 }
  0x10   : > { %p8029_p4 = por %p10011_p1, %p110_p0  ;;  %p5292_p5 = scmp.ge.s32.totalorder %s7954_s24, 1 }
  0x11   : > { %p8034_p6 = por %p192_p3, %p110_p0  ;;  %p199_p7 = scmp.lt.s32.totalorder %s7954_s24, 7 }
  0x12   : > { %s10027_s1 = sld [smem:[#allocation24_spill]]  ;;  %s7956_s9 = smov [#allocation5]  }
  0x13   : > { %s10025_s28 = scalar_select %p8034_p6, 1, 0 }
  0x14   : > { %p8042_p8 = pnand %p5292_p5, %p199_p7  ;;  %s224_s10 = sshll.u32 %s7956_s9, 4  ;;  %s225_s10 = int_to_ptr.vmem [resolvable:$true] %s224_s10 }
  0x15   : > { %10026 = sst [smem:[#allocation21_spill]] %s10025_s28  ;;  %s8055_s12 = sadd.s32 1, %s7954_s24  }
  0x16   : > { %p7581_p9 = pneg %p8042_p8  ;;  %10030 = sst [smem:[#allocation22_spill]] %s8055_s12 }
  0x17   : > { %s7957_s13 = smov 1088   ;;  %s7958_s14 = smov 68  }
  0x18   : > { %s222_s7 = sshll.u32 %s10027_s1, 4  ;;  %p8050_p10 = pnand %p7581_p9, %p10011_p1  ;;  %s223_s7 = int_to_ptr.hbm [resolvable:$true] %s222_s7 }
  0x19   : > { %s94_s15 = ssub.s32 %s7954_s24, %s8055_s12  ;;  %s97_s16 = sadd.s32 1, %s7950_s23 }
  0x1a   : > { %7587 = dma.hbm_to_vmem [thread:$0]  (!%p8050_p10), %s223_s7, 4352, %s225_s10, [#allocation6], %s7957_s13, %s7957_s13, %s7958_s14  }
  0x1b   : > { %p95_p11 = scmp.eq.s32.totalorder %s94_s15, 0  ;;  %p104_p12 = scmp.ne.s32.totalorder %s7950_s23, %s7946_s22 }
  0x1c   : > { %p105_p13 = scmp.eq.s32.totalorder %s7954_s24, 0  ;;  %p7608_p0 = scmp.lt.s32.totalorder %s7954_s24, 6 }
  0x1d   : > { %s8067_s17 = scalar_select %p95_p11, %s7950_s23, %s97_s16  }
  0x1e   : > { %p106_p3 = por %p105_p13, %p104_p12  ;;  %p8071_p5 = por %p186_p2, %p104_p12 }
  0x1f   : > { %10031 = sst [smem:[#allocation23_spill]] %s8067_s17  ;;  %s250_s19 = sand.u32 1, %s7954_s24  }
  0x20   : > { %s8077_s20 = sand.u32 1, %s7950_s23   ;;  %s10012_s29 = smul.u32 12, %s7954_s24 }
  0x21   : > { %s7556_s26 = smul.u32 3264, %s8077_s20  ;;  %p8081_p7 = pnand %p7608_p0, %p106_p3 }
  0x22   : > { %s10034_s3 = sld [smem:[#allocation25_spill]]  ;;  %s8090_s16 = scalar_lea.sflag [#allocation9], %s250_s19 }
  0x23   : > { %s254_s13 = scalar_lea.vmem [#allocation8], %s7556_s26  ;;  %p7730_p9 = pneg %p8081_p7 }
  0x24   : > { %s262_s14 = sshll.u32 %s254_s13, 4  ;;  %s263_s14 = int_to_ptr.vmem [resolvable:$true] %s262_s14 }
  0x28   : > { %s259_s10 = scalar_lea.hbm %s10034_s3, %s10012_s29  ;;  %s7733_s26 = scalar_lea.hbm %s10034_s3, 19584 }
  0x29   : > { %s260_s15 = sshll.u32 %s259_s10, 4  ;;  %s261_s15 = int_to_ptr.hbm [resolvable:$true] %s260_s15 }
  0x2a   : > { %s7726_s1 = sshra.s32 %s261_s15, 4  ;;  %s7727_s1 = int_to_ptr.hbm [resolvable:$true] %s7726_s1 }
  0x2b   : > { %s7728_s17 = scalar_lea.hbm %s7727_s1, 3264  ;;  %p7734_p13 = scmp.lt.s32.totalorder %s7727_s1, %s10034_s3 }
  0x2c   : > { %p7729_p2 = scmp.ne.s32.totalorder %s7727_s1, %s7728_s17  ;;  %p7735_p0 = scmp.lt.s32.totalorder %s7733_s26, %s7728_s17 }
  0x2e   : > { %p7731_p11 = pnand %p7730_p9, %p7729_p2  ;;  %p7736_p3 = por %p7735_p0, %p7734_p13 }
  0x30   : > { %p7732_p12 = pneg %p7731_p11 }
  0x32   : > { %p7737_p1 = pnand %p7736_p3, %p7732_p12 }
  0x34   : > { %7740 = shalt.err (!%p7737_p1)
}
  0x35   : > { %s10018_s19 = smov 1152   ;;  %s10019_s29 = smov 192  }
  0x36   : > { %s7961_s23 = smov 12   ;;  %s211_s17 = sshll.u32 %s10004_s0, 4  ;;  %s212_s17 = int_to_ptr.hbm [resolvable:$true] %s211_s17 }
  0x37   : > { %7594 = dma.hbm_to_vmem [thread:$0]  (!%p8081_p7), %s261_s15, 52224, %s263_s14, %s8090_s16, %s10018_s19, %s10019_s29, %s7961_s23  }
  0x38   : > { %s7962_s9 = smov [#allocation2]   ;;  %s237_s3 = sshll.u32 %s10006_s2, 4  ;;  %s238_s3 = int_to_ptr.hbm [resolvable:$true] %s237_s3 }
  0x39   : > { %s213_s26 = sshll.u32 %s7962_s9, 4  ;;  %s7963_s12 = smov [#allocation7]   ;;  %s214_s26 = int_to_ptr.vmem [resolvable:$true] %s213_s26 }
  0x3a   : > { %7584 = dma.hbm_to_vmem [thread:$0]  (!%p8050_p10), %s212_s17, 128, %s214_s26, [#allocation3]  }
  0x3b   : > { %s239_s28 = sshll.u32 %s7963_s12, 4  ;;  %s7557_s21 = smul.u32 24, %s8077_s20  ;;  %s240_s28 = int_to_ptr.vmem [resolvable:$true] %s239_s28 }
  0x3c   : > { %s7109_s14 = smul.u32 24, %s7954_s24 }
  0x3d   : > { %7590 = dma.hbm_to_vmem [thread:$0]  (!%p8050_p10), %s238_s3, 2176, %s240_s28, [#allocation6]  }
  0x3e   : > { %s281_s1 = scalar_lea.hbm %s10008_s4, %s7109_s14  ;;  %s276_s19 = scalar_lea.vmem [#allocation10], %s7557_s21 }
  0x3f   : > { %s283_s9 = sshll.u32 %s281_s1, 4  ;;  %s285_s29 = sshll.u32 %s276_s19, 4  ;;  %s284_s9 = int_to_ptr.hbm [resolvable:$true] %s283_s9  ;;  %s286_s29 = int_to_ptr.vmem [resolvable:$true] %s285_s29 }
  0x40   : > { %s7816_s13 = sshra.s32 %s284_s9, 4  ;;  %s7823_s3 = scalar_lea.hbm %s10008_s4, 144  ;;  %s7817_s13 = int_to_ptr.hbm [resolvable:$true] %s7816_s13 }
  0x41   : > { %s7818_s17 = scalar_lea.hbm %s7817_s13, 24  ;;  %p7824_p10 = scmp.lt.s32.totalorder %s7817_s13, %s10008_s4 }
  0x42   : > { %p7819_p1 = scmp.ne.s32.totalorder %s7817_s13, %s7818_s17  ;;  %p7825_p12 = scmp.lt.s32.totalorder %s7823_s3, %s7818_s17 }
  0x44   : > { %p7821_p2 = pnand %p7819_p1, %p7730_p9  ;;  %p7826_p13 = por %p7825_p12, %p7824_p10 }
  0x46   : > { %p7822_p11 = pneg %p7821_p2 }
  0x48   : > { %p7827_p0 = pnand %p7826_p13, %p7822_p11 }
  0x4a   : > { %7830 = shalt.err (!%p7827_p0)
}
  0x4b   : > { %7597 = dma.hbm_to_vmem [thread:$0]  (!%p8081_p7), %s284_s9, 384, %s286_s29, %s8090_s16  }
  0x4c   : > { %s296_s19 = scalar_lea.vmem [#allocation11], %s7557_s21  ;;  %s10035_s14 = smul.u32 12, %s7954_s24 }
  0x4d   : > { %s304_s10 = sshll.u32 %s296_s19, 4  ;;  %s293_s17 = scalar_lea.sflag [#allocation12], %s8077_s20  ;;  %s305_s10 = int_to_ptr.vmem [resolvable:$true] %s304_s10 }
  0x4e   : > { %s301_s1 = scalar_lea.hbm %s10009_s5, %s10035_s14  ;;  %s7853_s16 = scalar_lea.hbm %s10009_s5, 144 }
  0x4f   : > { %s302_s13 = sshll.u32 %s301_s1, 4  ;;  %s303_s13 = int_to_ptr.hbm [resolvable:$true] %s302_s13 }
  0x50   : > { %s7846_s12 = sshra.s32 %s303_s13, 4  ;;  %s7847_s12 = int_to_ptr.hbm [resolvable:$true] %s7846_s12 }
  0x51   : > { %s7848_s11 = scalar_lea.hbm %s7847_s12, 24  ;;  %p7854_p11 = scmp.lt.s32.totalorder %s7847_s12, %s10009_s5 }
  0x52   : > { %p7849_p3 = scmp.ne.s32.totalorder %s7847_s12, %s7848_s11  ;;  %p7855_p10 = scmp.lt.s32.totalorder %s7853_s16, %s7848_s11 }
  0x54   : > { %p7851_p1 = pnand %p7849_p3, %p7730_p9  ;;  %p7856_p12 = por %p7855_p10, %p7854_p11 }
  0x56   : > { %p7852_p2 = pneg %p7851_p1 }
  0x58   : > { %p7857_p13 = pnand %p7856_p12, %p7852_p2 }
  0x5a   : > { %7860 = shalt.err (!%p7857_p13)
}
  0x5b   : > { %s10036_s20 = smov 192   ;;  %s10037_s28 = smov 1152  }
  0x5c   : > { %7600 = dma.hbm_to_vmem [thread:$0]  (!%p8081_p7), %s303_s13, 384, %s305_s10, %s293_s17, %s10037_s28, %s10036_s20, %s7961_s23  }
  0x5d   : > { %316 = sbr.rel (%p8042_p8) target bundleno = 1111 (0x457), region = 44  ;;  %p10038_p9 = scmp.eq.s32.totalorder (!%p8042_p8), %s8020_s25, 0 }
  0x62   : > { %7921 = dma.done.wait (%p10038_p9), [#allocation3], 128   ;;  %p10039_p0 = pmov %p10038_p9 }
  0x64   : > { %7923 = vsyncadd (%p10039_p0), [#allocation3], 4294967168  ;;  %p10040_p3 = pmov %p10039_p0 }
  0x65   : > { %p10041_p1 = pmov %p10039_p0 }
  0x66   : > { %7925 = dma.done.wait (%p10040_p3), [#allocation6], 6528  }
  0x67   : > { %7927 = vsyncadd (%p10041_p1), [#allocation6], 4294960768  ;;  %s333_s30 = sand.u32 1, %s8020_s25   ;;  %s8168_s23 = sand.u32 1, %s7946_s22  }
  0x68   : > { %s7559_s8 = smul.u32 3264, %s8168_s23  ;;  %s334_s26 = scalar_lea.sflag [#allocation9], %s333_s30 }
  0x6a   : > { %s8171_s19 = scalar_lea.vmem [#allocation8], %s7559_s8 }
  0x6b   : > { %7929 = dma.done.wait (%p8029_p4), %s334_s26, 52608  }
  0x6c   : > { %7931 = vsyncadd (%p8029_p4), %s334_s26, 4294914688  ;;  %s7560_s10 = smul.u32 24, %s8168_s23  ;;  %s354_s15 = scalar_lea.sflag [#allocation12], %s8168_s23 }
  0x6e   : > { %s8178_s14 = scalar_lea.vmem [#allocation10], %s7560_s10  ;;  %s8181_s7 = scalar_lea.vmem [#allocation11], %s7560_s10 }
  0x6f   : > { %7933 = dma.done.wait (%p8029_p4), %s354_s15, 384  }
  0x70   : > { %7935 = vsyncadd (%p8029_p4), %s354_s15, 4294966912  ;;  %v5375_v0 = vld [vmem:[#allocation5 + $0x88] sm:$0xf]  ;;  %v7136_v1 = vld [vmem:[#allocation5 + $0xc8] sm:$0xf0]  ;;  %vm677_vm0 = vcmask 261120  }
  0x71   : > { %v7128_v2 = vld [vmem:[#allocation5 + $0x8c] sm:$0xf]  ;;  %v5376_v3 = vor.u32 %v7136_v1, %v5375_v0  ;;  %v5377_v4 = vld [vmem:[#allocation5 + $0xcc] sm:$0xf0]  ;;  %v7137_v6 = vld [vmem:[#allocation5 + $0xd0] sm:$0xf0] }
  0x72   : > { %v5383_v5 = vld [vmem:[#allocation5 + $0x90] sm:$0xf]  ;;  %v5380_v7 = vor.u32 %v7128_v2, %v5377_v4  ;;  %v7129_v9 = vld [vmem:[#allocation5 + $0x94] sm:$0xf]  ;;  %v5385_v10 = vld [vmem:[#allocation5 + $0xd4] sm:$0xf0] }
  0x73   : > { %v5384_v8 = vor.u32 %v7137_v6, %v5383_v5  ;;  %v5307_v11 = vld [vmem:[#allocation5] sm:$0xf]  ;;  %687 = vmatpush.bf16.msra.mxu0 %v5376_v3  ;;  %v5388_v12 = vor.u32 %v7129_v9, %v5385_v10  ;;  %v7119_v13 = vld [vmem:[#allocation5 + $0x40] sm:$0xf0]  ;;  %v5309_v15 = vld [vmem:[#allocation5 + $0x44] sm:$0xf0] }
  0x74   : > { %v7111_v14 = vld [vmem:[#allocation5 + $0x4] sm:$0xf]  ;;  %700 = vmatpush.bf16.msra.mxu1 %v5380_v7  ;;  %v5308_v16 = vor.u32 %v7119_v13, %v5307_v11  ;;  %v5315_v18 = vld [vmem:[#allocation5 + $0x8] sm:$0xf]  ;;  %v7120_v19 = vld [vmem:[#allocation5 + $0x48] sm:$0xf0] }
  0x75   : > { %713 = vmatpush.bf16.msra.mxu2 %v5384_v8  ;;  %v5312_v17 = vor.u32 %v7111_v14, %v5309_v15  ;;  %v7112_v20 = vld [vmem:[#allocation5 + $0xc] sm:$0xf]  ;;  %726 = vmatpush.bf16.msra.mxu3 %v5388_v12  ;;  %v5316_v21 = vor.u32 %v7120_v19, %v5315_v18  ;;  %v5317_v22 = vld [vmem:[#allocation5 + $0x4c] sm:$0xf0]  ;;  %v401_v23 = vld [vmem:[#allocation2] sm:$0xff]  ;;  %vm1391_vm3 = vcmask 1040384  }
  0x76   : > { %v5391_v24 = vld [vmem:[#allocation5 + $0x98] sm:$0xf]  ;;  %v5320_v25 = vor.u32 %v7112_v20, %v5317_v22  ;;  %v8187_v26 = vpack.c.bf16 %v401_v23, %v401_v23  ;;  %v7138_v27 = vld [vmem:[#allocation5 + $0xd8] sm:$0xf0]  ;;  %v5393_v29 = vld [vmem:[#allocation5 + $0xdc] sm:$0xf0] }
  0x77   : > { %v7130_v28 = vld [vmem:[#allocation5 + $0x9c] sm:$0xf]  ;;  %688 = vmatpush.bf16.msra.mxu0 %v5308_v16  ;;  %v5392_v30 = vor.u32 %v7138_v27, %v5391_v24  ;;  %v5399_v32 = vld [vmem:[#allocation5 + $0xa0] sm:$0xf]  ;;  %v7139_v33 = vld [vmem:[#allocation5 + $0xe0] sm:$0xf0] }
  0x78   : > { %v5396_v31 = vor.u32 %v7130_v28, %v5393_v29  ;;  %v7131_v34 = vld [vmem:[#allocation5 + $0xa4] sm:$0xf]  ;;  %701 = vmatpush.bf16.msra.mxu1 %v5312_v17  ;;  %v5400_v35 = vor.u32 %v7139_v33, %v5399_v32  ;;  %v5401_v36 = vld [vmem:[#allocation5 + $0xe4] sm:$0xf0]  ;;  %v5323_v37 = vld [vmem:[#allocation5 + $0x10] sm:$0xf] }
  0x79   : > { %714 = vmatpush.bf16.msra.mxu2 %v5316_v21  ;;  %v7121_v38 = vld [vmem:[#allocation5 + $0x50] sm:$0xf0]  ;;  %727 = vmatpush.bf16.msra.mxu3 %v5320_v25  ;;  %v5404_v39 = vor.u32 %v7131_v34, %v5401_v36  ;;  %v5325_v42 = vld [vmem:[#allocation5 + $0x54] sm:$0xf0]  ;;  %v7122_v45 = vld [vmem:[#allocation5 + $0x58] sm:$0xf0] }
  0x7a   : > { %v5324_v40 = vor.u32 %v7121_v38, %v5323_v37  ;;  %v7113_v41 = vld [vmem:[#allocation5 + $0x14] sm:$0xf]  ;;  %v5331_v43 = vld [vmem:[#allocation5 + $0x18] sm:$0xf]  ;;  %5441 = vmatmul.msk.bf16.vlgmr.msra.gmra.mxu0 %vm677_vm0, %v8187_v26  ;;  %v7114_v46 = vld [vmem:[#allocation5 + $0x1c] sm:$0xf] }
  0x7b   : > { %739 = vmatpush.bf16.msrb.mxu0 %v5392_v30  ;;  %v5328_v44 = vor.u32 %v7113_v41, %v5325_v42  ;;  %v5333_v47 = vld [vmem:[#allocation5 + $0x5c] sm:$0xf0]  ;;  %5442 = vmatmul.msk.bf16.vlgmr.msra.gmra.mxu1 %vm677_vm0, %v8187_v26  ;;  %v5407_v48 = vld [vmem:[#allocation5 + $0xa8] sm:$0xf]  ;;  %v7140_v49 = vld [vmem:[#allocation5 + $0xe8] sm:$0xf0]  ;;  %v5332_v51 = vor.u32 %v7122_v45, %v5331_v43 }
  0x7c   : > { %752 = vmatpush.bf16.msrb.mxu1 %v5396_v31  ;;  %5443 = vmatmul.msk.bf16.vlgmr.msra.gmra.mxu2 %vm677_vm0, %v8187_v26  ;;  %v7132_v50 = vld [vmem:[#allocation5 + $0xac] sm:$0xf]  ;;  %v5408_v52 = vor.u32 %v7140_v49, %v5407_v48  ;;  %v5409_v53 = vld [vmem:[#allocation5 + $0xec] sm:$0xf0]  ;;  %v7141_v55 = vld [vmem:[#allocation5 + $0xf0] sm:$0xf0]  ;;  %v5336_v56 = vor.u32 %v7114_v46, %v5333_v47 }
  0x7d   : > { %5444 = vmatmul.msk.bf16.vlgmr.msra.gmra.mxu3 %vm677_vm0, %v8187_v26  ;;  %765 = vmatpush.bf16.msrb.mxu2 %v5400_v35  ;;  %v5415_v54 = vld [vmem:[#allocation5 + $0xb0] sm:$0xf]  ;;  %v5412_v57 = vor.u32 %v7132_v50, %v5409_v53  ;;  %v7133_v59 = vld [vmem:[#allocation5 + $0xb4] sm:$0xf]  ;;  %v5417_v60 = vld [vmem:[#allocation5 + $0xf4] sm:$0xf0] }
  0x7e   : > { %778 = vmatpush.bf16.msrb.mxu3 %v5404_v39  ;;  %v5416_v58 = vor.u32 %v7141_v55, %v5415_v54  ;;  %v5339_v61 = vld [vmem:[#allocation5 + $0x20] sm:$0xf]  ;;  %v5420_v62 = vor.u32 %v7133_v59, %v5417_v60  ;;  %v7123_v63 = vld [vmem:[#allocation5 + $0x60] sm:$0xf0]  ;;  %v5341_v1 = vld [vmem:[#allocation5 + $0x64] sm:$0xf0] }
  0x7f   : > { %740 = vmatpush.bf16.msrb.mxu0 %v5324_v40  ;;  %v7115_v0 = vld [vmem:[#allocation5 + $0x24] sm:$0xf]  ;;  %v5340_v2 = vor.u32 %v7123_v63, %v5339_v61  ;;  %v5347_v4 = vld [vmem:[#allocation5 + $0x28] sm:$0xf]  ;;  %v7124_v5 = vld [vmem:[#allocation5 + $0x68] sm:$0xf0] }
  0x80   : > { %753 = vmatpush.bf16.msrb.mxu1 %v5328_v44  ;;  %v5344_v3 = vor.u32 %v7115_v0, %v5341_v1  ;;  %v7116_v6 = vld [vmem:[#allocation5 + $0x2c] sm:$0xf]  ;;  %v5349_v7 = vld [vmem:[#allocation5 + $0x6c] sm:$0xf0]  ;;  %v5348_v8 = vor.u32 %v7124_v5, %v5347_v4  ;;  %v5423_v10 = vld [vmem:[#allocation5 + $0xb8] sm:$0xf] }
  0x81   : > { %766 = vmatpush.bf16.msrb.mxu2 %v5332_v51  ;;  %v5352_v9 = vor.u32 %v7116_v6, %v5349_v7  ;;  %v7142_v11 = vld [vmem:[#allocation5 + $0xf8] sm:$0xf0]  ;;  %v5425_v13 = vld [vmem:[#allocation5 + $0xfc] sm:$0xf0]  ;;  %v7143_v15 = vld [vmem:[#allocation5 + $0x100] sm:$0xf0] }
  0x82   : > { %779 = vmatpush.bf16.msrb.mxu3 %v5336_v56  ;;  %v7134_v12 = vld [vmem:[#allocation5 + $0xbc] sm:$0xf]  ;;  %v5431_v14 = vld [vmem:[#allocation5 + $0xc0] sm:$0xf]  ;;  %v7135_v16 = vld [vmem:[#allocation5 + $0xc4] sm:$0xf]  ;;  %v5424_v18 = vor.u32 %v7142_v11, %v5423_v10 }
  0x83   : > { %791 = vmatpush.bf16.msra.mxu0 %v5408_v52  ;;  %v5433_v17 = vld [vmem:[#allocation5 + $0x104] sm:$0xf0]  ;;  %v5428_v19 = vor.u32 %v7134_v12, %v5425_v13  ;;  %v5432_v20 = vor.u32 %v7143_v15, %v5431_v14  ;;  %v5355_v21 = vld [vmem:[#allocation5 + $0x30] sm:$0xf]  ;;  %v7125_v22 = vld [vmem:[#allocation5 + $0x70] sm:$0xf0] }
  0x84   : > { %804 = vmatpush.bf16.msra.mxu1 %v5412_v57  ;;  %v7117_v23 = vld [vmem:[#allocation5 + $0x34] sm:$0xf]  ;;  %v5436_v24 = vor.u32 %v7135_v16, %v5433_v17  ;;  %v5357_v25 = vld [vmem:[#allocation5 + $0x74] sm:$0xf0]  ;;  %v7126_v28 = vld [vmem:[#allocation5 + $0x78] sm:$0xf0]  ;;  %v5356_v31 = vor.u32 %v7125_v22, %v5355_v21 }
  0x85   : > { %817 = vmatpush.bf16.msra.mxu2 %v5416_v58  ;;  %v5363_v27 = vld [vmem:[#allocation5 + $0x38] sm:$0xf]  ;;  %v7118_v29 = vld [vmem:[#allocation5 + $0x3c] sm:$0xf]  ;;  %v5365_v30 = vld [vmem:[#allocation5 + $0x7c] sm:$0xf0]  ;;  %v5360_v32 = vor.u32 %v7117_v23, %v5357_v25 }
  0x86   : > { %830 = vmatpush.bf16.msra.mxu3 %v5420_v62  ;;  %v5364_v33 = vor.u32 %v7126_v28, %v5363_v27  ;;  %v5368_v34 = vor.u32 %v7118_v29, %v5365_v30  ;;  %v5439_v35 = vld [vmem:[#allocation5 + $0xc8] sm:$0xf]  ;;  %v7144_v36 = vld [vmem:[#allocation5 + $0x108] sm:$0xf0]  ;;  %v5371_v38 = vld [vmem:[#allocation5 + $0x40] sm:$0xf] }
  0x87   : > { %792 = vmatpush.bf16.msra.mxu0 %v5340_v2  ;;  %v5440_v37 = vor.u32 %v7144_v36, %v5439_v35  ;;  %v7127_v39 = vld [vmem:[#allocation5 + $0x80] sm:$0xf0]  ;;  %v402_v41 = vld [vmem:[#allocation7] ss:$8 sm:$0xf]  ;;  %vm1393_vm9 = vcmask 1042434  }
  0x88   : > { %805 = vmatpush.bf16.msra.mxu1 %v5344_v3  ;;  %v5372_v40 = vor.u32 %v7127_v39, %v5371_v38  ;;  %v403_v42 = vld [vmem:[#allocation7] ss:$8 sm:$0xf0]  ;;  %vm1395_vm10 = vcmask 1041408   ;;  %s5304_s27 = sshll.u32 %s8168_s23, 3  ;;  %s7105_s1 = sshll.u32 %s8020_s25, 3 }
  0x89   : > { %818 = vmatpush.bf16.msra.mxu2 %v5348_v8  ;;  %v8223_v43 = vor.u32 %v403_v42, %v402_v41  ;;  %s5142_s12 = scalar_lea.hbm %s10010_s6, %s7105_s1  ;;  %s396_s11 = scalar_lea.vmem [#allocation13], %s5304_s27 }
  0x8a   : > { %831 = vmatpush.bf16.msra.mxu3 %v5352_v9  ;;  %5445 = vmatmul.msk.bf16.vlgmr.msrb.gmra.mxu0 %vm677_vm0, %v8187_v26  ;;  %s5144_s29 = sshll.u32 %s396_s11, 4  ;;  %s5146_s21 = sshll.u32 %s5142_s12, 4  ;;  %s5145_s29 = int_to_ptr.vmem [resolvable:$true] %s5144_s29  ;;  %s5147_s21 = int_to_ptr.hbm [resolvable:$true] %s5146_s21 }
  0x8b   : > { %5446 = vmatmul.msk.bf16.vlgmr.msrb.gmra.mxu1 %vm677_vm0, %v8187_v26  ;;  %843 = vmatpush.bf16.msrb.mxu0 %v5424_v18  ;;  %v471_v44 = vperm.slane %v8223_v43, 0  ;;  %v472_v45 = vperm.slane %v8223_v43, 1  ;;  %v473_v52 = vperm.slane %v8223_v43, 2  ;;  %v474_v54 = vperm.slane %v8223_v43, 3  ;;  %s5132_s16 = scalar_lea.sflag [#allocation4], %s8168_s23  ;;  %s7890_s9 = sshra.s32 %s5147_s21, 4  ;;  %s7891_s9 = int_to_ptr.hbm [resolvable:$true] %s7890_s9 }
  0x8c   : > { %5447 = vmatmul.msk.bf16.vlgmr.msrb.gmra.mxu2 %vm677_vm0, %v8187_v26  ;;  %856 = vmatpush.bf16.msrb.mxu1 %v5428_v19  ;;  %v475_v8 = vperm.slane %v8223_v43, 4  ;;  %v476_v11 = vperm.slane %v8223_v43, 5  ;;  %v477_v36 = vperm.slane %v8223_v43, 6  ;;  %s7892_s3 = scalar_lea.hbm %s7891_s9, 8  ;;  %s7896_s28 = scalar_lea.hbm %s10010_s6, 48 }
  0x8d   : > { %5448 = vmatmul.msk.bf16.vlgmr.msrb.gmra.mxu3 %vm677_vm0, %v8187_v26  ;;  %869 = vmatpush.bf16.msrb.mxu2 %v5432_v20  ;;  %p7893_p4 = scmp.ne.s32.totalorder %s7891_s9, %s7892_s3  ;;  %p7897_p2 = scmp.lt.s32.totalorder %s7891_s9, %s10010_s6 }
  0x8e   : > { %882 = vmatpush.bf16.msrb.mxu3 %v5436_v24  ;;  %p7898_p11 = scmp.lt.s32.totalorder %s7896_s28, %s7892_s3 }
  0x8f   : > { %844 = vmatpush.bf16.msrb.mxu0 %v5356_v31  ;;  %p7894_p8 = pnand %p7893_p4, %p8071_p5 }
  0x90   : > { %857 = vmatpush.bf16.msrb.mxu1 %v5360_v32  ;;  %p7899_p10 = por %p7898_p11, %p7897_p2 }
  0x91   : > { %870 = vmatpush.bf16.msrb.mxu2 %v5364_v33  ;;  %p7895_p7 = pneg %p7894_p8 }
  0x92   : > { %883 = vmatpush.bf16.msrb.mxu3 %v5368_v34 }
  0x93   : > { %p7900_p12 = pnand %p7899_p10, %p7895_p7 }
  0x9a   : > { %5449 = vmatmul.msk.bf16.vlgmr.msra.gmra.mxu0 %vm677_vm0, %v8187_v26 }
  0x9b   : > { %5450 = vmatmul.msk.bf16.vlgmr.msra.gmra.mxu1 %vm677_vm0, %v8187_v26  ;;  %895 = vmatpush.bf16.msra.mxu0 %v5440_v37 }
  0x9c   : > { %5451 = vmatmul.msk.bf16.vlgmr.msra.gmra.mxu2 %vm677_vm0, %v8187_v26 }
  0x9d   : > { %5452 = vmatmul.msk.bf16.vlgmr.msra.gmra.mxu3 %vm677_vm0, %v8187_v26 }
  0x9f   : > { %896 = vmatpush.bf16.msra.mxu0 %v5372_v40  ;;  %v478_v40 = vperm.slane %v8223_v43, 7 }
  0xaa   : > { %5453 = vmatmul.msk.bf16.vlgmr.msrb.gmra.mxu0 %vm677_vm0, %v8187_v26 }
  0xab   : > { %5454 = vmatmul.msk.bf16.vlgmr.msrb.gmra.mxu1 %vm677_vm0, %v8187_v26 }
  0xac   : > { %5455 = vmatmul.msk.bf16.vlgmr.msrb.gmra.mxu2 %vm677_vm0, %v8187_v26 }
  0xad   : > { %5456 = vmatmul.msk.bf16.vlgmr.msrb.gmra.mxu3 %vm677_vm0, %v8187_v26 }
  0xba   : > { %5457 = vmatmul.msk.bf16.vlgmr.msra.gmra.mxu0 %vm677_vm0, %v8187_v26 }
  0xf7   : > { %v690_v46 = vpop.f32.mrf.mxu0 }
  0xf8   : > { %v691_v47 = vadd.f32 %v690_v46, %v471_v44  ;;  %v703_v48 = vpop.f32.mrf.mxu1 }
  0xf9   : > { %v704_v49 = vadd.f32 %v703_v48, %v472_v45 }
  0xfa   : > { %v902_v50 = vrot.slane %v691_v47, 4 }
  0xfb   : > { %v908_v51 = vrot.slane %v704_v49, 4 }
  0xfc   : > { %v903_v53 = vadd.f32 %v902_v50, %v691_v47 }
  0xfd   : > { %v909_v26 = vadd.f32 %v908_v51, %v704_v49 }
  0xfe   : > { %v904_v55 = vrot.slane %v903_v53, 2 }
  0xff   : > { %v716_v56 = vpop.f32.mrf.mxu2  ;;  %v910_v57 = vrot.slane %v909_v26, 2  ;;  %v692_v60 = vpop.f32.mrf.mxu0 }
 0x100   : > { %v717_v58 = vadd.f32 %v716_v56, %v473_v52  ;;  %v729_v59 = vpop.f32.mrf.mxu3  ;;  %v905_v61 = vadd.f32 %v904_v55, %v903_v53  ;;  %v705_v63 = vpop.f32.mrf.mxu1 }
 0x101   : > { %v730_v62 = vadd.f32 %v729_v59, %v474_v54  ;;  %v911_v0 = vadd.f32 %v910_v57, %v909_v26 }
 0x102   : > { %v914_v1 = vrot.slane %v717_v58, 4  ;;  %v906_v2 = vrot.slane %v905_v61, 1 }
 0x103   : > { %v920_v3 = vrot.slane %v730_v62, 4  ;;  %v912_v4 = vrot.slane %v911_v0, 1 }
 0x104   : > { %v915_v5 = vadd.f32 %v914_v1, %v717_v58  ;;  %v907_v6 = vadd.f32 %v906_v2, %v905_v61 }
 0x105   : > { %v921_v7 = vadd.f32 %v920_v3, %v730_v62  ;;  %v913_v9 = vadd.f32 %v912_v4, %v911_v0 }
 0x106   : > { %v916_v10 = vrot.slane %v915_v5, 2  ;;  %v1004_v12 = vmul.f32 0.125, %v907_v6  ;;  %v406_v6 = vld [vmem:[#allocation7 + $0x40] ss:$8 sm:$0xf] }
 0x107   : > { %v922_v13 = vrot.slane %v921_v7, 2  ;;  %v718_v14 = vpop.f32.mrf.mxu2  ;;  %v1005_v15 = vmul.f32 0.125, %v913_v9  ;;  %v742_v18 = vpop.f32.mrf.mxu0 }
 0x108   : > { %v917_v16 = vadd.f32 %v916_v10, %v915_v5  ;;  %v731_v17 = vpop.f32.mrf.mxu3  ;;  %v8231_v19 = vsub.f32 %v691_v47, %v1004_v12  ;;  %v8233_v21 = vadd.f32 %v742_v18, %v475_v8  ;;  %v755_v22 = vpop.f32.mrf.mxu1  ;;  %v407_v10 = vld [vmem:[#allocation7 + $0x40] ss:$8 sm:$0xf0] }
 0x109   : > { %v923_v20 = vadd.f32 %v922_v13, %v921_v7  ;;  %v8235_v23 = vsub.f32 %v704_v49, %v1005_v15  ;;  %v8237_v25 = vadd.f32 %v755_v22, %v476_v11 }
 0x10a   : > { %v918_v24 = vrot.slane %v917_v16, 1  ;;  %v1038_v27 = vmul.f32 %v8231_v19, %v8231_v19  ;;  %v926_v29 = vrot.slane %v8233_v21, 4 }
 0x10b   : > { %v924_v28 = vrot.slane %v923_v20, 1  ;;  %v1039_v30 = vmul.f32 %v8235_v23, %v8235_v23  ;;  %v932_v32 = vrot.slane %v8237_v25, 4 }
 0x10c   : > { %v919_v31 = vadd.f32 %v918_v24, %v917_v16  ;;  %v1055_v33 = vrot.slane %v1038_v27, 4  ;;  %v927_v35 = vadd.f32 %v926_v29, %v8233_v21 }
 0x10d   : > { %v925_v34 = vadd.f32 %v924_v28, %v923_v20  ;;  %v1061_v37 = vrot.slane %v1039_v30, 4  ;;  %v933_v39 = vadd.f32 %v932_v32, %v8237_v25 }
 0x10e   : > { %v1006_v38 = vmul.f32 0.125, %v919_v31  ;;  %v1056_v41 = vadd.f32 %v1055_v33, %v1038_v27  ;;  %v928_v44 = vrot.slane %v927_v35, 2 }
 0x10f   : > { %v1007_v42 = vmul.f32 0.125, %v925_v34  ;;  %v768_v45 = vpop.f32.mrf.mxu2  ;;  %v1062_v46 = vadd.f32 %v1061_v37, %v1039_v30  ;;  %v934_v48 = vrot.slane %v933_v39, 2  ;;  %v744_v50 = vpop.f32.mrf.mxu0  ;;  %v8268_v30 = vor.u32 %v407_v10, %v406_v6 }
 0x110   : > { %v8249_v47 = vsub.f32 %v717_v58, %v1006_v38  ;;  %v781_v49 = vpop.f32.mrf.mxu3  ;;  %v1057_v51 = vrot.slane %v1056_v41, 2  ;;  %v929_v53 = vadd.f32 %v928_v44, %v927_v35  ;;  %v8253_v54 = vadd.f32 %v768_v45, %v477_v36  ;;  %v757_v26 = vpop.f32.mrf.mxu1 }
 0x111   : > { %v8251_v52 = vsub.f32 %v730_v62, %v1007_v42  ;;  %v1063_v55 = vrot.slane %v1062_v46, 2  ;;  %v935_v56 = vadd.f32 %v934_v48, %v933_v39  ;;  %v8257_v57 = vadd.f32 %v781_v49, %v478_v40 }
 0x112   : > { %v1040_v43 = vmul.f32 %v8249_v47, %v8249_v47  ;;  %v1058_v59 = vadd.f32 %v1057_v51, %v1056_v41  ;;  %v930_v60 = vrot.slane %v929_v53, 1  ;;  %v938_v61 = vrot.slane %v8253_v54, 4 }
 0x113   : > { %v1041_v58 = vmul.f32 %v8251_v52, %v8251_v52  ;;  %v1064_v62 = vadd.f32 %v1063_v55, %v1062_v46  ;;  %v936_v0 = vrot.slane %v935_v56, 1  ;;  %v944_v1 = vrot.slane %v8257_v57, 4 }
 0x114   : > { %v1067_v63 = vrot.slane %v1040_v43, 4  ;;  %v1059_v2 = vrot.slane %v1058_v59, 1  ;;  %v931_v4 = vadd.f32 %v930_v60, %v929_v53  ;;  %v939_v5 = vadd.f32 %v938_v61, %v8253_v54 }
 0x115   : > { %v1073_v3 = vrot.slane %v1041_v58, 4  ;;  %v1065_v7 = vrot.slane %v1064_v62, 1  ;;  %v937_v9 = vadd.f32 %v936_v0, %v935_v56  ;;  %v945_v14 = vadd.f32 %v944_v1, %v8257_v57 }
 0x116   : > { %v1068_v8 = vadd.f32 %v1067_v63, %v1040_v43  ;;  %v1060_v11 = vadd.f32 %v1059_v2, %v1058_v59  ;;  %v1008_v13 = vmul.f32 0.125, %v931_v4  ;;  %v940_v20 = vrot.slane %v939_v5, 2 }
 0x117   : > { %v1074_v12 = vadd.f32 %v1073_v3, %v1041_v58  ;;  %v770_v15 = vpop.f32.mrf.mxu2  ;;  %v1066_v16 = vadd.f32 %v1065_v7, %v1064_v62  ;;  %v1009_v18 = vmul.f32 0.125, %v937_v9  ;;  %v794_v24 = vpop.f32.mrf.mxu0  ;;  %v946_v39 = vrot.slane %v945_v14, 2 }
 0x118   : > { %v1069_v17 = vrot.slane %v1068_v8, 2  ;;  %v783_v22 = vpop.f32.mrf.mxu3  ;;  %v1157_v27 = vmul.f32 0.125, %v1060_v11  ;;  %v8266_v29 = vsub.f32 %v8233_v21, %v1008_v13  ;;  %v807_v31 = vpop.f32.mrf.mxu1  ;;  %v941_v35 = vadd.f32 %v940_v20, %v939_v5 }
 0x119   : > { %v1075_v28 = vrot.slane %v1074_v12, 2  ;;  %v1158_v32 = vmul.f32 0.125, %v1066_v16  ;;  %v8271_v34 = vsub.f32 %v8237_v25, %v1009_v18  ;;  %v479_v45 = vperm.slane %v8268_v30, 0 }
 0x11a   : > { %v1070_v33 = vadd.f32 %v1069_v17, %v1068_v8  ;;  %v8273_v36 = vadd.f32 1e-05, %v1157_v27  ;;  %v1042_v38 = vmul.f32 %v8266_v29, %v8266_v29  ;;  %v942_v42 = vrot.slane %v941_v35, 1 }
 0x11b   : > { %v1076_v37 = vadd.f32 %v1075_v28, %v1074_v12  ;;  %v8277_v40 = vadd.f32 1e-05, %v1158_v32  ;;  %v1043_v41 = vmul.f32 %v8271_v34, %v8271_v34  ;;  %v480_v49 = vperm.slane %v8268_v30, 1 }
 0x11c   : > { %v1071_v21 = vrot.slane %v1070_v33, 1  ;;  %7655 = vrsqrt.f32 %v8273_v36  ;;  %v1079_v25 = vrot.slane %v1042_v38, 4  ;;  %v943_v53 = vadd.f32 %v942_v42, %v941_v35 }
 0x11d   : > { %v1077_v44 = vrot.slane %v1076_v37, 1  ;;  %7657 = vrsqrt.f32 %v8277_v40  ;;  %v1085_v48 = vrot.slane %v1043_v41, 4  ;;  %v947_v26 = vadd.f32 %v946_v39, %v945_v14 }
 0x11e   : > { %v1072_v46 = vadd.f32 %v1071_v21, %v1070_v33  ;;  %v1080_v51 = vadd.f32 %v1079_v25, %v1042_v38  ;;  %v1010_v62 = vmul.f32 0.125, %v943_v53  ;;  %v8289_v63 = vadd.f32 %v794_v24, %v479_v45 }
 0x11f   : > { %v1078_v50 = vadd.f32 %v1077_v44, %v1076_v37  ;;  %v8285_v55 = vpop.f32.mrf.mxu2  ;;  %v1086_v56 = vadd.f32 %v1085_v48, %v1043_v41  ;;  %v796_v58 = vpop.f32.mrf.mxu0  ;;  %v8293_v3 = vadd.f32 %v807_v31, %v480_v49  ;;  %v948_v8 = vrot.slane %v947_v26, 1 }
 0x120   : > { %v1159_v43 = vmul.f32 0.125, %v1072_v46  ;;  %v8287_v59 = vpop.f32.mrf.mxu3  ;;  %v1081_v61 = vrot.slane %v1080_v51, 2  ;;  %v809_v0 = vpop.f32.mrf.mxu1  ;;  %v8300_v7 = vsub.f32 %v8253_v54, %v1010_v62  ;;  %v950_v12 = vrot.slane %v8289_v63, 4 }
 0x121   : > { %v1160_v60 = vmul.f32 0.125, %v1078_v50  ;;  %v1087_v2 = vrot.slane %v1086_v56, 2  ;;  %vm1197_vm1 = vweird.f32 %v8273_v36  ;;  %vm1207_vm2 = vweird.f32 %v8277_v40 }
 0x122   : > { %v8291_v1 = vadd.f32 1e-05, %v1159_v43  ;;  %v8295_v4 = vpop.eup %7655  ;;  %v1082_v6 = vadd.f32 %v1081_v61, %v1080_v51  ;;  %v1044_v54 = vmul.f32 %v8300_v7, %v8300_v7  ;;  %v949_v17 = vadd.f32 %v948_v8, %v947_v26 }
 0x123   : > { %v8297_v5 = vadd.f32 1e-05, %v1160_v60  ;;  %v7658_v9 = vpop.eup %7657  ;;  %v1192_v10 = vmul.f32 %v8295_v4, %v8273_v36  ;;  %v1088_v15 = vadd.f32 %v1087_v2, %v1086_v56  ;;  %v956_v18 = vrot.slane %v8293_v3, 4 }
 0x124   : > { %7659 = vrsqrt.f32 %v8291_v1  ;;  %v1202_v11 = vmul.f32 %v7658_v9, %v8277_v40  ;;  %v1083_v14 = vrot.slane %v1082_v6, 1  ;;  %v1091_v28 = vrot.slane %v1044_v54, 4 }
 0x125   : > { %7661 = vrsqrt.f32 %v8297_v5  ;;  %v1193_v13 = vmul.f32 %v8295_v4, %v1192_v10  ;;  %v1089_v27 = vrot.slane %v1088_v15, 1  ;;  %vm1198_vm4 = vweird.f32 %v8295_v4  ;;  %v7167_v10 = vld [vmem:[%s8171_s19 + $0xb0] sm:$0xf0] }
 0x126   : > { %v1203_v16 = vmul.f32 %v7658_v9, %v1202_v11  ;;  %v1084_v24 = vadd.f32 %v1083_v14, %v1082_v6  ;;  %v1011_v33 = vmul.f32 0.125, %v949_v17  ;;  %v951_v35 = vadd.f32 %v950_v12, %v8289_v63  ;;  %vm1199_vm11 = vmor %vm1197_vm1, %vm1198_vm4  ;;  %v5642_v14 = vld [vmem:[%s8171_s19 + $0x168] sm:$0xf] }
 0x127   : > { %v822_v20 = vpop.f32.mrf.mxu2  ;;  %v1194_v22 = vmul.f32 0.5, %v1193_v13  ;;  %v1090_v21 = vadd.f32 %v1089_v27, %v1088_v15  ;;  %v1092_v41 = vadd.f32 %v1091_v28, %v1044_v54  ;;  %vm1208_vm5 = vweird.f32 %v7658_v9  ;;  %v8342_v40 = vpop.f32.mrf.mxu0  ;;  %v7191_v15 = vld [vmem:[%s8171_s19 + $0x170] sm:$0xf0] }
 0x128   : > { %v835_v31 = vpop.f32.mrf.mxu3  ;;  %v1204_v32 = vmul.f32 0.5, %v1203_v16  ;;  %v1161_v39 = vmul.f32 0.125, %v1084_v24  ;;  %vm1217_vm6 = vweird.f32 %v8291_v1  ;;  %v8324_v45 = vadd.f32 %v956_v18, %v8293_v3  ;;  %vm1209_vm7 = vmor %vm1207_vm2, %vm1208_vm5  ;;  %v8344_v0 = vpop.f32.mrf.mxu1 }
 0x129   : > { %v1195_v38 = vsub.f32 1.5, %v1194_v22  ;;  %v8332_v50 = vsub.f32 %v8257_v57, %v1011_v33  ;;  %v1162_v26 = vmul.f32 0.125, %v1090_v21  ;;  %v1093_v43 = vrot.slane %v1092_v41, 2 }
 0x12a   : > { %v8316_v37 = vpop.eup %7659  ;;  %v1205_v44 = vsub.f32 1.5, %v1204_v32  ;;  %v8329_v49 = vadd.f32 1e-05, %v1161_v39  ;;  %v952_v58 = vrot.slane %v951_v35, 2  ;;  %v958_v22 = vrot.slane %v8324_v45, 2 }
 0x12b   : > { %v8318_v42 = vpop.eup %7661  ;;  %v1212_v25 = vmul.f32 %v8316_v37, %v8291_v1  ;;  %v1196_v46 = vmul.f32 %v8295_v4, %v1195_v38  ;;  %vm1218_vm8 = vweird.f32 %v8316_v37  ;;  %v8340_v61 = vadd.f32 1e-05, %v1162_v26  ;;  %v7215_v26 = vld [vmem:[%s8171_s19 + $0x230] sm:$0xf0] }
 0x12c   : > { %v1222_v48 = vmul.f32 %v8318_v42, %v8297_v5  ;;  %v1206_v51 = vmul.f32 %v7658_v9, %v1205_v44  ;;  %7663 = vrsqrt.f32 %v8329_v49  ;;  %v1094_v62 = vadd.f32 %v1093_v43, %v1092_v41  ;;  %vm1219_vm13 = vmor %vm1217_vm6, %vm1218_vm8  ;;  %v5834_v43 = vld [vmem:[%s8171_s19 + $0x2e8] sm:$0xf] }
 0x12d   : > { %v1213_v53 = vmul.f32 %v8316_v37, %v1212_v25  ;;  %vm1228_vm12 = vweird.f32 %v8318_v42  ;;  %v1045_v8 = vmul.f32 %v8332_v50, %v8332_v50  ;;  %v1200_v11 = vsel %vm1199_vm11, %v8295_v4, %v1196_v46  ;;  %v5738_v46 = vld [vmem:[%s8171_s19 + $0x228] sm:$0xf] }
 0x12e   : > { %v1223_v56 = vmul.f32 %v8318_v42, %v1222_v48  ;;  %v1210_v57 = vsel %vm1209_vm7, %v7658_v9, %v1206_v51  ;;  %v5546_v9 = vld [vmem:[%s8171_s19 + $0xa8] sm:$0xf]  ;;  %7665 = vrsqrt.f32 %v8340_v61  ;;  %v1095_v13 = vrot.slane %v1094_v62, 1 }
 0x12f   : > { %v1214_v60 = vmul.f32 0.5, %v1213_v53  ;;  %v1377_v2 = vrot.slane %v1210_v57, 7  ;;  %v1097_v16 = vrot.slane %v1045_v8, 4  ;;  %v953_v17 = vadd.f32 %v952_v58, %v951_v35  ;;  %v848_v48 = vpop.f32.mrf.mxu0 }
 0x130   : > { %v1224_v6 = vmul.f32 0.5, %v1223_v56  ;;  %v1096_v20 = vadd.f32 %v1095_v13, %v1094_v62  ;;  %v5547_v24 = vor.u32 %v7167_v10, %v5546_v9  ;;  %vm1227_vm14 = vweird.f32 %v8297_v5  ;;  %v861_v51 = vpop.f32.mrf.mxu1  ;;  %v7239_v56 = vld [vmem:[%s8171_s19 + $0x2f0] sm:$0xf0]  ;;  %v5630_v13 = vld [vmem:[%s8171_s19 + $0x150] sm:$0xf] }
 0x131   : > { %v1215_v12 = vsub.f32 1.5, %v1214_v60  ;;  %v1392_v36 = vsel %vm1391_vm3, %v1200_v11, %v1377_v2  ;;  %v1098_v28 = vadd.f32 %v1097_v16, %v1045_v8  ;;  %v5643_v31 = vor.u32 %v7191_v15, %v5642_v14  ;;  %vm1229_vm15 = vmor %vm1227_vm14, %vm1228_vm12  ;;  %v7164_v8 = vld [vmem:[%s8171_s19 + $0x98] sm:$0xf0] }
 0x132   : > { %v1225_v54 = vsub.f32 1.5, %v1224_v6  ;;  %v8362_v27 = vpop.eup %7663  ;;  %vm1237_vm0 = vweird.f32 %v8329_v49  ;;  %v1163_v35 = vmul.f32 0.125, %v1096_v20  ;;  %4291 = vmatpush.bf16.msra.mxu1 %v5547_v24  ;;  %v954_v39 = vrot.slane %v953_v17, 1  ;;  %v5534_v6 = vld [vmem:[%s8171_s19 + $0x90] sm:$0xf]  ;;  %v8405_v24 = vpop.f32.mrf.mxu2 }
 0x133   : > { %v1216_v18 = vmul.f32 %v8316_v37, %v1215_v12  ;;  %v1232_v33 = vmul.f32 %v8362_v27, %v8329_v49  ;;  %v1099_v5 = vrot.slane %v1098_v28, 2  ;;  %4304 = vmatpush.bf16.msra.mxu2 %v5643_v31  ;;  %v959_v25 = vadd.f32 %v958_v22, %v8324_v45 }
 0x134   : > { %v1226_v4 = vmul.f32 %v8318_v42, %v1225_v54  ;;  %v8380_v44 = vadd.f32 1e-05, %v1163_v35  ;;  %vm1238_vm1 = vweird.f32 %v8362_v27  ;;  %vm1247_vm2 = vweird.f32 %v8340_v61 }
 0x135   : > { %v1220_v32 = vsel %vm1219_vm13, %v8316_v37, %v1216_v18  ;;  %v8377_v37 = vpop.eup %7665  ;;  %v1233_v41 = vmul.f32 %v8362_v27, %v1232_v33  ;;  %v1100_v53 = vadd.f32 %v1099_v5, %v1098_v28  ;;  %vm1397_vm5 = vcmask 1044484   ;;  %vm1239_vm6 = vmor %vm1237_vm0, %vm1238_vm1  ;;  %v5726_v5 = vld [vmem:[%s8171_s19 + $0x210] sm:$0xf] }
 0x136   : > { %v1378_v1 = vrot.slane %v1220_v32, 6  ;;  %v1230_v38 = vsel %vm1229_vm15, %v8318_v42, %v1226_v4  ;;  %v1242_v42 = vmul.f32 %v8377_v37, %v8340_v61  ;;  %vm1248_vm4 = vweird.f32 %v8377_v37 }
 0x137   : > { %v1379_v21 = vrot.slane %v1230_v38, 5  ;;  %v1234_v45 = vmul.f32 0.5, %v1233_v41  ;;  %7667 = vrsqrt.f32 %v8380_v44  ;;  %v1101_v62 = vrot.slane %v1100_v53, 1  ;;  %v5822_v41 = vld [vmem:[%s8171_s19 + $0x2d0] sm:$0xf]  ;;  %vm1249_vm8 = vmor %vm1247_vm2, %vm1248_vm4 }
 0x138   : > { %v1243_v60 = vmul.f32 %v8377_v37, %v1242_v42  ;;  %v955_v2 = vadd.f32 %v954_v39, %v953_v17  ;;  %v960_v10 = vrot.slane %v959_v25, 1  ;;  %v5739_v11 = vor.u32 %v7215_v26, %v5738_v46  ;;  %v7212_v39 = vld [vmem:[%s8171_s19 + $0x218] sm:$0xf0]  ;;  %v7161_v42 = vld [vmem:[%s8171_s19 + $0x80] sm:$0xf0] }
 0x139   : > { %v1394_v58 = vsel %vm1393_vm9, %v1378_v1, %v1379_v21  ;;  %v1235_v9 = vsub.f32 1.5, %v1234_v45  ;;  %v5835_v12 = vor.u32 %v7239_v56, %v5834_v43  ;;  %v1102_v15 = vadd.f32 %v1101_v62, %v1100_v53  ;;  %v8445_v53 = vpop.f32.mrf.mxu3  ;;  %v7185_v45 = vld [vmem:[%s8171_s19 + $0x140] sm:$0xf0]  ;;  %v5714_v62 = vld [vmem:[%s8171_s19 + $0x1f8] sm:$0xf] }
 0x13a   : > { %v8395_v57 = vsel %vm1395_vm10, %v1392_v36, %v1394_v58  ;;  %v1244_v14 = vmul.f32 0.5, %v1243_v60  ;;  %v1012_v54 = vmul.f32 0.125, %v955_v2  ;;  %v481_v16 = vperm.slane %v8268_v30, 2  ;;  %v7188_v36 = vld [vmem:[%s8171_s19 + $0x158] sm:$0xf0]  ;;  %4317 = vmatpush.bf16.msra.mxu3 %v5739_v11 }
 0x13b   : > { %v1236_v18 = vmul.f32 %v8362_v27, %v1235_v9  ;;  %v961_v20 = vadd.f32 %v960_v10, %v959_v25  ;;  %4330 = vmatpush.bf16.msrb.mxu0 %v5835_v12  ;;  %v482_v17 = vperm.slane %v8268_v30, 3  ;;  %v5535_v22 = vor.u32 %v7164_v8, %v5534_v6  ;;  %v5522_v25 = vld [vmem:[%s8171_s19 + $0x78] sm:$0xf]  ;;  %v7209_v2 = vld [vmem:[%s8171_s19 + $0x200] sm:$0xf0] }
 0x13c   : > { %v1245_v4 = vsub.f32 1.5, %v1244_v14  ;;  %v1164_v28 = vmul.f32 0.125, %v1102_v15  ;;  %v8412_v31 = vsub.f32 %v8289_v63, %v1012_v54  ;;  %v8415_v32 = vadd.f32 %v8285_v55, %v481_v16  ;;  %v5618_v58 = vld [vmem:[%s8171_s19 + $0x138] sm:$0xf]  ;;  %v7233_v11 = vld [vmem:[%s8171_s19 + $0x2c0] sm:$0xf0]  ;;  %v874_v16 = vpop.f32.mrf.mxu2 }
 0x13d   : > { %v8417_v33 = vpop.eup %7667  ;;  %v1240_v35 = vsel %vm1239_vm6, %v8362_v27, %v1236_v18  ;;  %v1013_v1 = vmul.f32 0.125, %v961_v20  ;;  %v8421_v38 = vadd.f32 %v8287_v59, %v482_v17  ;;  %4292 = vmatpush.bf16.msra.mxu1 %v5535_v22  ;;  %v5631_v49 = vor.u32 %v7188_v36, %v5630_v13  ;;  %v7236_v27 = vld [vmem:[%s8171_s19 + $0x2d8] sm:$0xf0]  ;;  %v5810_v10 = vld [vmem:[%s8171_s19 + $0x2b8] sm:$0xf] }
 0x13e   : > { %v1380_v21 = vrot.slane %v1240_v35, 4  ;;  %v1246_v63 = vmul.f32 %v8377_v37, %v1245_v4  ;;  %v1252_v55 = vmul.f32 %v8417_v33, %v8380_v44  ;;  %vm1257_vm7 = vweird.f32 %v8380_v44  ;;  %v5510_v54 = vld [vmem:[%s8171_s19 + $0x60] sm:$0xf]  ;;  %v7158_v22 = vld [vmem:[%s8171_s19 + $0x68] sm:$0xf0] }
 0x13f   : > { %v8436_v59 = vadd.f32 1e-05, %v1164_v28  ;;  %v1046_v46 = vmul.f32 %v8412_v31, %v8412_v31  ;;  %v8441_v48 = vsub.f32 %v8293_v3, %v1013_v1  ;;  %v962_v51 = vrot.slane %v8415_v32, 4  ;;  %4305 = vmatpush.bf16.msra.mxu2 %v5631_v49 }
 0x140   : > { %v1250_v26 = vsel %vm1249_vm8, %v8377_v37, %v1246_v63  ;;  %v1253_v61 = vmul.f32 %v8417_v33, %v1252_v55  ;;  %v968_v43 = vrot.slane %v8421_v38, 4  ;;  %v5727_v56 = vor.u32 %v7212_v39, %v5726_v5 }
 0x141   : > { %v1381_v3 = vrot.slane %v1250_v26, 3  ;;  %vm1258_vm11 = vweird.f32 %v8417_v33  ;;  %7669 = vrsqrt.f32 %v8436_v59  ;;  %v1103_v60 = vrot.slane %v1046_v46, 4 }
 0x142   : > { %v1254_v6 = vmul.f32 0.5, %v1253_v61  ;;  %v1047_v37 = vmul.f32 %v8441_v48, %v8441_v48  ;;  %v963_v8 = vadd.f32 %v962_v51, %v8415_v32  ;;  %v969_v9 = vadd.f32 %v968_v43, %v8421_v38  ;;  %4318 = vmatpush.bf16.msra.mxu3 %v5727_v56  ;;  %vm8476_vm12 = vmor %vm1257_vm7, %vm1258_vm11  ;;  %v887_v51 = vpop.f32.mrf.mxu3  ;;  %v5606_v61 = vld [vmem:[%s8171_s19 + $0x120] sm:$0xf]  ;;  %v7182_v43 = vld [vmem:[%s8171_s19 + $0x128] sm:$0xf0] }
 0x143   : > { %v8463_v12 = vsel %vm1397_vm5, %v1380_v21, %v1381_v3  ;;  %v1104_v13 = vadd.f32 %v1103_v60, %v1046_v46  ;;  %v5823_v14 = vor.u32 %v7236_v27, %v5822_v41  ;;  %v5523_v15 = vor.u32 %v7161_v42, %v5522_v25 }
 0x144   : > { %v1255_v36 = vsub.f32 1.5, %v1254_v6  ;;  %v1109_v18 = vrot.slane %v1047_v37, 4  ;;  %v964_v20 = vrot.slane %v963_v8, 2  ;;  %v970_v17 = vrot.slane %v969_v9, 2  ;;  %v7206_v6 = vld [vmem:[%s8171_s19 + $0x1e8] sm:$0xf0] }
 0x145   : > { %v1105_v4 = vrot.slane %v1104_v13, 2  ;;  %4331 = vmatpush.bf16.msrb.mxu0 %v5823_v14  ;;  %4293 = vmatpush.bf16.msra.mxu1 %v5523_v15  ;;  %v5619_v28 = vor.u32 %v7185_v45, %v5618_v58  ;;  %v5715_v35 = vor.u32 %v7209_v2, %v5714_v62  ;;  %v5811_v1 = vor.u32 %v7233_v11, %v5810_v10  ;;  %v5702_v2 = vld [vmem:[%s8171_s19 + $0x1e0] sm:$0xf] }
 0x146   : > { %v8468_v49 = vmul.f32 %v8417_v33, %v1255_v36  ;;  %v1110_v5 = vadd.f32 %v1109_v18, %v1047_v37  ;;  %v965_v39 = vadd.f32 %v964_v20, %v963_v8  ;;  %v971_v21 = vadd.f32 %v970_v17, %v969_v9  ;;  %v5798_v11 = vld [vmem:[%s8171_s19 + $0x2a0] sm:$0xf] }
 0x147   : > { %v8470_v63 = vpop.eup %7669  ;;  %v1106_v41 = vadd.f32 %v1105_v4, %v1104_v13  ;;  %4306 = vmatpush.bf16.msra.mxu2 %v5619_v28  ;;  %4319 = vmatpush.bf16.msra.mxu3 %v5715_v35  ;;  %v483_v27 = vperm.slane %v8268_v30, 4  ;;  %v484_v25 = vperm.slane %v8268_v30, 5  ;;  %v5511_v46 = vor.u32 %v7158_v22, %v5510_v54 }
 0x148   : > { %v1260_v42 = vsel %vm8476_vm12, %v8417_v33, %v8468_v49  ;;  %v1262_v44 = vmul.f32 %v8470_v63, %v8436_v59  ;;  %vm1267_vm13 = vweird.f32 %v8436_v59  ;;  %v1111_v26 = vrot.slane %v1110_v5, 2 }
 0x149   : > { %vm1268_vm14 = vweird.f32 %v8470_v63  ;;  %v1107_v56 = vrot.slane %v1106_v41, 1  ;;  %v966_v58 = vrot.slane %v965_v39, 1  ;;  %v972_v45 = vrot.slane %v971_v21, 1  ;;  %4332 = vmatpush.bf16.msrb.mxu0 %v5811_v1  ;;  %4294 = vmatpush.bf16.msra.mxu1 %v5511_v46  ;;  %v5594_v46 = vld [vmem:[%s8171_s19 + $0x108] sm:$0xf] }
 0x14a   : > { %v1263_v33 = vmul.f32 %v8470_v63, %v1262_v44  ;;  %vm1399_vm15 = vcmask 1046534   ;;  %v1112_v3 = vadd.f32 %v1111_v26, %v1110_v5  ;;  %v8494_v60 = vadd.f32 %v8342_v40, %v483_v27  ;;  %v7230_v40 = vld [vmem:[%s8171_s19 + $0x2a8] sm:$0xf0]  ;;  %v5498_v5 = vld [vmem:[%s8171_s19 + $0x48] sm:$0xf]  ;;  %vm1269_vm2 = vmor %vm1267_vm13, %vm1268_vm14 }
 0x14b   : > { %v8497_v62 = vadd.f32 %v8344_v0, %v484_v25  ;;  %vm1401_vm0 = vcmask 1045508   ;;  %v1108_v37 = vadd.f32 %v1107_v56, %v1106_v41  ;;  %v967_v8 = vadd.f32 %v966_v58, %v965_v39  ;;  %v7155_v27 = vld [vmem:[%s8171_s19 + $0x50] sm:$0xf0] }
 0x14c   : > { %v973_v9 = vadd.f32 %v972_v45, %v971_v21  ;;  %v5607_v10 = vor.u32 %v7182_v43, %v5606_v61  ;;  %v1264_v13 = vmul.f32 0.5, %v1263_v33  ;;  %vm1403_vm1 = vcmask 1043456   ;;  %v7179_v26 = vld [vmem:[%s8171_s19 + $0x110] sm:$0xf0]  ;;  %v5690_v61 = vld [vmem:[%s8171_s19 + $0x1c8] sm:$0xf] }
 0x14d   : > { %v1113_v14 = vrot.slane %v1112_v3, 1  ;;  %v974_v15 = vrot.slane %v8494_v60, 4  ;;  %v980_v54 = vrot.slane %v8497_v62, 4  ;;  %v1165_v16 = vmul.f32 0.125, %v1108_v37  ;;  %v7203_v33 = vld [vmem:[%s8171_s19 + $0x1d0] sm:$0xf0] }
 0x14e   : > { %v1014_v0 = vmul.f32 0.125, %v967_v8  ;;  %v1015_v36 = vmul.f32 0.125, %v973_v9  ;;  %4307 = vmatpush.bf16.msra.mxu2 %v5607_v10  ;;  %v5703_v18 = vor.u32 %v7206_v6, %v5702_v2  ;;  %v1265_v20 = vsub.f32 1.5, %v1264_v13  ;;  %v5786_v6 = vld [vmem:[%s8171_s19 + $0x288] sm:$0xf] }
 0x14f   : > { %v1114_v17 = vadd.f32 %v1113_v14, %v1112_v3  ;;  %v975_v22 = vadd.f32 %v974_v15, %v8494_v60  ;;  %v981_v4 = vadd.f32 %v980_v54, %v8497_v62  ;;  %v8507_v28 = vadd.f32 1e-05, %v1165_v16  ;;  %v7227_v37 = vld [vmem:[%s8171_s19 + $0x290] sm:$0xf0] }
 0x150   : > { %v8510_v35 = vsub.f32 %v8415_v32, %v1014_v0  ;;  %v8513_v1 = vsub.f32 %v8421_v38, %v1015_v36  ;;  %4320 = vmatpush.bf16.msra.mxu3 %v5703_v18  ;;  %v5799_v49 = vor.u32 %v7230_v40, %v5798_v11  ;;  %v1266_v39 = vmul.f32 %v8470_v63, %v1265_v20  ;;  %v8537_v8 = vld [vmem:[#allocation7 + $0x1] ss:$8 sm:$0xf] }
 0x151   : > { %v1166_v21 = vmul.f32 0.125, %v1114_v17  ;;  %v976_v55 = vrot.slane %v975_v22, 2  ;;  %v982_v41 = vrot.slane %v981_v4, 2  ;;  %v1382_v25 = vrot.slane %v1260_v42, 2 }
 0x152   : > { %7671 = vrsqrt.f32 %v8507_v28  ;;  %v1048_v32 = vmul.f32 %v8510_v35, %v8510_v35  ;;  %v1049_v38 = vmul.f32 %v8513_v1, %v8513_v1  ;;  %4333 = vmatpush.bf16.msrb.mxu0 %v5799_v49  ;;  %v1270_v51 = vsel %vm1269_vm2, %v8470_v63, %v1266_v39  ;;  %v8539_v63 = vld [vmem:[#allocation7 + $0x1] ss:$8 sm:$0xf0] }
 0x153   : > { %v8529_v42 = vadd.f32 1e-05, %v1166_v21  ;;  %v977_v44 = vadd.f32 %v976_v55, %v975_v22  ;;  %v983_v59 = vadd.f32 %v982_v41, %v981_v4  ;;  %v1383_v43 = vrot.slane %v1270_v51, 1 }
 0x154   : > { %v1115_v56 = vrot.slane %v1048_v32, 4  ;;  %v1121_v58 = vrot.slane %v1049_v38, 4  ;;  %v5499_v45 = vor.u32 %v7155_v27, %v5498_v5  ;;  %v5595_v13 = vor.u32 %v7179_v26, %v5594_v46 }
 0x155   : > { %7673 = vrsqrt.f32 %v8529_v42  ;;  %v978_v3 = vrot.slane %v977_v44, 1  ;;  %v984_v2 = vrot.slane %v983_v59, 1  ;;  %v1400_v9 = vsel %vm1399_vm15, %v1382_v25, %v1383_v43 }
 0x156   : > { %v1116_v10 = vadd.f32 %v1115_v56, %v1048_v32  ;;  %v1122_v11 = vadd.f32 %v1121_v58, %v1049_v38  ;;  %4295 = vmatpush.bf16.msra.mxu1 %v5499_v45  ;;  %v1402_v14 = vsel %vm1401_vm0, %v8463_v12, %v1400_v9  ;;  %v5691_v40 = vor.u32 %v7203_v33, %v5690_v61 }
 0x157   : > { %v979_v15 = vadd.f32 %v978_v3, %v977_v44  ;;  %v985_v54 = vadd.f32 %v984_v2, %v983_v59  ;;  %v1404_v0 = vsel %vm1403_vm1, %v8395_v57, %v1402_v14  ;;  %4308 = vmatpush.bf16.msra.mxu2 %v5595_v13  ;;  %v5787_v20 = vor.u32 %v7227_v37, %v5786_v6  ;;  %v5486_v37 = vld [vmem:[%s8171_s19 + $0x30] sm:$0xf] }
 0x158   : > { %v8544_v16 = vpop.eup %7671  ;;  %v1117_v36 = vrot.slane %v1116_v10, 2  ;;  %v1123_v18 = vrot.slane %v1122_v11, 2  ;;  %v414_v17 = vor.u32 %v8539_v63, %v8537_v8  ;;  %vm1277_vm4 = vweird.f32 %v8507_v28  ;;  %4321 = vmatpush.bf16.msra.mxu3 %v5691_v40  ;;  %v7152_v8 = vld [vmem:[%s8171_s19 + $0x38] sm:$0xf0]  ;;  %v5582_v63 = vld [vmem:[%s8171_s19 + $0xf0] sm:$0xf] }
 0x159   : > { %v1272_v22 = vmul.f32 %v8544_v16, %v8507_v28  ;;  %v1016_v12 = vmul.f32 0.125, %v979_v15  ;;  %v1017_v5 = vmul.f32 0.125, %v985_v54  ;;  %4334 = vmatpush.bf16.msrb.mxu0 %v5787_v20  ;;  %v485_v57 = vperm.slane %v8268_v30, 6  ;;  %v7176_v40 = vld [vmem:[%s8171_s19 + $0xf8] sm:$0xf0] }
 0x15a   : > { %v1118_v4 = vadd.f32 %v1117_v36, %v1116_v10  ;;  %v1124_v49 = vadd.f32 %v1123_v18, %v1122_v11  ;;  %vm1287_vm6 = vweird.f32 %v8529_v42  ;;  %v486_v41 = vperm.slane %v8268_v30, 7  ;;  %v5678_v36 = vld [vmem:[%s8171_s19 + $0x1b0] sm:$0xf]  ;;  %v7200_v28 = vld [vmem:[%s8171_s19 + $0x1b8] sm:$0xf0] }
 0x15b   : > { %v7674_v39 = vpop.eup %7673  ;;  %v1273_v21 = vmul.f32 %v8544_v16, %v1272_v22  ;;  %v8557_v55 = vsub.f32 %v8494_v60, %v1016_v12  ;;  %vm1278_vm7 = vweird.f32 %v8544_v16  ;;  %v8565_v51 = vsub.f32 %v8497_v62, %v1017_v5  ;;  %v5774_v12 = vld [vmem:[%s8171_s19 + $0x270] sm:$0xf]  ;;  %v7149_v5 = vld [vmem:[%s8171_s19 + $0x20] sm:$0xf0] }
 0x15c   : > { %v1282_v27 = vmul.f32 %v7674_v39, %v8529_v42  ;;  %v1119_v25 = vrot.slane %v1118_v4, 1  ;;  %v1125_v32 = vrot.slane %v1124_v49, 1  ;;  %vm1288_vm8 = vweird.f32 %v7674_v39  ;;  %vm8590_vm11 = vmor %vm1277_vm4, %vm1278_vm7 }
 0x15d   : > { %v1274_v38 = vmul.f32 0.5, %v1273_v21  ;;  %v1050_v46 = vmul.f32 %v8557_v55, %v8557_v55  ;;  %v8568_v30 = vadd.f32 %v8405_v24, %v485_v57  ;;  %v1051_v43 = vmul.f32 %v8565_v51, %v8565_v51  ;;  %vm1289_vm12 = vmor %vm1287_vm6, %vm1288_vm8 }
 0x15e   : > { %v1283_v44 = vmul.f32 %v7674_v39, %v1282_v27  ;;  %v1120_v60 = vadd.f32 %v1119_v25, %v1118_v4  ;;  %v1126_v59 = vadd.f32 %v1125_v32, %v1124_v49  ;;  %v8573_v56 = vadd.f32 %v8445_v53, %v486_v41  ;;  %v7224_v4 = vld [vmem:[%s8171_s19 + $0x278] sm:$0xf0]  ;;  %v5570_v25 = vld [vmem:[%s8171_s19 + $0xd8] sm:$0xf]  ;;  %v7173_v32 = vld [vmem:[%s8171_s19 + $0xe0] sm:$0xf0] }
 0x15f   : > { %v1275_v26 = vsub.f32 1.5, %v1274_v38  ;;  %v1127_v61 = vrot.slane %v1050_v46, 4  ;;  %v986_v33 = vrot.slane %v8568_v30, 4  ;;  %v1133_v24 = vrot.slane %v1051_v43, 4 }
 0x160   : > { %v1284_v58 = vmul.f32 0.5, %v1283_v44  ;;  %v1167_v62 = vmul.f32 0.125, %v1120_v60  ;;  %v1168_v45 = vmul.f32 0.125, %v1126_v59  ;;  %v992_v6 = vrot.slane %v8573_v56, 4  ;;  %v5666_v60 = vld [vmem:[%s8171_s19 + $0x198] sm:$0xf] }
 0x161   : > { %v1276_v3 = vmul.f32 %v8544_v16, %v1275_v26  ;;  %v1128_v2 = vadd.f32 %v1127_v61, %v1050_v46  ;;  %v987_v11 = vadd.f32 %v986_v33, %v8568_v30  ;;  %v1134_v15 = vadd.f32 %v1133_v24, %v1051_v43  ;;  %v7197_v59 = vld [vmem:[%s8171_s19 + $0x1a0] sm:$0xf0]  ;;  %v5762_v33 = vld [vmem:[%s8171_s19 + $0x258] sm:$0xf] }
 0x162   : > { %v1285_v53 = vsub.f32 1.5, %v1284_v58  ;;  %v8581_v9 = vadd.f32 1e-05, %v1167_v62  ;;  %v8583_v10 = vadd.f32 1e-05, %v1168_v45  ;;  %v993_v54 = vadd.f32 %v992_v6, %v8573_v56 }
 0x163   : > { %v1129_v14 = vrot.slane %v1128_v2, 2  ;;  %v8597_v18 = vmul.f32 %v1404_v0, %v414_v17  ;;  %v1280_v20 = vsel %vm8590_vm11, %v8544_v16, %v1276_v3  ;;  %v1135_v17 = vrot.slane %v1134_v15, 2  ;;  %v5474_v16 = vld [vmem:[%s8171_s19 + $0x18] sm:$0xf] }
 0x164   : > { %v1286_v22 = vmul.f32 %v7674_v39, %v1285_v53  ;;  %7675 = vrsqrt.f32 %v8581_v9  ;;  %v988_v49 = vrot.slane %v987_v11, 2  ;;  %v994_v21 = vrot.slane %v993_v54, 2 }
 0x165   : > { %7677 = vrsqrt.f32 %v8583_v10  ;;  %v1130_v0 = vadd.f32 %v1129_v14, %v1128_v2  ;;  %v5487_v41 = vor.u32 %v7152_v8, %v5486_v37  ;;  %v5583_v27 = vor.u32 %v7176_v40, %v5582_v63  ;;  %v7221_v8 = vld [vmem:[%s8171_s19 + $0x260] sm:$0xf0]  ;;  %v5462_v63 = vld [vmem:[%s8171_s19] sm:$0xf] }
 0x166   : > { %v1290_v57 = vsel %vm1289_vm12, %v7674_v39, %v1286_v22  ;;  %v1136_v42 = vadd.f32 %v1135_v17, %v1134_v15  ;;  %v989_v44 = vadd.f32 %v988_v49, %v987_v11  ;;  %v995_v26 = vadd.f32 %v994_v21, %v993_v54  ;;  %v7146_v15 = vld [vmem:[%s8171_s19 + $0x8] sm:$0xf0]  ;;  %v5558_v54 = vld [vmem:[%s8171_s19 + $0xc0] sm:$0xf] }
 0x167   : > { %v1384_v38 = vrot.slane %v1290_v57, 7  ;;  %v1131_v46 = vrot.slane %v1130_v0, 1  ;;  %4296 = vmatpush.bf16.msra.mxu1 %v5487_v41  ;;  %4309 = vmatpush.bf16.msra.mxu2 %v5583_v27  ;;  %v5679_v61 = vor.u32 %v7200_v28, %v5678_v36  ;;  %v5775_v43 = vor.u32 %v7224_v4, %v5774_v12  ;;  %v7170_v22 = vld [vmem:[%s8171_s19 + $0xc8] sm:$0xf0]  ;;  %v5654_v28 = vld [vmem:[%s8171_s19 + $0x180] sm:$0xf] }
 0x168   : > { %v1137_v62 = vrot.slane %v1136_v42, 1  ;;  %v990_v45 = vrot.slane %v989_v44, 1  ;;  %v996_v2 = vrot.slane %v995_v26, 1  ;;  %v5475_v24 = vor.u32 %v7149_v5, %v5474_v16  ;;  %v7194_v12 = vld [vmem:[%s8171_s19 + $0x188] sm:$0xf0] }
 0x169   : > { %v8617_v39 = vsel %vm1391_vm3, %v1280_v20, %v1384_v38  ;;  %v1132_v58 = vadd.f32 %v1131_v46, %v1130_v0  ;;  %4322 = vmatpush.bf16.msra.mxu3 %v5679_v61  ;;  %4335 = vmatpush.bf16.msrb.mxu0 %v5775_v43  ;;  %v5571_v6 = vor.u32 %v7173_v32, %v5570_v25  ;;  %vm1297_vm13 = vweird.f32 %v8581_v9  ;;  %v5750_v16 = vld [vmem:[%s8171_s19 + $0x240] sm:$0xf]  ;;  %v7218_v5 = vld [vmem:[%s8171_s19 + $0x248] sm:$0xf0]  ;;  %v5930_v25 = vld [vmem:[%s8171_s19 + $0x3a8] sm:$0xf] }
 0x16a   : > { %v8620_v3 = vpop.eup %7675  ;;  %v5667_v37 = vor.u32 %v7197_v59, %v5666_v60  ;;  %v1138_v14 = vadd.f32 %v1137_v62, %v1136_v42  ;;  %vm1307_vm14 = vweird.f32 %v8583_v10  ;;  %v991_v36 = vadd.f32 %v990_v45, %v989_v44  ;;  %v7263_v32 = vld [vmem:[%s8171_s19 + $0x3b0] sm:$0xf0]  ;;  %v6026_v38 = vld [vmem:[%s8171_s19 + $0x468] sm:$0xf] }
 0x16b   : > { %v8624_v53 = vpop.eup %7677  ;;  %v1292_v11 = vmul.f32 %v8620_v3, %v8581_v9  ;;  %v1169_v13 = vmul.f32 0.125, %v1132_v58  ;;  %v997_v20 = vadd.f32 %v996_v2, %v995_v26  ;;  %4297 = vmatpush.bf16.msra.mxu1 %v5475_v24  ;;  %4310 = vmatpush.bf16.msra.mxu2 %v5571_v6  ;;  %v5763_v49 = vor.u32 %v7221_v8, %v5762_v33  ;;  %v7287_v46 = vld [vmem:[%s8171_s19 + $0x470] sm:$0xf0]  ;;  %v6122_v42 = vld [vmem:[%s8171_s19 + $0x528] sm:$0xf] }
 0x16c   : > { %v1302_v40 = vmul.f32 %v8624_v53, %v8583_v10  ;;  %v1170_v17 = vmul.f32 0.125, %v1138_v14  ;;  %v1018_v21 = vmul.f32 0.125, %v991_v36  ;;  %v5463_v27 = vor.u32 %v7146_v15, %v5462_v63  ;;  %v7311_v59 = vld [vmem:[%s8171_s19 + $0x530] sm:$0xf0]  ;;  %v6218_v62 = vld [vmem:[%s8171_s19 + $0x5e8] sm:$0xf] }
 0x16d   : > { %v1293_v4 = vmul.f32 %v8620_v3, %v1292_v11  ;;  %v8638_v0 = vadd.f32 1e-05, %v1169_v13  ;;  %v1019_v41 = vmul.f32 0.125, %v997_v20  ;;  %4323 = vmatpush.bf16.msra.mxu3 %v5667_v37  ;;  %vm1298_vm2 = vweird.f32 %v8620_v3  ;;  %4336 = vmatpush.bf16.msrb.mxu0 %v5763_v49  ;;  %v7335_v45 = vld [vmem:[%s8171_s19 + $0x5f0] sm:$0xf0]  ;;  %v8673_v13 = vpop.f32.mrf.mxu0 }
 0x16e   : > { %v1303_v57 = vmul.f32 %v8624_v53, %v1302_v40  ;;  %v8650_v60 = vadd.f32 1e-05, %v1170_v17  ;;  %v8654_v61 = vsub.f32 %v8568_v30, %v1018_v21  ;;  %v5559_v58 = vor.u32 %v7170_v22, %v5558_v54  ;;  %v8664_v24 = vld [vmem:[%s8171_s19 + $0x390] sm:$0xf]  ;;  %v7260_v30 = vld [vmem:[%s8171_s19 + $0x398] sm:$0xf0]  ;;  %vm8682_vm6 = vmor %vm1297_vm13, %vm1298_vm2 }
 0x16f   : > { %v1294_v44 = vmul.f32 0.5, %v1293_v4  ;;  %7679 = vrsqrt.f32 %v8638_v0  ;;  %v8657_v43 = vsub.f32 %v8573_v56, %v1019_v41  ;;  %4298 = vmatpush.bf16.msra.mxu1 %v5463_v27  ;;  %vm1308_vm4 = vweird.f32 %v8624_v53  ;;  %v6014_v63 = vld [vmem:[%s8171_s19 + $0x450] sm:$0xf]  ;;  %v7284_v11 = vld [vmem:[%s8171_s19 + $0x458] sm:$0xf0] }
 0x170   : > { %v1304_v26 = vmul.f32 0.5, %v1303_v57  ;;  %7681 = vrsqrt.f32 %v8650_v60  ;;  %v5655_v2 = vor.u32 %v7194_v12, %v5654_v28  ;;  %v1052_v56 = vmul.f32 %v8654_v61, %v8654_v61  ;;  %4311 = vmatpush.bf16.msra.mxu2 %v5559_v58  ;;  %v6110_v36 = vld [vmem:[%s8171_s19 + $0x510] sm:$0xf]  ;;  %v7308_v20 = vld [vmem:[%s8171_s19 + $0x518] sm:$0xf0]  ;;  %vm8699_vm7 = vmor %vm1307_vm14, %vm1308_vm4 }
 0x171   : > { %v1295_v33 = vsub.f32 1.5, %v1294_v44  ;;  %v1053_v37 = vmul.f32 %v8657_v43, %v8657_v43  ;;  %v5751_v8 = vor.u32 %v7218_v5, %v5750_v16  ;;  %v5931_v15 = vor.u32 %v7263_v32, %v5930_v25  ;;  %v6206_v49 = vld [vmem:[%s8171_s19 + $0x5d0] sm:$0xf]  ;;  %v7332_v16 = vld [vmem:[%s8171_s19 + $0x5d8] sm:$0xf0] }
 0x172   : > { %v1305_v6 = vsub.f32 1.5, %v1304_v26  ;;  %4324 = vmatpush.bf16.msra.mxu3 %v5655_v2  ;;  %v6027_v54 = vor.u32 %v7287_v46, %v6026_v38  ;;  %v6123_v40 = vor.u32 %v7311_v59, %v6122_v42  ;;  %v1139_v12 = vrot.slane %v1052_v56, 4  ;;  %v5906_v25 = vld [vmem:[%s8171_s19 + $0x378] sm:$0xf]  ;;  %v7257_v32 = vld [vmem:[%s8171_s19 + $0x380] sm:$0xf0] }
 0x173   : > { %v1296_v14 = vmul.f32 %v8620_v3, %v1295_v33  ;;  %v1145_v4 = vrot.slane %v1053_v37, 4  ;;  %4337 = vmatpush.bf16.msrb.mxu0 %v5751_v8  ;;  %v6219_v17 = vor.u32 %v7335_v45, %v6218_v62  ;;  %v1427_v57 = vperm.slane %v8597_v18, 7  ;;  %4343 = vmatpush.bf16.msrb.mxu1 %v5931_v15  ;;  %v6002_v46 = vld [vmem:[%s8171_s19 + $0x438] sm:$0xf]  ;;  %v7281_v42 = vld [vmem:[%s8171_s19 + $0x440] sm:$0xf0] }
 0x174   : > { %v1306_v28 = vmul.f32 %v8624_v53, %v1305_v6  ;;  %4356 = vmatpush.bf16.msrb.mxu2 %v6027_v54  ;;  %v5919_v41 = vor.u32 %v7260_v30, %v8664_v24  ;;  %v6015_v27 = vor.u32 %v7284_v11, %v6014_v63  ;;  %vm1317_vm8 = vweird.f32 %v8638_v0  ;;  %v6098_v44 = vld [vmem:[%s8171_s19 + $0x4f8] sm:$0xf]  ;;  %v7305_v59 = vld [vmem:[%s8171_s19 + $0x500] sm:$0xf0]  ;;  %v8725_v8 = vld [vmem:[%s8171_s19 + $0x360] sm:$0xf] }
 0x175   : > { %v8689_v5 = vpop.eup %7679  ;;  %v1300_v9 = vsel %vm8682_vm6, %v8620_v3, %v1296_v14  ;;  %v1140_v62 = vadd.f32 %v1139_v12, %v1052_v56  ;;  %v1146_v45 = vadd.f32 %v1145_v4, %v1053_v37  ;;  %v6194_v33 = vld [vmem:[%s8171_s19 + $0x5b8] sm:$0xf]  ;;  %v7329_v2 = vld [vmem:[%s8171_s19 + $0x5c0] sm:$0xf0]  ;;  %vm1327_vm11 = vweird.f32 %v8650_v60  ;;  %v8728_v63 = vld [vmem:[%s8171_s19 + $0x368] sm:$0xf0]  ;;  %v900_v4 = vpop.f32.mrf.mxu0 }
 0x176   : > { %v1385_v38 = vrot.slane %v1300_v9, 6  ;;  %v1310_v10 = vsel %vm8699_vm7, %v8624_v53, %v1306_v28  ;;  %v1312_v3 = vmul.f32 %v8689_v5, %v8638_v0  ;;  %4369 = vmatpush.bf16.msrb.mxu3 %v6123_v40  ;;  %v8716_v26 = vpop.eup %7681  ;;  %v6111_v53 = vor.u32 %v7308_v20, %v6110_v36  ;;  %v8731_v56 = vld [vmem:[%s8171_s19 + $0x420] sm:$0xf]  ;;  %v8736_v15 = vld [vmem:[%s8171_s19 + $0x428] sm:$0xf0] }
 0x177   : > { %4382 = vmatpush.bf16.msra.mxu0 %v6219_v17  ;;  %v1386_v58 = vrot.slane %v1310_v10, 5  ;;  %v1322_v30 = vmul.f32 %v8716_v26, %v8650_v60  ;;  %v6207_v6 = vor.u32 %v7332_v16, %v6206_v49  ;;  %vm1318_vm12 = vweird.f32 %v8689_v5  ;;  %4344 = vmatpush.bf16.msrb.mxu1 %v5919_v41  ;;  %v8739_v54 = vld [vmem:[%s8171_s19 + $0x4e0] sm:$0xf]  ;;  %v8747_v28 = vld [vmem:[%s8171_s19 + $0x4e8] sm:$0xf0] }
 0x178   : > { %v1313_v24 = vmul.f32 %v8689_v5, %v1312_v3  ;;  %v1141_v11 = vrot.slane %v1140_v62, 2  ;;  %v1147_v14 = vrot.slane %v1146_v45, 2  ;;  %4357 = vmatpush.bf16.msrb.mxu2 %v6015_v27  ;;  %v5907_v22 = vor.u32 %v7257_v32, %v5906_v25  ;;  %v8750_v12 = vld [vmem:[%s8171_s19 + $0x5a0] sm:$0xf]  ;;  %v7326_v9 = vld [vmem:[%s8171_s19 + $0x5a8] sm:$0xf0]  ;;  %vm8805_vm13 = vmor %vm1317_vm8, %vm1318_vm12 }
 0x179   : > { %v1406_v37 = vsel %vm1393_vm9, %v1385_v38, %v1386_v58  ;;  %v1323_v20 = vmul.f32 %v8716_v26, %v1322_v30  ;;  %v6003_v16 = vor.u32 %v7281_v42, %v6002_v46  ;;  %v8754_v21 = vld [vmem:[%s8171_s19 + $0x348] sm:$0xf]  ;;  %v8757_v41 = vld [vmem:[%s8171_s19 + $0x350] sm:$0xf0]  ;;  %vm1328_vm9 = vweird.f32 %v8716_v26  ;;  %v8825_v0 = vld [vmem:[%s8171_s19 + $0x578] sm:$0xf0] }
 0x17a   : > { %v8743_v40 = vsel %vm1395_vm10, %v8617_v39, %v1406_v37  ;;  %v1314_v36 = vmul.f32 0.5, %v1313_v24  ;;  %4370 = vmatpush.bf16.msrb.mxu3 %v6111_v53  ;;  %v1142_v17 = vadd.f32 %v1141_v11, %v1140_v62  ;;  %v1148_v49 = vadd.f32 %v1147_v14, %v1146_v45  ;;  %v8760_v32 = vld [vmem:[#allocation7 + $0x41] ss:$8 sm:$0xf]  ;;  %v8766_v3 = vld [vmem:[%s8171_s19 + $0x410] sm:$0xf0]  ;;  %vm8857_vm14 = vmor %vm1327_vm11, %vm1328_vm9 }
 0x17b   : > { %4383 = vmatpush.bf16.msra.mxu0 %v6207_v6  ;;  %v6099_v39 = vor.u32 %v7305_v59, %v6098_v44  ;;  %v1324_v25 = vmul.f32 0.5, %v1323_v20  ;;  %v6195_v38 = vor.u32 %v7329_v2, %v6194_v33  ;;  %v8763_v10 = vld [vmem:[%s8171_s19 + $0x408] sm:$0xf]  ;;  %v8772_v42 = vld [vmem:[%s8171_s19 + $0x4d0] sm:$0xf0]  ;;  %4345 = vmatpush.bf16.msrb.mxu1 %v5907_v22  ;;  %v5895_v62 = vor.u32 %v8728_v63, %v8725_v8 }
 0x17c   : > { %v1315_v27 = vsub.f32 1.5, %v1314_v36  ;;  %v8769_v46 = vld [vmem:[%s8171_s19 + $0x4c8] sm:$0xf]  ;;  %v1143_v44 = vrot.slane %v1142_v17, 1  ;;  %v1149_v58 = vrot.slane %v1148_v49, 1  ;;  %4358 = vmatpush.bf16.msrb.mxu2 %v6003_v16  ;;  %v5991_v45 = vor.u32 %v8736_v15, %v8731_v56 }
 0x17d   : > { %v8774_v59 = vld [vmem:[#allocation7 + $0x41] ss:$8 sm:$0xf0]  ;;  %v8784_v33 = vld [vmem:[%s8171_s19 + $0x590] sm:$0xf0]  ;;  %v1325_v24 = vsub.f32 1.5, %v1324_v25  ;;  %v6087_v30 = vor.u32 %v8747_v28, %v8739_v54  ;;  %v6183_v6 = vor.u32 %v7326_v9, %v8750_v12  ;;  %v8799_v56 = vmul.f32 %v1427_v57, %v8332_v50 }
 0x17e   : > { %v8781_v53 = vld [vmem:[%s8171_s19 + $0x588] sm:$0xf]  ;;  %v1316_v2 = vmul.f32 %v8689_v5, %v1315_v27  ;;  %4371 = vmatpush.bf16.msrb.mxu3 %v6099_v39  ;;  %v8791_v8 = vld [vmem:[%s8171_s19 + $0x330] sm:$0xf]  ;;  %v8794_v63 = vld [vmem:[%s8171_s19 + $0x338] sm:$0xf0]  ;;  %v1144_v11 = vadd.f32 %v1143_v44, %v1142_v17  ;;  %v1150_v14 = vadd.f32 %v1149_v58, %v1148_v49  ;;  %v5883_v12 = vor.u32 %v8757_v41, %v8754_v21 }
 0x17f   : > { %4384 = vmatpush.bf16.msra.mxu0 %v6195_v38  ;;  %v8810_v15 = vld [vmem:[%s8171_s19 + $0x3f0] sm:$0xf]  ;;  %v8813_v54 = vld [vmem:[%s8171_s19 + $0x3f8] sm:$0xf0]  ;;  %v1326_v22 = vmul.f32 %v8716_v26, %v1325_v24  ;;  %v8836_v4 = vld [vmem:[%s8171_s19 + $0x318] sm:$0xf]  ;;  %4346 = vmatpush.bf16.msrb.mxu1 %v5895_v62  ;;  %v5979_v25 = vor.u32 %v8766_v3, %v8763_v10  ;;  %v6075_v38 = vor.u32 %v8772_v42, %v8769_v46 }
 0x180   : > { %v8816_v50 = vld [vmem:[%s8171_s19 + $0x4b0] sm:$0xf]  ;;  %v8819_v57 = vld [vmem:[%s8171_s19 + $0x4b8] sm:$0xf0]  ;;  %v1320_v20 = vsel %vm8805_vm13, %v8689_v5, %v1316_v2  ;;  %v8839_v17 = vld [vmem:[%s8171_s19 + $0x320] sm:$0xf0]  ;;  %4359 = vmatpush.bf16.msrb.mxu2 %v5991_v45  ;;  %v6171_v62 = vor.u32 %v8784_v33, %v8781_v53  ;;  %v5871_v10 = vor.u32 %v8794_v63, %v8791_v8  ;;  %v5967_v53 = vor.u32 %v8813_v54, %v8810_v15 }
 0x181   : > { %v8822_v36 = vld [vmem:[%s8171_s19 + $0x570] sm:$0xf]  ;;  %v8842_v49 = vld [vmem:[%s8171_s19 + $0x3d8] sm:$0xf]  ;;  %v8845_v16 = vld [vmem:[%s8171_s19 + $0x3e0] sm:$0xf0]  ;;  %v1330_v2 = vsel %vm8857_vm14, %v8716_v26, %v1326_v22  ;;  %v6063_v33 = vor.u32 %v8819_v57, %v8816_v50 }
 0x182   : > { %v8848_v39 = vld [vmem:[%s8171_s19 + $0x498] sm:$0xf]  ;;  %v8851_v5 = vld [vmem:[%s8171_s19 + $0x4a0] sm:$0xf0]  ;;  %v1171_v41 = vmul.f32 0.125, %v1144_v11  ;;  %v1172_v27 = vmul.f32 0.125, %v1150_v14  ;;  %4372 = vmatpush.bf16.msrb.mxu3 %v6087_v30  ;;  %v5859_v14 = vor.u32 %v8839_v17, %v8836_v4  ;;  %v5955_v15 = vor.u32 %v8845_v16, %v8842_v49 }
 0x183   : > { %v7653_v9 = vld [vmem:[#allocation7 + $0x80] ss:$0 sm:$0xff]  ;;  %v8869_v60 = vld [vmem:[%s8171_s19 + $0x560] sm:$0xf0]  ;;  %v1387_v58 = vrot.slane %v1320_v20, 4  ;;  %4385 = vmatpush.bf16.msra.mxu0 %v6183_v6  ;;  %v1388_v24 = vrot.slane %v1330_v2, 3  ;;  %v6159_v6 = vor.u32 %v8825_v0, %v8822_v36  ;;  %4347 = vmatpush.bf16.msrb.mxu1 %v5883_v12 }
 0x184   : > { %v8866_v44 = vld [vmem:[%s8171_s19 + $0x558] sm:$0xf]  ;;  %v8879_v3 = vld [vmem:[%s8171_s19 + $0x300] sm:$0xf]  ;;  %v8882_v46 = vld [vmem:[%s8171_s19 + $0x308] sm:$0xf0]  ;;  %v8902_v8 = vadd.f32 %v7653_v9, %v8673_v13  ;;  %4360 = vmatpush.bf16.msrb.mxu2 %v5979_v25  ;;  %v6051_v13 = vor.u32 %v8851_v5, %v8848_v39 }
 0x185   : > { %v8885_v42 = vld [vmem:[%s8171_s19 + $0x3c0] sm:$0xf]  ;;  %v8888_v45 = vld [vmem:[%s8171_s19 + $0x3c8] sm:$0xf0]  ;;  %v8890_v37 = vadd.f32 1e-05, %v1171_v41  ;;  %v8912_v54 = vsel %vm1397_vm5, %v1387_v58, %v1388_v24  ;;  %v6147_v50 = vor.u32 %v8869_v60, %v8866_v44  ;;  %v5847_v22 = vor.u32 %v8882_v46, %v8879_v3 }
 0x186   : > { %v8892_v26 = vadd.f32 1e-05, %v1172_v27  ;;  %v1420_v30 = vperm.slane %v8597_v18, 0  ;;  %v422_v63 = vld [vmem:[#allocation7 + $0x2] ss:$8 sm:$0xf]  ;;  %4373 = vmatpush.bf16.msrb.mxu3 %v6075_v38  ;;  %v5943_v12 = vor.u32 %v8888_v45, %v8885_v42 }
 0x187   : > { %v423_v11 = vld [vmem:[#allocation7 + $0x2] ss:$8 sm:$0xf0]  ;;  %7683 = vrsqrt.f32 %v8890_v37  ;;  %4386 = vmatpush.bf16.msra.mxu0 %v6171_v62  ;;  %v998_v57 = vrot.slane %v8902_v8, 4  ;;  %v8922_v0 = vld [vmem:[%s8171_s19 + $0x488] sm:$0xf0]  ;;  %4348 = vmatpush.bf16.msrb.mxu1 %v5871_v10  ;;  %vm1337_vm5 = vweird.f32 %v8890_v37 }
 0x188   : > { %7685 = vrsqrt.f32 %v8892_v26  ;;  %v8919_v36 = vld [vmem:[%s8171_s19 + $0x480] sm:$0xf]  ;;  %v8932_v4 = vld [vmem:[%s8171_s19 + $0x548] sm:$0xf0]  ;;  %v8934_v17 = vor.u32 %v423_v11, %v422_v63  ;;  %v1454_v49 = vmul.f32 %v1420_v30, %v8231_v19  ;;  %v8938_v16 = vld [vmem:[%s8171_s19 + $0x6a8] sm:$0xf]  ;;  %4361 = vmatpush.bf16.msrb.mxu2 %v5967_v53  ;;  %vm1347_vm2 = vweird.f32 %v8892_v26 }
 0x189   : > { %v8925_v20 = vld [vmem:[%s8171_s19 + $0x540] sm:$0xf]  ;;  %v8941_v39 = vld [vmem:[%s8171_s19 + $0x6b0] sm:$0xf0]  ;;  %v999_v5 = vadd.f32 %v998_v57, %v8902_v8  ;;  %v1421_v9 = vperm.slane %v8597_v18, 1  ;;  %v1422_v21 = vperm.slane %v8597_v18, 2 }
 0x18a   : > { %v1423_v41 = vperm.slane %v8597_v18, 3  ;;  %v8948_v27 = vld [vmem:[%s8171_s19 + $0x768] sm:$0xf]  ;;  %v1474_v19 = vperm.slane %v8934_v17, 0  ;;  %v1475_v25 = vperm.slane %v8934_v17, 1  ;;  %v1476_v38 = vperm.slane %v8934_v17, 2  ;;  %4374 = vmatpush.bf16.msrb.mxu3 %v6063_v33 }
 0x18b   : > { %v1477_v44 = vperm.slane %v8934_v17, 3  ;;  %v8955_v60 = vld [vmem:[%s8171_s19 + $0x770] sm:$0xf0]  ;;  %4387 = vmatpush.bf16.msra.mxu0 %v6159_v6  ;;  %v1000_v58 = vrot.slane %v999_v5, 2  ;;  %v1455_v2 = vmul.f32 %v1421_v9, %v8235_v23  ;;  %v1456_v62 = vmul.f32 %v1422_v21, %v8249_v47  ;;  %v8962_v24 = vld [vmem:[%s8171_s19 + $0x828] sm:$0xf]  ;;  %4349 = vmatpush.bf16.msrb.mxu1 %v5859_v14 }
 0x18c   : > { %v1457_v10 = vmul.f32 %v1423_v41, %v8251_v52  ;;  %v8965_v30 = vld [vmem:[%s8171_s19 + $0x830] sm:$0xf0]  ;;  %v6039_v33 = vor.u32 %v8922_v0, %v8919_v36  ;;  %v6135_v23 = vor.u32 %v8932_v4, %v8925_v20  ;;  %v1508_v6 = vadd.f32 %v1474_v19, %v1454_v49  ;;  %v8983_v36 = vld [vmem:[%s8171_s19 + $0x8e8] sm:$0xf]  ;;  %4362 = vmatpush.bf16.msrb.mxu2 %v5955_v15  ;;  %v8993_v21 = vld [vmem:[%s8171_s19 + $0x690] sm:$0xf] }
 0x18d   : > { %v8967_v53 = vpop.eup %7683  ;;  %v1001_v11 = vadd.f32 %v1000_v58, %v999_v5  ;;  %v1509_v57 = vadd.f32 %v1475_v25, %v1455_v2  ;;  %v8986_v0 = vld [vmem:[%s8171_s19 + $0x8f0] sm:$0xf0]  ;;  %v1510_v49 = vadd.f32 %v1476_v38, %v1456_v62  ;;  %v8996_v41 = vld [vmem:[%s8171_s19 + $0x698] sm:$0xf0]  ;;  %v9000_v15 = vld [vmem:[%s8171_s19 + $0x750] sm:$0xf] }
 0x18e   : > { %v8976_v52 = vpop.eup %7685  ;;  %v1332_v63 = vmul.f32 %v8967_v53, %v8890_v37  ;;  %v1525_v4 = vmax.f32 %v1508_v6, 0.0  ;;  %4375 = vmatpush.bf16.msrb.mxu3 %v6051_v13  ;;  %v1511_v14 = vadd.f32 %v1477_v44, %v1457_v10  ;;  %v9003_v38 = vld [vmem:[%s8171_s19 + $0x758] sm:$0xf0]  ;;  %v9006_v2 = vld [vmem:[%s8171_s19 + $0x810] sm:$0xf]  ;;  %vm1338_vm4 = vweird.f32 %v8967_v53 }
 0x18f   : > { %v1342_v20 = vmul.f32 %v8976_v52, %v8892_v26  ;;  %4388 = vmatpush.bf16.msra.mxu0 %v6147_v50  ;;  %v1002_v25 = vrot.slane %v1001_v11, 1  ;;  %v1526_v58 = vmax.f32 %v1509_v57, 0.0  ;;  %v9009_v62 = vld [vmem:[%s8171_s19 + $0x818] sm:$0xf0]  ;;  %v1527_v13 = vmax.f32 %v1510_v49, 0.0  ;;  %4350 = vmatpush.bf16.msrb.mxu1 %v5847_v22  ;;  %vm1339_vm7 = vmor %vm1337_vm5, %vm1338_vm4 }
 0x190   : > { %v1333_v19 = vmul.f32 %v8967_v53, %v1332_v63  ;;  %v9013_v63 = vpack.c.bf16 %v1525_v4, %v1525_v4  ;;  %v9016_v50 = vld [vmem:[%s8171_s19 + $0x8d0] sm:$0xf]  ;;  %v9019_v44 = vld [vmem:[%s8171_s19 + $0x8d8] sm:$0xf0]  ;;  %v1528_v5 = vmax.f32 %v1511_v14, 0.0  ;;  %vm1348_vm6 = vweird.f32 %v8976_v52  ;;  %4363 = vmatpush.bf16.msrb.mxu2 %v5943_v12 }
 0x191   : > { %v1343_v6 = vmul.f32 %v8976_v52, %v1342_v20  ;;  %v1003_v57 = vadd.f32 %v1002_v25, %v1001_v11  ;;  %v9021_v28 = vpack.c.bf16 %v1526_v58, %v1526_v58  ;;  %v9024_v9 = vld [vmem:[%s8171_s19 + $0x678] sm:$0xf]  ;;  %v9027_v47 = vld [vmem:[%s8171_s19 + $0x680] sm:$0xf0]  ;;  %v9036_v11 = vpack.c.bf16 %v1527_v13, %v1527_v13  ;;  %v9079_v14 = vld [vmem:[%s8171_s19 + $0x660] sm:$0xf] }
 0x192   : > { %v1334_v10 = vmul.f32 0.5, %v1333_v19  ;;  %v6603_v4 = vor.u32 %v8986_v0, %v8983_v36  ;;  %v9041_v49 = vld [vmem:[%s8171_s19 + $0x738] sm:$0xf]  ;;  %v9044_v19 = vld [vmem:[%s8171_s19 + $0x740] sm:$0xf0]  ;;  %4376 = vmatpush.bf16.msrb.mxu3 %v6039_v33  ;;  %v9046_v3 = vpack.c.bf16 %v1528_v5, %v1528_v5  ;;  %v6303_v46 = vor.u32 %v8996_v41, %v8993_v21  ;;  %4299 = vmatmul.bf16.vlgmr.msra.gmra.mxu1 %v9013_v63  ;;  %vm1349_vm8 = vmor %vm1347_vm2, %vm1348_vm6 }
 0x193   : > { %v1344_v20 = vmul.f32 0.5, %v1343_v6  ;;  %v1020_v58 = vmul.f32 0.125, %v1003_v57  ;;  %4389 = vmatpush.bf16.msra.mxu0 %v6135_v23  ;;  %v9051_v42 = vld [vmem:[%s8171_s19 + $0x7f8] sm:$0xf]  ;;  %v9054_v45 = vld [vmem:[%s8171_s19 + $0x800] sm:$0xf0]  ;;  %4312 = vmatmul.bf16.vlgmr.msra.gmra.mxu2 %v9021_v28  ;;  %v6399_v12 = vor.u32 %v9003_v38, %v9000_v15  ;;  %v6495_v33 = vor.u32 %v9009_v62, %v9006_v2 }
 0x194   : > { %v1335_v25 = vsub.f32 1.5, %v1334_v10  ;;  %v6591_v23 = vor.u32 %v9019_v44, %v9016_v50  ;;  %v9065_v36 = vld [vmem:[%s8171_s19 + $0x8b8] sm:$0xf]  ;;  %v9068_v0 = vld [vmem:[%s8171_s19 + $0x8c0] sm:$0xf0]  ;;  %4325 = vmatmul.bf16.vlgmr.msra.gmra.mxu3 %v9036_v11  ;;  %4338 = vmatmul.bf16.vlgmr.msrb.gmra.mxu0 %v9046_v3  ;;  %v6291_v41 = vor.u32 %v9027_v47, %v9024_v9  ;;  %v1424_v38 = vperm.slane %v8597_v18, 4 }
 0x195   : > { %v1345_v22 = vsub.f32 1.5, %v1344_v20  ;;  %v9072_v21 = vsub.f32 %v8902_v8, %v1020_v58  ;;  %v9082_v15 = vld [vmem:[%s8171_s19 + $0x668] sm:$0xf0]  ;;  %v10054_v2 = vor.u32 %v8941_v39, %v8938_v16  ;;  %v10055_v47 = vor.u32 %v8955_v60, %v8948_v27 }
 0x196   : > { %v1336_v5 = vmul.f32 %v8967_v53, %v1335_v25  ;;  %v6387_v9 = vor.u32 %v9044_v19, %v9041_v49  ;;  %v6483_v62 = vor.u32 %v9054_v45, %v9051_v42  ;;  %v10056_v39 = vor.u32 %v8965_v30, %v8962_v24  ;;  %v6374_v24 = vld [vmem:[%s8171_s19 + $0x720] sm:$0xf]  ;;  %v7422_v45 = vld [vmem:[%s8171_s19 + $0x8a8] sm:$0xf0] }
 0x197   : > { %v1346_v8 = vmul.f32 %v8976_v52, %v1345_v22  ;;  %4395 = vmatpush.bf16.msra.mxu1 %v10054_v2  ;;  %4408 = vmatpush.bf16.msra.mxu2 %v10055_v47  ;;  %v1054_v16 = vmul.f32 %v9072_v21, %v9072_v21  ;;  %v1478_v27 = vperm.slane %v8934_v17, 4  ;;  %v1425_v60 = vperm.slane %v8597_v18, 5  ;;  %v6566_v42 = vld [vmem:[%s8171_s19 + $0x8a0] sm:$0xf]  ;;  %v6458_v47 = vld [vmem:[%s8171_s19 + $0x7c8] sm:$0xf] }
 0x198   : > { %v1340_v37 = vsel %vm1339_vm7, %v8967_v53, %v1336_v5  ;;  %4421 = vmatpush.bf16.msra.mxu3 %v10056_v39  ;;  %4434 = vmatpush.bf16.msrb.mxu0 %v6603_v4  ;;  %v6579_v26 = vor.u32 %v9068_v0, %v9065_v36  ;;  %v6279_v13 = vor.u32 %v9082_v15, %v9079_v14  ;;  %v1479_v57 = vperm.slane %v8934_v17, 5  ;;  %v6266_v0 = vld [vmem:[%s8171_s19 + $0x648] sm:$0xf] }
 0x199   : > { %v1389_v6 = vrot.slane %v1340_v37, 2  ;;  %v1350_v53 = vsel %vm1349_vm8, %v8976_v52, %v1346_v8  ;;  %v1151_v44 = vrot.slane %v1054_v16, 4  ;;  %v1458_v30 = vmul.f32 %v1424_v38, %v8266_v29  ;;  %v7374_v52 = vld [vmem:[%s8171_s19 + $0x728] sm:$0xf0]  ;;  %v6470_v29 = vld [vmem:[%s8171_s19 + $0x7e0] sm:$0xf] }
 0x19a   : > { %v1390_v50 = vrot.slane %v1350_v53, 1  ;;  %v1459_v10 = vmul.f32 %v1425_v60, %v8271_v34  ;;  %v1426_v20 = vperm.slane %v8597_v18, 6  ;;  %v1480_v4 = vperm.slane %v8934_v17, 6  ;;  %v7371_v38 = vld [vmem:[%s8171_s19 + $0x710] sm:$0xf0] }
 0x19b   : > { %4396 = vmatpush.bf16.msra.mxu1 %v6303_v46  ;;  %4409 = vmatpush.bf16.msra.mxu2 %v6399_v12  ;;  %v1481_v49 = vperm.slane %v8934_v17, 7  ;;  %v1152_v25 = vadd.f32 %v1151_v44, %v1054_v16  ;;  %v1512_v34 = vadd.f32 %v1478_v27, %v1458_v30  ;;  %v7398_v46 = vld [vmem:[%s8171_s19 + $0x7e8] sm:$0xf0]  ;;  %v10057_v5 = vor.u32 %v8774_v59, %v8760_v32  ;;  %v7395_v37 = vld [vmem:[%s8171_s19 + $0x7d0] sm:$0xf0] }
 0x19c   : > { %v1409_v19 = vsel %vm1399_vm15, %v1389_v6, %v1390_v50  ;;  %4422 = vmatpush.bf16.msra.mxu3 %v6495_v33  ;;  %4435 = vmatpush.bf16.msrb.mxu0 %v6591_v23  ;;  %v1513_v18 = vadd.f32 %v1479_v57, %v1459_v10  ;;  %v1460_v17 = vmul.f32 %v1426_v20, %v8300_v7  ;;  %v7419_v16 = vld [vmem:[%s8171_s19 + $0x890] sm:$0xf0]  ;;  %v7344_v6 = vld [vmem:[%s8171_s19 + $0x638] sm:$0xf0]  ;;  %v6350_v44 = vld [vmem:[%s8171_s19 + $0x6f0] sm:$0xf] }
 0x19d   : > { %v1410_v58 = vsel %vm1401_vm0, %v8912_v54, %v1409_v19  ;;  %v1515_v22 = vadd.f32 %v1481_v49, %v8799_v56  ;;  %v1153_v33 = vrot.slane %v1152_v25, 2  ;;  %v6375_v23 = vor.u32 %v7374_v52, %v6374_v24  ;;  %v7347_v54 = vld [vmem:[%s8171_s19 + $0x650] sm:$0xf0]  ;;  %v7368_v24 = vld [vmem:[%s8171_s19 + $0x6f8] sm:$0xf0] }
 0x19e   : > { %v1411_v12 = vsel %vm1403_vm1, %v8743_v40, %v1410_v58  ;;  %v1529_v36 = vmax.f32 %v1512_v34, 0.0  ;;  %v1530_v7 = vmax.f32 %v1513_v18, 0.0  ;;  %v1514_v56 = vadd.f32 %v1480_v4, %v1460_v17  ;;  %v6362_v40 = vld [vmem:[%s8171_s19 + $0x708] sm:$0xf]  ;;  %v6446_v30 = vld [vmem:[%s8171_s19 + $0x7b0] sm:$0xf] }
 0x19f   : > { %v9141_v14 = vmul.f32 %v1411_v12, %v10057_v5  ;;  %4397 = vmatpush.bf16.msra.mxu1 %v6291_v41  ;;  %4410 = vmatpush.bf16.msra.mxu2 %v6387_v9  ;;  %v1532_v15 = vmax.f32 %v1515_v22, 0.0  ;;  %v6471_v8 = vor.u32 %v7398_v46, %v6470_v29  ;;  %v6567_v2 = vor.u32 %v7422_v45, %v6566_v42  ;;  %v6554_v9 = vld [vmem:[%s8171_s19 + $0x888] sm:$0xf]  ;;  %v7392_v20 = vld [vmem:[%s8171_s19 + $0x7b8] sm:$0xf0] }
 0x1a0   : > { %4423 = vmatpush.bf16.msra.mxu3 %v6483_v62  ;;  %4436 = vmatpush.bf16.msrb.mxu0 %v6579_v26  ;;  %v1154_v59 = vadd.f32 %v1153_v33, %v1152_v25  ;;  %v1531_v41 = vmax.f32 %v1514_v56, 0.0  ;;  %v9150_v39 = vpack.c.bf16 %v1529_v36, %v1529_v36  ;;  %v6267_v27 = vor.u32 %v7347_v54, %v6266_v0  ;;  %v6254_v62 = vld [vmem:[%s8171_s19 + $0x630] sm:$0xf]  ;;  %v6242_v49 = vld [vmem:[%s8171_s19 + $0x618] sm:$0xf] }
 0x1a1   : > { %v1435_v32 = vperm.slane %v9141_v14, 7  ;;  %v6363_v60 = vor.u32 %v7371_v38, %v6362_v40  ;;  %v9157_v26 = vpack.c.bf16 %v1530_v7, %v1530_v7  ;;  %v9159_v50 = vpack.c.bf16 %v1532_v15, %v1532_v15  ;;  %v7341_v19 = vld [vmem:[%s8171_s19 + $0x620] sm:$0xf0]  ;;  %v426_v29 = vld [vmem:[#allocation7 + $0x42] ss:$8 sm:$0xf] }
 0x1a2   : > { %v9164_v10 = vpack.c.bf16 %v1531_v41, %v1531_v41  ;;  %v6459_v52 = vor.u32 %v7395_v37, %v6458_v47  ;;  %v6555_v57 = vor.u32 %v7419_v16, %v6554_v9  ;;  %v1155_v4 = vrot.slane %v1154_v59, 1  ;;  %4351 = vmatmul.bf16.vlgmr.msrb.gmra.mxu1 %v9150_v39  ;;  %v427_v34 = vld [vmem:[#allocation7 + $0x42] ss:$8 sm:$0xf0]  ;;  %v7365_v45 = vld [vmem:[%s8171_s19 + $0x6e0] sm:$0xf0] }
 0x1a3   : > { %v9155_v53 = vmul.f32 %v1435_v32, %v8657_v43  ;;  %4398 = vmatpush.bf16.msra.mxu1 %v6279_v13  ;;  %4411 = vmatpush.bf16.msra.mxu2 %v6375_v23  ;;  %v6542_v43 = vld [vmem:[%s8171_s19 + $0x870] sm:$0xf]  ;;  %v7416_v13 = vld [vmem:[%s8171_s19 + $0x878] sm:$0xf0]  ;;  %v1428_v25 = vperm.slane %v9141_v14, 0  ;;  %v6255_v58 = vor.u32 %v7344_v6, %v6254_v62  ;;  %v6351_v46 = vor.u32 %v7368_v24, %v6350_v44 }
 0x1a4   : > { %4424 = vmatpush.bf16.msra.mxu3 %v6471_v8  ;;  %4437 = vmatpush.bf16.msrb.mxu0 %v6567_v2  ;;  %v6338_v42 = vld [vmem:[%s8171_s19 + $0x6d8] sm:$0xf]  ;;  %v1429_v18 = vperm.slane %v9141_v14, 1  ;;  %v6447_v17 = vor.u32 %v7392_v20, %v6446_v30  ;;  %v6543_v22 = vor.u32 %v7416_v13, %v6542_v43  ;;  %v7389_v33 = vld [vmem:[%s8171_s19 + $0x7a0] sm:$0xf0]  ;;  %v9183_v0 = vor.u32 %v427_v34, %v426_v29 }
 0x1a5   : > { %4364 = vmatmul.bf16.vlgmr.msrb.gmra.mxu2 %v9157_v26  ;;  %4377 = vmatmul.bf16.vlgmr.msrb.gmra.mxu3 %v9164_v10  ;;  %v6434_v12 = vld [vmem:[%s8171_s19 + $0x798] sm:$0xf]  ;;  %v7413_v36 = vld [vmem:[%s8171_s19 + $0x860] sm:$0xf0]  ;;  %v1462_v54 = vmul.f32 %v1428_v25, %v8412_v31  ;;  %v1430_v7 = vperm.slane %v9141_v14, 2  ;;  %v1156_v56 = vadd.f32 %v1155_v4, %v1154_v59  ;;  %v6243_v15 = vor.u32 %v7341_v19, %v6242_v49 }
 0x1a6   : > { %4390 = vmatmul.bf16.vlgmr.msra.gmra.mxu0 %v9159_v50  ;;  %v6530_v23 = vld [vmem:[%s8171_s19 + $0x858] sm:$0xf]  ;;  %v1463_v5 = vmul.f32 %v1429_v18, %v8441_v48  ;;  %v6339_v40 = vor.u32 %v7365_v45, %v6338_v42  ;;  %v6230_v38 = vld [vmem:[%s8171_s19 + $0x600] sm:$0xf]  ;;  %v7338_v8 = vld [vmem:[%s8171_s19 + $0x608] sm:$0xf0] }
 0x1a7   : > { %4399 = vmatpush.bf16.msra.mxu1 %v6267_v27  ;;  %4412 = vmatpush.bf16.msra.mxu2 %v6363_v60  ;;  %v6326_v2 = vld [vmem:[%s8171_s19 + $0x6c0] sm:$0xf]  ;;  %v7362_v47 = vld [vmem:[%s8171_s19 + $0x6c8] sm:$0xf0]  ;;  %v1431_v37 = vperm.slane %v9141_v14, 3  ;;  %v1482_v59 = vperm.slane %v9183_v0, 0  ;;  %v1464_v9 = vmul.f32 %v1430_v7, %v8510_v35  ;;  %v6435_v27 = vor.u32 %v7389_v33, %v6434_v12 }
 0x1a8   : > { %4425 = vmatpush.bf16.msra.mxu3 %v6459_v52  ;;  %4438 = vmatpush.bf16.msrb.mxu0 %v6555_v57  ;;  %v6422_v32 = vld [vmem:[%s8171_s19 + $0x780] sm:$0xf]  ;;  %v7386_v31 = vld [vmem:[%s8171_s19 + $0x788] sm:$0xf0]  ;;  %v1483_v41 = vperm.slane %v9183_v0, 1  ;;  %v1484_v16 = vperm.slane %v9183_v0, 2  ;;  %v6531_v60 = vor.u32 %v7413_v36, %v6530_v23  ;;  %v6231_v25 = vor.u32 %v7338_v8, %v6230_v38 }
 0x1a9   : > { %v6518_v48 = vld [vmem:[%s8171_s19 + $0x840] sm:$0xf]  ;;  %v7410_v62 = vld [vmem:[%s8171_s19 + $0x848] sm:$0xf0]  ;;  %v6698_v6 = vld [vmem:[%s8171_s19 + $0x9a8] sm:$0xf]  ;;  %v1465_v44 = vmul.f32 %v1431_v37, %v8513_v1  ;;  %v1516_v35 = vadd.f32 %v1482_v59, %v1462_v54  ;;  %v6327_v1 = vor.u32 %v7362_v47, %v6326_v2  ;;  %v6423_v42 = vor.u32 %v7386_v31, %v6422_v32 }
 0x1aa   : > { %v1485_v24 = vperm.slane %v9183_v0, 3  ;;  %v7455_v30 = vld [vmem:[%s8171_s19 + $0x9b0] sm:$0xf0]  ;;  %v6794_v52 = vld [vmem:[%s8171_s19 + $0xa68] sm:$0xf]  ;;  %v1517_v20 = vadd.f32 %v1483_v41, %v1463_v5  ;;  %v1518_v43 = vadd.f32 %v1484_v16, %v1464_v9  ;;  %v1173_v13 = vmul.f32 0.125, %v1156_v56 }
 0x1ab   : > { %4400 = vmatpush.bf16.msra.mxu1 %v6255_v58  ;;  %4413 = vmatpush.bf16.msra.mxu2 %v6351_v46  ;;  %v7479_v57 = vld [vmem:[%s8171_s19 + $0xa70] sm:$0xf0]  ;;  %v6890_v4 = vld [vmem:[%s8171_s19 + $0xb28] sm:$0xf]  ;;  %v1533_v58 = vmax.f32 %v1516_v35, 0.0  ;;  %v6519_v45 = vor.u32 %v7410_v62, %v6518_v48 }
 0x1ac   : > { %4426 = vmatpush.bf16.msra.mxu3 %v6447_v17  ;;  %4439 = vmatpush.bf16.msrb.mxu0 %v6543_v22  ;;  %v7503_v49 = vld [vmem:[%s8171_s19 + $0xb30] sm:$0xf0]  ;;  %v1519_v19 = vadd.f32 %v1485_v24, %v1465_v44  ;;  %v6986_v29 = vld [vmem:[%s8171_s19 + $0xbe8] sm:$0xf]  ;;  %v1534_v46 = vmax.f32 %v1517_v20, 0.0  ;;  %v1535_v18 = vmax.f32 %v1518_v43, 0.0  ;;  %v6699_v22 = vor.u32 %v7455_v30, %v6698_v6 }
 0x1ad   : > { %v7527_v34 = vld [vmem:[%s8171_s19 + $0xbf0] sm:$0xf0]  ;;  %v6795_v12 = vor.u32 %v7479_v57, %v6794_v52  ;;  %v6686_v33 = vld [vmem:[%s8171_s19 + $0x990] sm:$0xf]  ;;  %v7452_v23 = vld [vmem:[%s8171_s19 + $0x998] sm:$0xf0]  ;;  %v6891_v5 = vor.u32 %v7503_v49, %v6890_v4 }
 0x1ae   : > { %v1536_v17 = vmax.f32 %v1519_v19, 0.0  ;;  %v6782_v36 = vld [vmem:[%s8171_s19 + $0xa50] sm:$0xf]  ;;  %v9214_v54 = vadd.f32 1e-05, %v1173_v13  ;;  %v6987_v7 = vor.u32 %v7527_v34, %v6986_v29  ;;  %v9220_v38 = vpack.c.bf16 %v1534_v46, %v1534_v46 }
 0x1af   : > { %4401 = vmatpush.bf16.msra.mxu1 %v6243_v15  ;;  %4414 = vmatpush.bf16.msra.mxu2 %v6339_v40  ;;  %v7476_v56 = vld [vmem:[%s8171_s19 + $0xa58] sm:$0xf0]  ;;  %v6878_v15 = vld [vmem:[%s8171_s19 + $0xb10] sm:$0xf]  ;;  %v9218_v40 = vpack.c.bf16 %v1533_v58, %v1533_v58  ;;  %v9225_v37 = vpack.c.bf16 %v1535_v18, %v1535_v18  ;;  %v6687_v31 = vor.u32 %v7452_v23, %v6686_v33  ;;  %v6674_v59 = vld [vmem:[%s8171_s19 + $0x978] sm:$0xf] }
 0x1b0   : > { %4427 = vmatpush.bf16.msra.mxu3 %v6435_v27  ;;  %4440 = vmatpush.bf16.msrb.mxu0 %v6531_v60  ;;  %v7500_v8 = vld [vmem:[%s8171_s19 + $0xb18] sm:$0xf0]  ;;  %v6974_v2 = vld [vmem:[%s8171_s19 + $0xbd0] sm:$0xf]  ;;  %v9227_v32 = vpack.c.bf16 %v1536_v17, %v1536_v17  ;;  %v6783_v48 = vor.u32 %v7476_v56, %v6782_v36  ;;  %v7449_v41 = vld [vmem:[%s8171_s19 + $0x980] sm:$0xf0]  ;;  %7687 = vrsqrt.f32 %v9214_v54  ;;  %vm1357_vm15 = vweird.f32 %v9214_v54 }
 0x1b1   : > { %v7524_v47 = vld [vmem:[%s8171_s19 + $0xbd8] sm:$0xf0]  ;;  %v6879_v9 = vor.u32 %v7500_v8, %v6878_v15  ;;  %v6770_v27 = vld [vmem:[%s8171_s19 + $0xa38] sm:$0xf]  ;;  %v7473_v60 = vld [vmem:[%s8171_s19 + $0xa40] sm:$0xf0]  ;;  %v6675_v30 = vor.u32 %v7449_v41, %v6674_v59 }
 0x1b2   : > { %v6975_v16 = vor.u32 %v7524_v47, %v6974_v2  ;;  %v6866_v62 = vld [vmem:[%s8171_s19 + $0xaf8] sm:$0xf]  ;;  %v7497_v6 = vld [vmem:[%s8171_s19 + $0xb00] sm:$0xf0]  ;;  %v6771_v52 = vor.u32 %v7473_v60, %v6770_v27  ;;  %v6662_v57 = vld [vmem:[%s8171_s19 + $0x960] sm:$0xf] }
 0x1b3   : > { %4402 = vmatpush.bf16.msra.mxu1 %v6231_v25  ;;  %4415 = vmatpush.bf16.msra.mxu2 %v6327_v1  ;;  %v6962_v44 = vld [vmem:[%s8171_s19 + $0xbb8] sm:$0xf]  ;;  %v7521_v24 = vld [vmem:[%s8171_s19 + $0xbc0] sm:$0xf0]  ;;  %v7446_v35 = vld [vmem:[%s8171_s19 + $0x968] sm:$0xf0]  ;;  %v6867_v20 = vor.u32 %v7497_v6, %v6866_v62 }
 0x1b4   : > { %4428 = vmatpush.bf16.msra.mxu3 %v6423_v42  ;;  %4441 = vmatpush.bf16.msrb.mxu0 %v6519_v45  ;;  %v6963_v43 = vor.u32 %v7521_v24, %v6962_v44  ;;  %v6758_v13 = vld [vmem:[%s8171_s19 + $0xa20] sm:$0xf]  ;;  %v7470_v4 = vld [vmem:[%s8171_s19 + $0xa28] sm:$0xf0]  ;;  %v6663_v34 = vor.u32 %v7446_v35, %v6662_v57  ;;  %v6650_v46 = vld [vmem:[%s8171_s19 + $0x948] sm:$0xf] }
 0x1b5   : > { %v6854_v49 = vld [vmem:[%s8171_s19 + $0xae0] sm:$0xf]  ;;  %v7494_v19 = vld [vmem:[%s8171_s19 + $0xae8] sm:$0xf0]  ;;  %v6759_v58 = vor.u32 %v7470_v4, %v6758_v13  ;;  %v7443_v42 = vld [vmem:[%s8171_s19 + $0x950] sm:$0xf0] }
 0x1b6   : > { %4403 = vmatmul.bf16.vlgmr.msra.gmra.mxu1 %v9218_v40  ;;  %4416 = vmatmul.bf16.vlgmr.msra.gmra.mxu2 %v9220_v38  ;;  %v6950_v25 = vld [vmem:[%s8171_s19 + $0xba0] sm:$0xf]  ;;  %v7518_v1 = vld [vmem:[%s8171_s19 + $0xba8] sm:$0xf0]  ;;  %v9250_v29 = vpop.eup %7687  ;;  %v6855_v45 = vor.u32 %v7494_v19, %v6854_v49  ;;  %v6746_v17 = vld [vmem:[%s8171_s19 + $0xa08] sm:$0xf]  ;;  %v6651_v56 = vor.u32 %v7443_v42, %v6650_v46 }
 0x1b7   : > { %4447 = vmatpush.bf16.msrb.mxu1 %v6699_v22  ;;  %4460 = vmatpush.bf16.msrb.mxu2 %v6795_v12  ;;  %v6951_v18 = vor.u32 %v7518_v1, %v6950_v25  ;;  %v7467_v22 = vld [vmem:[%s8171_s19 + $0xa10] sm:$0xf0]  ;;  %v6842_v12 = vld [vmem:[%s8171_s19 + $0xac8] sm:$0xf]  ;;  %v6638_v8 = vld [vmem:[%s8171_s19 + $0x930] sm:$0xf]  ;;  %vm1358_vm0 = vweird.f32 %v9250_v29 }
 0x1b8   : > { %4473 = vmatpush.bf16.msrb.mxu3 %v6891_v5  ;;  %4486 = vmatpush.bf16.msra.mxu0 %v6987_v7  ;;  %v7491_v33 = vld [vmem:[%s8171_s19 + $0xad0] sm:$0xf0]  ;;  %v6938_v23 = vld [vmem:[%s8171_s19 + $0xb88] sm:$0xf]  ;;  %v1352_v5 = vmul.f32 %v9250_v29, %v9214_v54  ;;  %v1432_v7 = vperm.slane %v9141_v14, 4  ;;  %v6747_v15 = vor.u32 %v7467_v22, %v6746_v17  ;;  %v1433_v60 = vperm.slane %v9141_v14, 5  ;;  %vm9323_vm1 = vmor %vm1357_vm15, %vm1358_vm0 }
 0x1b9   : > { %4429 = vmatmul.bf16.vlgmr.msra.gmra.mxu3 %v9225_v37  ;;  %4442 = vmatmul.bf16.vlgmr.msrb.gmra.mxu0 %v9227_v32  ;;  %v7515_v36 = vld [vmem:[%s8171_s19 + $0xb90] sm:$0xf0]  ;;  %v7440_v2 = vld [vmem:[%s8171_s19 + $0x938] sm:$0xf0]  ;;  %v6734_v47 = vld [vmem:[%s8171_s19 + $0x9f0] sm:$0xf] }
 0x1ba   : > { %v7464_v59 = vld [vmem:[%s8171_s19 + $0x9f8] sm:$0xf0]  ;;  %v6830_v41 = vld [vmem:[%s8171_s19 + $0xab0] sm:$0xf]  ;;  %v1353_v62 = vmul.f32 %v9250_v29, %v1352_v5  ;;  %v1486_v6 = vperm.slane %v9183_v0, 4  ;;  %v1434_v44 = vperm.slane %v9141_v14, 6  ;;  %v6639_v24 = vor.u32 %v7440_v2, %v6638_v8 }
 0x1bb   : > { %4448 = vmatpush.bf16.msrb.mxu1 %v6687_v31  ;;  %4461 = vmatpush.bf16.msrb.mxu2 %v6783_v48  ;;  %v6843_v31 = vor.u32 %v7491_v33, %v6842_v12  ;;  %v6939_v48 = vor.u32 %v7515_v36, %v6938_v23  ;;  %v7512_v27 = vld [vmem:[%s8171_s19 + $0xb78] sm:$0xf0]  ;;  %v7437_v57 = vld [vmem:[%s8171_s19 + $0x920] sm:$0xf0]  ;;  %v6722_v35 = vld [vmem:[%s8171_s19 + $0x9d8] sm:$0xf]  ;;  %v1466_v14 = vmul.f32 %v1432_v7, %v8557_v55 }
 0x1bc   : > { %4474 = vmatpush.bf16.msrb.mxu3 %v6879_v9  ;;  %4487 = vmatpush.bf16.msra.mxu0 %v6975_v16  ;;  %v7488_v9 = vld [vmem:[%s8171_s19 + $0xab8] sm:$0xf0]  ;;  %v6926_v16 = vld [vmem:[%s8171_s19 + $0xb70] sm:$0xf]  ;;  %v7461_v13 = vld [vmem:[%s8171_s19 + $0x9e0] sm:$0xf0]  ;;  %v1467_v1 = vmul.f32 %v1433_v60, %v8565_v51  ;;  %v1468_v42 = vmul.f32 %v1434_v44, %v8654_v61 }
 0x1bd   : > { %v6818_v4 = vld [vmem:[%s8171_s19 + $0xa98] sm:$0xf]  ;;  %v7485_v49 = vld [vmem:[%s8171_s19 + $0xaa0] sm:$0xf0]  ;;  %v6614_v46 = vld [vmem:[%s8171_s19 + $0x900] sm:$0xf]  ;;  %v6723_v51 = vor.u32 %v7461_v13, %v6722_v35  ;;  %v1520_v5 = vadd.f32 %v1486_v6, %v1466_v14 }
 0x1be   : > { %v6914_v19 = vld [vmem:[%s8171_s19 + $0xb58] sm:$0xf]  ;;  %v7509_v25 = vld [vmem:[%s8171_s19 + $0xb60] sm:$0xf0]  ;;  %v7434_v17 = vld [vmem:[%s8171_s19 + $0x908] sm:$0xf0]  ;;  %v6819_v61 = vor.u32 %v7485_v49, %v6818_v4 }
 0x1bf   : > { %4449 = vmatpush.bf16.msrb.mxu1 %v6675_v30  ;;  %4462 = vmatpush.bf16.msrb.mxu2 %v6771_v52  ;;  %v6735_v30 = vor.u32 %v7464_v59, %v6734_v47  ;;  %v6626_v52 = vld [vmem:[%s8171_s19 + $0x918] sm:$0xf]  ;;  %v6710_v22 = vld [vmem:[%s8171_s19 + $0x9c0] sm:$0xf]  ;;  %v7458_v12 = vld [vmem:[%s8171_s19 + $0x9c8] sm:$0xf0]  ;;  %v6915_v33 = vor.u32 %v7509_v25, %v6914_v19 }
 0x1c0   : > { %4475 = vmatpush.bf16.msrb.mxu3 %v6867_v20  ;;  %4488 = vmatpush.bf16.msra.mxu0 %v6963_v43  ;;  %v6831_v20 = vor.u32 %v7488_v9, %v6830_v41  ;;  %v6927_v43 = vor.u32 %v7512_v27, %v6926_v16  ;;  %v6627_v55 = vor.u32 %v7437_v57, %v6626_v52  ;;  %v6806_v23 = vld [vmem:[%s8171_s19 + $0xa80] sm:$0xf]  ;;  %v7482_v36 = vld [vmem:[%s8171_s19 + $0xa88] sm:$0xf0]  ;;  %v5548_v47 = vld [vmem:[%s8171_s19 + $0xb4] sm:$0xf0] }
 0x1c1   : > { %v7506_v7 = vld [vmem:[%s8171_s19 + $0xb48] sm:$0xf0]  ;;  %v6615_v41 = vor.u32 %v7434_v17, %v6614_v46  ;;  %v6711_v9 = vor.u32 %v7458_v12, %v6710_v22  ;;  %v5644_v16 = vld [vmem:[%s8171_s19 + $0x174] sm:$0xf0]  ;;  %v6807_v6 = vor.u32 %v7482_v36, %v6806_v23  ;;  %v7187_v19 = vld [vmem:[%s8171_s19 + $0x154] sm:$0xf] }
 0x1c2   : > { %v7166_v2 = vld [vmem:[%s8171_s19 + $0xac] sm:$0xf]  ;;  %v5740_v60 = vld [vmem:[%s8171_s19 + $0x234] sm:$0xf0]  ;;  %v5632_v25 = vld [vmem:[%s8171_s19 + $0x15c] sm:$0xf0] }
 0x1c3   : > { %4450 = vmatpush.bf16.msrb.mxu1 %v6663_v34  ;;  %4463 = vmatpush.bf16.msrb.mxu2 %v6759_v58  ;;  %v1487_v34 = vperm.slane %v9183_v0, 5  ;;  %v1354_v58 = vmul.f32 0.5, %v1353_v62  ;;  %v7214_v27 = vld [vmem:[%s8171_s19 + $0x22c] sm:$0xf]  ;;  %v5551_v57 = vor.u32 %v7166_v2, %v5548_v47  ;;  %v7058_v17 = vld [vmem:[%s8171_s19 + $0xc78] sm:$0xf] }
 0x1c4   : > { %4476 = vmatpush.bf16.msrb.mxu3 %v6855_v45  ;;  %4489 = vmatpush.bf16.msra.mxu0 %v6951_v18  ;;  %v1488_v45 = vperm.slane %v9183_v0, 6  ;;  %v1489_v18 = vperm.slane %v9183_v0, 7  ;;  %v6902_v0 = vld [vmem:[%s8171_s19 + $0xb40] sm:$0xf]  ;;  %v5743_v4 = vor.u32 %v7214_v27, %v5740_v60  ;;  %v7545_v22 = vld [vmem:[%s8171_s19 + $0xc80] sm:$0xf0] }
 0x1c5   : > { %v1521_v8 = vadd.f32 %v1487_v34, %v1467_v1  ;;  %v1355_v62 = vsub.f32 1.5, %v1354_v58  ;;  %v6903_v44 = vor.u32 %v7506_v7, %v6902_v0  ;;  %v7211_v1 = vld [vmem:[%s8171_s19 + $0x214] sm:$0xf]  ;;  %v5728_v34 = vld [vmem:[%s8171_s19 + $0x21c] sm:$0xf0] }
 0x1c6   : > { %v1523_v59 = vadd.f32 %v1489_v18, %v9155_v53  ;;  %v1537_v53 = vmax.f32 %v1520_v5, 0.0  ;;  %v5524_v23 = vld [vmem:[%s8171_s19 + $0x84] sm:$0xf0]  ;;  %v7184_v36 = vld [vmem:[%s8171_s19 + $0x13c] sm:$0xf] }
 0x1c7   : > { %4451 = vmatpush.bf16.msrb.mxu1 %v6651_v56  ;;  %4464 = vmatpush.bf16.msrb.mxu2 %v6747_v15  ;;  %v7082_v56 = vld [vmem:[%s8171_s19 + $0xca8] sm:$0xf]  ;;  %v7551_v15 = vld [vmem:[%s8171_s19 + $0xcb0] sm:$0xf0]  ;;  %v1538_v35 = vmax.f32 %v1521_v8, 0.0  ;;  %v1356_v58 = vmul.f32 %v9250_v29, %v1355_v62 }
 0x1c8   : > { %4477 = vmatpush.bf16.msrb.mxu3 %v6843_v31  ;;  %4490 = vmatpush.bf16.msra.mxu0 %v6939_v48  ;;  %v7190_v31 = vld [vmem:[%s8171_s19 + $0x16c] sm:$0xf]  ;;  %v1522_v48 = vadd.f32 %v1488_v45, %v1468_v42  ;;  %v7083_v52 = vor.u32 %v7551_v15, %v7082_v56  ;;  %v1540_v14 = vmax.f32 %v1523_v59, 0.0  ;;  %v9317_v46 = vpack.c.bf16 %v1537_v53, %v1537_v53  ;;  %v5620_v0 = vld [vmem:[%s8171_s19 + $0x144] sm:$0xf0] }
 0x1c9   : > { %v5647_v13 = vor.u32 %v7190_v31, %v5644_v16  ;;  %v9327_v18 = vpack.c.bf16 %v1538_v35, %v1538_v35  ;;  %v7208_v5 = vld [vmem:[%s8171_s19 + $0x1fc] sm:$0xf]  ;;  %v5716_v7 = vld [vmem:[%s8171_s19 + $0x204] sm:$0xf0]  ;;  %v7059_v15 = vor.u32 %v7545_v22, %v7058_v17  ;;  %v7046_v2 = vld [vmem:[%s8171_s19 + $0xc60] sm:$0xf]  ;;  %v1360_v31 = vsel %vm9323_vm1, %v9250_v29, %v1356_v58 }
 0x1ca   : > { %v1539_v49 = vmax.f32 %v1522_v48, 0.0  ;;  %v9333_v54 = vpack.c.bf16 %v1540_v14, %v1540_v14  ;;  %v420_v56 = vld [vmem:[#allocation7 + $0x81] ss:$8 sm:$0x1]  ;;  %v7542_v47 = vld [vmem:[%s8171_s19 + $0xc68] sm:$0xf0]  ;;  %v5623_v48 = vor.u32 %v7184_v36, %v5620_v0  ;;  %v5719_v59 = vor.u32 %v7208_v5, %v5716_v7 }
 0x1cb   : > { %4452 = vmatpush.bf16.msrb.mxu1 %v6639_v24  ;;  %4465 = vmatpush.bf16.msrb.mxu2 %v6735_v30  ;;  %v7070_v24 = vld [vmem:[%s8171_s19 + $0xc90] sm:$0xf]  ;;  %v7548_v30 = vld [vmem:[%s8171_s19 + $0xc98] sm:$0xf0]  ;;  %v7181_v16 = vld [vmem:[%s8171_s19 + $0x124] sm:$0xf]  ;;  %v7047_v29 = vor.u32 %v7542_v47, %v7046_v2 }
 0x1cc   : > { %4478 = vmatpush.bf16.msrb.mxu3 %v6831_v20  ;;  %4491 = vmatpush.bf16.msra.mxu0 %v6927_v43  ;;  %v7163_v20 = vld [vmem:[%s8171_s19 + $0x94] sm:$0xf]  ;;  %v5536_v43 = vld [vmem:[%s8171_s19 + $0x9c] sm:$0xf0]  ;;  %v7071_v42 = vor.u32 %v7548_v30, %v7070_v24  ;;  %v9331_v12 = vpack.c.bf16 %v1539_v49, %v1539_v49  ;;  %v5608_v27 = vld [vmem:[%s8171_s19 + $0x12c] sm:$0xf0] }
 0x1cd   : > { %v7205_v60 = vld [vmem:[%s8171_s19 + $0x1e4] sm:$0xf]  ;;  %v5704_v62 = vld [vmem:[%s8171_s19 + $0x1ec] sm:$0xf0]  ;;  %v7034_v53 = vld [vmem:[%s8171_s19 + $0xc48] sm:$0xf]  ;;  %v5611_v30 = vor.u32 %v7181_v16, %v5608_v27 }
 0x1ce   : > { %v7539_v24 = vld [vmem:[%s8171_s19 + $0xc50] sm:$0xf0]  ;;  %v5500_v35 = vld [vmem:[%s8171_s19 + $0x54] sm:$0xf0]  ;;  %v5488_v45 = vld [vmem:[%s8171_s19 + $0x3c] sm:$0xf0] }
 0x1cf   : > { %4453 = vmatpush.bf16.msrb.mxu1 %v6627_v55  ;;  %4466 = vmatpush.bf16.msrb.mxu2 %v6723_v51  ;;  %v5539_v55 = vor.u32 %v7163_v20, %v5536_v43  ;;  %v5635_v51 = vor.u32 %v7187_v19, %v5632_v25  ;;  %v7178_v20 = vld [vmem:[%s8171_s19 + $0x10c] sm:$0xf]  ;;  %v5596_v43 = vld [vmem:[%s8171_s19 + $0x114] sm:$0xf0]  ;;  %v7035_v14 = vor.u32 %v7539_v24, %v7034_v53  ;;  %v7022_v25 = vld [vmem:[%s8171_s19 + $0xc30] sm:$0xf] }
 0x1d0   : > { %4479 = vmatpush.bf16.msrb.mxu3 %v6819_v61  ;;  %4492 = vmatpush.bf16.msra.mxu0 %v6915_v33  ;;  %v5731_v61 = vor.u32 %v7211_v1, %v5728_v34  ;;  %v7160_v33 = vld [vmem:[%s8171_s19 + $0x7c] sm:$0xf]  ;;  %v5599_v34 = vor.u32 %v7178_v20, %v5596_v43  ;;  %v7199_v17 = vld [vmem:[%s8171_s19 + $0x1b4] sm:$0xf]  ;;  %v5680_v22 = vld [vmem:[%s8171_s19 + $0x1bc] sm:$0xf0] }
 0x1d1   : > { %v5527_v8 = vor.u32 %v7160_v33, %v5524_v23  ;;  %v7536_v1 = vld [vmem:[%s8171_s19 + $0xc38] sm:$0xf0]  ;;  %v7010_v23 = vld [vmem:[%s8171_s19 + $0xc18] sm:$0xf]  ;;  %v7533_v36 = vld [vmem:[%s8171_s19 + $0xc20] sm:$0xf0]  ;;  %v5683_v7 = vor.u32 %v7199_v17, %v5680_v22 }
 0x1d2   : > { %v7148_v0 = vld [vmem:[%s8171_s19 + $0x1c] sm:$0xf]  ;;  %v7530_v16 = vld [vmem:[%s8171_s19 + $0xc08] sm:$0xf0]  ;;  %v7145_v27 = vld [vmem:[%s8171_s19 + $0x4] sm:$0xf] }
 0x1d3   : > { %4454 = vmatpush.bf16.msrb.mxu1 %v6615_v41  ;;  %4467 = vmatpush.bf16.msrb.mxu2 %v6711_v9  ;;  %v7157_v41 = vld [vmem:[%s8171_s19 + $0x64] sm:$0xf]  ;;  %v5512_v9 = vld [vmem:[%s8171_s19 + $0x6c] sm:$0xf0]  ;;  %v7196_v47 = vld [vmem:[%s8171_s19 + $0x19c] sm:$0xf] }
 0x1d4   : > { %4480 = vmatpush.bf16.msrb.mxu3 %v6807_v6  ;;  %4493 = vmatpush.bf16.msra.mxu0 %v6903_v44  ;;  %v1416_v6 = vmul.f32 %v1360_v31, %v420_v56  ;;  %v5515_v44 = vor.u32 %v7157_v41, %v5512_v9  ;;  %v5476_v56 = vld [vmem:[%s8171_s19 + $0x24] sm:$0xf0]  ;;  %v7011_v41 = vor.u32 %v7533_v36, %v7010_v23  ;;  %v5656_v53 = vld [vmem:[%s8171_s19 + $0x18c] sm:$0xf0]  ;;  %v7238_v24 = vld [vmem:[%s8171_s19 + $0x2ec] sm:$0xf] }
 0x1d5   : > { %v5668_v31 = vld [vmem:[%s8171_s19 + $0x1a4] sm:$0xf0]  ;;  %v5479_v9 = vor.u32 %v7148_v0, %v5476_v56  ;;  %v7286_v20 = vld [vmem:[%s8171_s19 + $0x46c] sm:$0xf]  ;;  %v7259_v17 = vld [vmem:[%s8171_s19 + $0x394] sm:$0xf] }
 0x1d6   : > { %4455 = vmatmul.bf16.vlgmr.msrb.gmra.mxu1 %v9317_v46  ;;  %4468 = vmatmul.bf16.vlgmr.msrb.gmra.mxu2 %v9327_v18  ;;  %v1436_v49 = vperm.slane %v1416_v6, 0  ;;  %v7169_v6 = vld [vmem:[%s8171_s19 + $0xc4] sm:$0xf]  ;;  %v5920_v22 = vld [vmem:[%s8171_s19 + $0x39c] sm:$0xf0] }
 0x1d7   : > { %4499 = vmatpush.bf16.msra.mxu1 %v7083_v52  ;;  %4512 = vmatpush.bf16.msra.mxu2 %v5551_v57  ;;  %v5707_v52 = vor.u32 %v7205_v60, %v5704_v62  ;;  %v7154_v57 = vld [vmem:[%s8171_s19 + $0x4c] sm:$0xf]  ;;  %v5671_v62 = vor.u32 %v7196_v47, %v5668_v31  ;;  %v7307_v23 = vld [vmem:[%s8171_s19 + $0x514] sm:$0xf]  ;;  %v6112_v36 = vld [vmem:[%s8171_s19 + $0x51c] sm:$0xf0] }
 0x1d8   : > { %4525 = vmatpush.bf16.msra.mxu3 %v5647_v13  ;;  %4538 = vmatpush.bf16.msrb.mxu0 %v5743_v4  ;;  %v7202_v13 = vld [vmem:[%s8171_s19 + $0x1cc] sm:$0xf]  ;;  %v5692_v4 = vld [vmem:[%s8171_s19 + $0x1d4] sm:$0xf0]  ;;  %v5503_v19 = vor.u32 %v7154_v57, %v5500_v35  ;;  %v1470_v2 = vmul.f32 %v1436_v49, %v9072_v21  ;;  %v5464_v21 = vld [vmem:[%s8171_s19 + $0xc] sm:$0xf0] }
 0x1d9   : > { %4481 = vmatmul.bf16.vlgmr.msrb.gmra.mxu3 %v9331_v12  ;;  %4494 = vmatmul.bf16.vlgmr.msra.gmra.mxu0 %v9333_v54  ;;  %v5695_v58 = vor.u32 %v7202_v13, %v5692_v4  ;;  %v7262_v57 = vld [vmem:[%s8171_s19 + $0x3ac] sm:$0xf]  ;;  %v5932_v35 = vld [vmem:[%s8171_s19 + $0x3b4] sm:$0xf0]  ;;  %v5467_v13 = vor.u32 %v7145_v27, %v5464_v21  ;;  %v7232_v56 = vld [vmem:[%s8171_s19 + $0x2bc] sm:$0xf] }
 0x1da   : > { %v6028_v4 = vld [vmem:[%s8171_s19 + $0x474] sm:$0xf0]  ;;  %v7310_v49 = vld [vmem:[%s8171_s19 + $0x52c] sm:$0xf]  ;;  %v7256_v47 = vld [vmem:[%s8171_s19 + $0x37c] sm:$0xf] }
 0x1db   : > { %4500 = vmatpush.bf16.msra.mxu1 %v7071_v42  ;;  %4513 = vmatpush.bf16.msra.mxu2 %v5539_v55  ;;  %v7151_v42 = vld [vmem:[%s8171_s19 + $0x34] sm:$0xf]  ;;  %v5908_v31 = vld [vmem:[%s8171_s19 + $0x384] sm:$0xf0]  ;;  %v7229_v21 = vld [vmem:[%s8171_s19 + $0x2a4] sm:$0xf] }
 0x1dc   : > { %4526 = vmatpush.bf16.msra.mxu3 %v5635_v51  ;;  %4539 = vmatpush.bf16.msrb.mxu0 %v5731_v61  ;;  %v7175_v55 = vld [vmem:[%s8171_s19 + $0xf4] sm:$0xf]  ;;  %v5584_v51 = vld [vmem:[%s8171_s19 + $0xfc] sm:$0xf0]  ;;  %v7023_v61 = vor.u32 %v7536_v1, %v7022_v25  ;;  %v5491_v33 = vor.u32 %v7151_v42, %v5488_v45  ;;  %v5911_v27 = vor.u32 %v7256_v47, %v5908_v31  ;;  %v7244_v31 = vld [vmem:[%s8171_s19 + $0x31c] sm:$0xf] }
 0x1dd   : > { %v5587_v5 = vor.u32 %v7175_v55, %v5584_v51  ;;  %v7235_v42 = vld [vmem:[%s8171_s19 + $0x2d4] sm:$0xf]  ;;  %v5824_v45 = vld [vmem:[%s8171_s19 + $0x2dc] sm:$0xf0]  ;;  %v6031_v55 = vor.u32 %v7286_v20, %v6028_v4  ;;  %v7226_v20 = vld [vmem:[%s8171_s19 + $0x28c] sm:$0xf] }
 0x1df   : > { %4501 = vmatpush.bf16.msra.mxu1 %v7059_v15  ;;  %4514 = vmatpush.bf16.msra.mxu2 %v5527_v8  ;;  %v7172_v15 = vld [vmem:[%s8171_s19 + $0xdc] sm:$0xf]  ;;  %v5572_v8 = vld [vmem:[%s8171_s19 + $0xe4] sm:$0xf0] }
 0x1e0   : > { %4527 = vmatpush.bf16.msra.mxu3 %v5623_v48  ;;  %4540 = vmatpush.bf16.msrb.mxu0 %v5719_v59  ;;  %v7654_v48 = vld [vmem:[#allocation7 + $0x82] ss:$0 sm:$0xff]  ;;  %v6998_v59 = vld [vmem:[%s8171_s19 + $0xc00] sm:$0xf]  ;;  %v5575_v60 = vor.u32 %v7172_v15, %v5572_v8  ;;  %v5812_v15 = vld [vmem:[%s8171_s19 + $0x2c4] sm:$0xf0] }
 0x1e1   : > { %v6999_v43 = vor.u32 %v7530_v16, %v6998_v59  ;;  %v6004_v59 = vld [vmem:[%s8171_s19 + $0x444] sm:$0xf0]  ;;  %v5815_v16 = vor.u32 %v7232_v56, %v5812_v15  ;;  %v7220_v15 = vld [vmem:[%s8171_s19 + $0x25c] sm:$0xf] }
 0x1e3   : > { %4502 = vmatpush.bf16.msra.mxu1 %v7047_v29  ;;  %4515 = vmatpush.bf16.msra.mxu2 %v5515_v44  ;;  %v5560_v29 = vld [vmem:[%s8171_s19 + $0xcc] sm:$0xf0]  ;;  %v7193_v44 = vld [vmem:[%s8171_s19 + $0x184] sm:$0xf] }
 0x1e4   : > { %4528 = vmatpush.bf16.msra.mxu3 %v5611_v30  ;;  %4541 = vmatpush.bf16.msrb.mxu0 %v5707_v52  ;;  %v5836_v30 = vld [vmem:[%s8171_s19 + $0x2f4] sm:$0xf0]  ;;  %v1524_v52 = vadd.f32 %v7654_v48, %v1470_v2  ;;  %v5659_v25 = vor.u32 %v7193_v44, %v5656_v53  ;;  %v6115_v2 = vor.u32 %v7307_v23, %v6112_v36  ;;  %v7280_v48 = vld [vmem:[%s8171_s19 + $0x43c] sm:$0xf]  ;;  %v5896_v44 = vld [vmem:[%s8171_s19 + $0x36c] sm:$0xf0] }
 0x1e5   : > { %v5839_v1 = vor.u32 %v7238_v24, %v5836_v30  ;;  %v7277_v53 = vld [vmem:[%s8171_s19 + $0x424] sm:$0xf]  ;;  %v5992_v24 = vld [vmem:[%s8171_s19 + $0x42c] sm:$0xf0]  ;;  %v5968_v23 = vld [vmem:[%s8171_s19 + $0x3fc] sm:$0xf0] }
 0x1e6   : > { %v7301_v30 = vld [vmem:[%s8171_s19 + $0x4e4] sm:$0xf]  ;;  %v7295_v36 = vld [vmem:[%s8171_s19 + $0x4b4] sm:$0xf] }
 0x1e7   : > { %4503 = vmatpush.bf16.msra.mxu1 %v7035_v14  ;;  %4516 = vmatpush.bf16.msra.mxu2 %v5503_v19  ;;  %v6124_v14 = vld [vmem:[%s8171_s19 + $0x534] sm:$0xf0]  ;;  %v5563_v19 = vor.u32 %v7169_v6, %v5560_v29  ;;  %v7253_v29 = vld [vmem:[%s8171_s19 + $0x364] sm:$0xf] }
 0x1e8   : > { %4529 = vmatpush.bf16.msra.mxu3 %v5599_v34  ;;  %4542 = vmatpush.bf16.msrb.mxu0 %v5695_v58  ;;  %v5935_v34 = vor.u32 %v7262_v57, %v5932_v35  ;;  %v1541_v58 = vmax.f32 %v1524_v52, 0.0  ;;  %v6127_v51 = vor.u32 %v7310_v49, %v6124_v14  ;;  %v6088_v52 = vld [vmem:[%s8171_s19 + $0x4ec] sm:$0xf0]  ;;  %v5899_v35 = vor.u32 %v7253_v29, %v5896_v44  ;;  %v7250_v49 = vld [vmem:[%s8171_s19 + $0x34c] sm:$0xf] }
 0x1e9   : > { %v6091_v4 = vor.u32 %v7301_v30, %v6088_v52  ;;  %v5884_v14 = vld [vmem:[%s8171_s19 + $0x354] sm:$0xf0]  ;;  %v5848_v29 = vld [vmem:[%s8171_s19 + $0x30c] sm:$0xf0]  ;;  %v7289_v52 = vld [vmem:[%s8171_s19 + $0x484] sm:$0xf] }
 0x1ea   : > { %v9405_v0 = vpack.c.bf16 %v1541_v58, %v1541_v58  ;;  %v5944_v30 = vld [vmem:[%s8171_s19 + $0x3cc] sm:$0xf0] }
 0x1eb   : > { %4504 = vmatpush.bf16.msra.mxu1 %v7023_v61  ;;  %4517 = vmatpush.bf16.msra.mxu2 %v5491_v33  ;;  %v7283_v61 = vld [vmem:[%s8171_s19 + $0x454] sm:$0xf]  ;;  %v6016_v33 = vld [vmem:[%s8171_s19 + $0x45c] sm:$0xf0] }
 0x1ec   : > { %4530 = vmatpush.bf16.msra.mxu3 %v5587_v5  ;;  %4543 = vmatpush.bf16.msrb.mxu0 %v5683_v7  ;;  %v5827_v5 = vor.u32 %v7235_v42, %v5824_v45  ;;  %v5923_v7 = vor.u32 %v7259_v17, %v5920_v22  ;;  %v6019_v8 = vor.u32 %v7283_v61, %v6016_v33  ;;  %v7223_v45 = vld [vmem:[%s8171_s19 + $0x274] sm:$0xf]  ;;  %v5872_v61 = vld [vmem:[%s8171_s19 + $0x33c] sm:$0xf0] }
 0x1ed   : > { %v5887_v42 = vor.u32 %v7250_v49, %v5884_v14  ;;  %v7247_v22 = vld [vmem:[%s8171_s19 + $0x334] sm:$0xf] }
 0x1ee   : > { %v7271_v33 = vld [vmem:[%s8171_s19 + $0x3f4] sm:$0xf]  ;;  %v5875_v56 = vor.u32 %v7247_v22, %v5872_v61 }
 0x1ef   : > { %4505 = vmatpush.bf16.msra.mxu1 %v7011_v41  ;;  %4518 = vmatpush.bf16.msra.mxu2 %v5479_v9  ;;  %v7304_v41 = vld [vmem:[%s8171_s19 + $0x4fc] sm:$0xf]  ;;  %v6100_v9 = vld [vmem:[%s8171_s19 + $0x504] sm:$0xf0]  ;;  %v7355_v61 = vld [vmem:[%s8171_s19 + $0x694] sm:$0xf] }
 0x1f0   : > { %4531 = vmatpush.bf16.msra.mxu3 %v5575_v60  ;;  %4544 = vmatpush.bf16.msrb.mxu0 %v5671_v62  ;;  %v5800_v60 = vld [vmem:[%s8171_s19 + $0x2ac] sm:$0xf0]  ;;  %v6007_v62 = vor.u32 %v7280_v48, %v6004_v59  ;;  %v6103_v6 = vor.u32 %v7304_v41, %v6100_v9  ;;  %v5860_v48 = vld [vmem:[%s8171_s19 + $0x324] sm:$0xf0]  ;;  %v7268_v59 = vld [vmem:[%s8171_s19 + $0x3dc] sm:$0xf] }
 0x1f1   : > { %v5803_v57 = vor.u32 %v7229_v21, %v5800_v60  ;;  %v5956_v41 = vld [vmem:[%s8171_s19 + $0x3e4] sm:$0xf0]  ;;  %v7292_v9 = vld [vmem:[%s8171_s19 + $0x49c] sm:$0xf]  ;;  %v5863_v60 = vor.u32 %v7244_v31, %v5860_v48 }
 0x1f2   : > { %v5959_v44 = vor.u32 %v7268_v59, %v5956_v41  ;;  %v6292_v31 = vld [vmem:[%s8171_s19 + $0x684] sm:$0xf0]  ;;  %v7376_v41 = vld [vmem:[%s8171_s19 + $0x73c] sm:$0xf] }
 0x1f3   : > { %4506 = vmatpush.bf16.msra.mxu1 %v6999_v43  ;;  %4519 = vmatpush.bf16.msra.mxu2 %v5467_v13  ;;  %v5788_v43 = vld [vmem:[%s8171_s19 + $0x294] sm:$0xf0]  ;;  %v5995_v13 = vor.u32 %v7277_v53, %v5992_v24  ;;  %v7265_v24 = vld [vmem:[%s8171_s19 + $0x3c4] sm:$0xf] }
 0x1f4   : > { %4532 = vmatpush.bf16.msra.mxu3 %v5563_v19  ;;  %4545 = vmatpush.bf16.msrb.mxu0 %v5659_v25  ;;  %v7274_v19 = vld [vmem:[%s8171_s19 + $0x40c] sm:$0xf]  ;;  %v5980_v25 = vld [vmem:[%s8171_s19 + $0x414] sm:$0xf0]  ;;  %v5791_v58 = vor.u32 %v7226_v20, %v5788_v43 }
 0x1f5   : > { %v6220_v20 = vld [vmem:[%s8171_s19 + $0x5f4] sm:$0xf0]  ;;  %v7358_v43 = vld [vmem:[%s8171_s19 + $0x6ac] sm:$0xf] }
 0x1f6   : > { %4507 = vmatmul.bf16.vlgmr.msra.gmra.mxu1 %v9405_v0  ;;  %4520 = vmatmul.bf16.vlgmr.msra.gmra.mxu2 %v9013_v63 }
 0x1f7   : > { %4551 = vmatpush.bf16.msrb.mxu1 %v5839_v1  ;;  %4564 = vmatpush.bf16.msrb.mxu2 %v5935_v34  ;;  %v7298_v1 = vld [vmem:[%s8171_s19 + $0x4cc] sm:$0xf]  ;;  %v6076_v34 = vld [vmem:[%s8171_s19 + $0x4d4] sm:$0xf0] }
 0x1f8   : > { %4577 = vmatpush.bf16.msrb.mxu3 %v6031_v55  ;;  %4590 = vmatpush.bf16.msra.mxu0 %v6127_v51  ;;  %v5776_v55 = vld [vmem:[%s8171_s19 + $0x27c] sm:$0xf0]  ;;  %v5983_v51 = vor.u32 %v7274_v19, %v5980_v25  ;;  %v6079_v17 = vor.u32 %v7298_v1, %v6076_v34  ;;  %v6412_v19 = vld [vmem:[%s8171_s19 + $0x774] sm:$0xf0]  ;;  %v7406_v25 = vld [vmem:[%s8171_s19 + $0x82c] sm:$0xf]  ;;  %v5947_v34 = vor.u32 %v7265_v24, %v5944_v30 }
 0x1f9   : > { %4533 = vmatmul.bf16.vlgmr.msra.gmra.mxu3 %v9021_v28  ;;  %4546 = vmatmul.bf16.vlgmr.msrb.gmra.mxu0 %v9036_v11  ;;  %v6508_v1 = vld [vmem:[%s8171_s19 + $0x834] sm:$0xf0]  ;;  %v6184_v24 = vld [vmem:[%s8171_s19 + $0x5ac] sm:$0xf0] }
 0x1fa   : > { %v6511_v22 = vor.u32 %v7406_v25, %v6508_v1  ;;  %v7322_v25 = vld [vmem:[%s8171_s19 + $0x58c] sm:$0xf]  ;;  %v6172_v1 = vld [vmem:[%s8171_s19 + $0x594] sm:$0xf0] }
 0x1fb   : > { %4552 = vmatpush.bf16.msrb.mxu1 %v5827_v5  ;;  %4565 = vmatpush.bf16.msrb.mxu2 %v5923_v7  ;;  %v6064_v5 = vld [vmem:[%s8171_s19 + $0x4bc] sm:$0xf0]  ;;  %v5779_v7 = vor.u32 %v7223_v45, %v5776_v55  ;;  %v7331_v55 = vld [vmem:[%s8171_s19 + $0x5d4] sm:$0xf] }
 0x1fc   : > { %4578 = vmatpush.bf16.msrb.mxu3 %v6019_v8  ;;  %4591 = vmatpush.bf16.msra.mxu0 %v6115_v2  ;;  %v5764_v8 = vld [vmem:[%s8171_s19 + $0x264] sm:$0xf0]  ;;  %v5971_v2 = vor.u32 %v7271_v33, %v5968_v23  ;;  %v6067_v47 = vor.u32 %v7295_v36, %v6064_v5  ;;  %v6304_v33 = vld [vmem:[%s8171_s19 + $0x69c] sm:$0xf0]  ;;  %v7379_v23 = vld [vmem:[%s8171_s19 + $0x754] sm:$0xf] }
 0x1fd   : > { %v5767_v21 = vor.u32 %v7220_v15, %v5764_v8  ;;  %v6400_v36 = vld [vmem:[%s8171_s19 + $0x75c] sm:$0xf0]  ;;  %v7403_v5 = vld [vmem:[%s8171_s19 + $0x814] sm:$0xf]  ;;  %v6307_v8 = vor.u32 %v7355_v61, %v6304_v33  ;;  %v6364_v61 = vld [vmem:[%s8171_s19 + $0x714] sm:$0xf0] }
 0x1fe   : > { %v6403_v48 = vor.u32 %v7379_v23, %v6400_v36  ;;  %v7394_v33 = vld [vmem:[%s8171_s19 + $0x7cc] sm:$0xf]  ;;  %v6460_v23 = vld [vmem:[%s8171_s19 + $0x7d4] sm:$0xf0] }
 0x1ff   : > { %4553 = vmatpush.bf16.msrb.mxu1 %v5815_v16  ;;  %4566 = vmatpush.bf16.msrb.mxu2 %v5911_v27  ;;  %v6052_v16 = vld [vmem:[%s8171_s19 + $0x4a4] sm:$0xf0]  ;;  %v7217_v27 = vld [vmem:[%s8171_s19 + $0x244] sm:$0xf] }
 0x200   : > { %4579 = vmatpush.bf16.msrb.mxu3 %v6007_v62  ;;  %4592 = vmatpush.bf16.msra.mxu0 %v6103_v6  ;;  %v5752_v62 = vld [vmem:[%s8171_s19 + $0x24c] sm:$0xf0]  ;;  %v7241_v6 = vld [vmem:[%s8171_s19 + $0x304] sm:$0xf]  ;;  %v6055_v53 = vor.u32 %v7292_v9, %v6052_v16  ;;  %v6388_v16 = vld [vmem:[%s8171_s19 + $0x744] sm:$0xf0] }
 0x201   : > { %v5755_v49 = vor.u32 %v7217_v27, %v5752_v62  ;;  %v5851_v14 = vor.u32 %v7241_v6, %v5848_v29  ;;  %v9481_v9 = vld [vmem:[%s8178_s14] ss:$8 sm:$0x7]  ;;  %v7400_v27 = vld [vmem:[%s8171_s19 + $0x7fc] sm:$0xf]  ;;  %v6391_v30 = vor.u32 %v7376_v41, %v6388_v16 }
 0x202   : > { %v2109_v29 = vperm.slane %v9481_v9, 0  ;;  %v7367_v41 = vld [vmem:[%s8171_s19 + $0x6f4] sm:$0xf]  ;;  %v6352_v16 = vld [vmem:[%s8171_s19 + $0x6fc] sm:$0xf0] }
 0x203   : > { %4554 = vmatpush.bf16.msrb.mxu1 %v5803_v57  ;;  %4567 = vmatpush.bf16.msrb.mxu2 %v5899_v35  ;;  %v6040_v57 = vld [vmem:[%s8171_s19 + $0x48c] sm:$0xf0]  ;;  %v7334_v35 = vld [vmem:[%s8171_s19 + $0x5ec] sm:$0xf] }
 0x204   : > { %4580 = vmatpush.bf16.msrb.mxu3 %v5995_v13  ;;  %4593 = vmatpush.bf16.msra.mxu0 %v6091_v4  ;;  %v6316_v13 = vld [vmem:[%s8171_s19 + $0x6b4] sm:$0xf0]  ;;  %v7382_v4 = vld [vmem:[%s8171_s19 + $0x76c] sm:$0xf] }
 0x205   : > { %v6319_v45 = vor.u32 %v7358_v43, %v6316_v13  ;;  %v6376_v43 = vld [vmem:[%s8171_s19 + $0x72c] sm:$0xf0]  ;;  %v7397_v13 = vld [vmem:[%s8171_s19 + $0x7e4] sm:$0xf] }
 0x207   : > { %4555 = vmatpush.bf16.msrb.mxu1 %v5791_v58  ;;  %4568 = vmatpush.bf16.msrb.mxu2 %v5887_v42  ;;  %v6043_v58 = vor.u32 %v7289_v52, %v6040_v57  ;;  %v6223_v42 = vor.u32 %v7334_v35, %v6220_v20  ;;  %v7349_v57 = vld [vmem:[%s8171_s19 + $0x664] sm:$0xf]  ;;  %v6280_v35 = vld [vmem:[%s8171_s19 + $0x66c] sm:$0xf0] }
 0x208   : > { %4581 = vmatpush.bf16.msrb.mxu3 %v5983_v51  ;;  %4594 = vmatpush.bf16.msra.mxu0 %v6079_v17  ;;  %v6208_v51 = vld [vmem:[%s8171_s19 + $0x5dc] sm:$0xf0]  ;;  %v6415_v17 = vor.u32 %v7382_v4, %v6412_v19  ;;  %v7373_v20 = vld [vmem:[%s8171_s19 + $0x724] sm:$0xf]  ;;  %v6472_v4 = vld [vmem:[%s8171_s19 + $0x7ec] sm:$0xf0]  ;;  %v6283_v19 = vor.u32 %v7349_v57, %v6280_v35 }
 0x209   : > { %v6211_v15 = vor.u32 %v7331_v55, %v6208_v51  ;;  %v6268_v55 = vld [vmem:[%s8171_s19 + $0x654] sm:$0xf0]  ;;  %v7370_v51 = vld [vmem:[%s8171_s19 + $0x70c] sm:$0xf]  ;;  %v7340_v57 = vld [vmem:[%s8171_s19 + $0x61c] sm:$0xf] }
 0x20a   : > { %v6244_v35 = vld [vmem:[%s8171_s19 + $0x624] sm:$0xf0] }
 0x20b   : > { %4556 = vmatpush.bf16.msrb.mxu1 %v5779_v7  ;;  %4569 = vmatpush.bf16.msrb.mxu2 %v5875_v56  ;;  %v6496_v7 = vld [vmem:[%s8171_s19 + $0x81c] sm:$0xf0]  ;;  %v7328_v56 = vld [vmem:[%s8171_s19 + $0x5bc] sm:$0xf] }
 0x20c   : > { %4582 = vmatpush.bf16.msrb.mxu3 %v5971_v2  ;;  %4595 = vmatpush.bf16.msra.mxu0 %v6067_v47  ;;  %v6196_v2 = vld [vmem:[%s8171_s19 + $0x5c4] sm:$0xf0]  ;;  %v7352_v47 = vld [vmem:[%s8171_s19 + $0x67c] sm:$0xf]  ;;  %v6499_v59 = vor.u32 %v7403_v5, %v6496_v7  ;;  %v6175_v7 = vor.u32 %v7322_v25, %v6172_v1  ;;  %v6247_v25 = vor.u32 %v7340_v57, %v6244_v35  ;;  %v7475_v57 = vld [vmem:[%s8171_s19 + $0xa54] sm:$0xf] }
 0x20d   : > { %v6199_v62 = vor.u32 %v7328_v56, %v6196_v2  ;;  %v6295_v6 = vor.u32 %v7352_v47, %v6292_v31  ;;  %v6160_v2 = vld [vmem:[%s8171_s19 + $0x57c] sm:$0xf0]  ;;  %v6367_v47 = vor.u32 %v7370_v51, %v6364_v61  ;;  %v6463_v31 = vor.u32 %v7394_v33, %v6460_v23  ;;  %v7385_v61 = vld [vmem:[%s8171_s19 + $0x784] sm:$0xf]  ;;  %v6424_v33 = vld [vmem:[%s8171_s19 + $0x78c] sm:$0xf0] }
 0x20e   : > { %v7430_v23 = vld [vmem:[%s8171_s19 + $0x8ec] sm:$0xf] }
 0x20f   : > { %4557 = vmatpush.bf16.msrb.mxu1 %v5767_v21  ;;  %4570 = vmatpush.bf16.msrb.mxu2 %v5863_v60  ;;  %v6484_v21 = vld [vmem:[%s8171_s19 + $0x804] sm:$0xf0]  ;;  %v4300_v60 = vpop.f32.mrf.mxu1 }
 0x210   : > { %4583 = vmatpush.bf16.msrb.mxu3 %v5959_v44  ;;  %4596 = vmatpush.bf16.msra.mxu0 %v6055_v53  ;;  %v7325_v53 = vld [vmem:[%s8171_s19 + $0x5a4] sm:$0xf]  ;;  %v6487_v52 = vor.u32 %v7400_v27, %v6484_v21  ;;  %v7391_v27 = vld [vmem:[%s8171_s19 + $0x7b4] sm:$0xf]  ;;  %v6448_v21 = vld [vmem:[%s8171_s19 + $0x7bc] sm:$0xf0] }
 0x211   : > { %v4339_v44 = vpop.f32.mrf.mxu0 }
 0x213   : > { %4558 = vmatpush.bf16.msrb.mxu1 %v5755_v49  ;;  %4571 = vmatpush.bf16.msrb.mxu2 %v5851_v14  ;;  %v4301_v49 = vadd.f32 %v4300_v60, %v2109_v29  ;;  %v6187_v14 = vor.u32 %v7325_v53, %v6184_v24  ;;  %v7316_v29 = vld [vmem:[%s8171_s19 + $0x55c] sm:$0xf]  ;;  %v6148_v53 = vld [vmem:[%s8171_s19 + $0x564] sm:$0xf0]  ;;  %v6355_v24 = vor.u32 %v7367_v41, %v6352_v16 }
 0x214   : > { %4584 = vmatpush.bf16.msrb.mxu3 %v5947_v34  ;;  %4597 = vmatpush.bf16.msra.mxu0 %v6043_v58  ;;  %v6379_v34 = vor.u32 %v7373_v20, %v6376_v43  ;;  %v6475_v58 = vor.u32 %v7397_v13, %v6472_v4  ;;  %v6340_v43 = vld [vmem:[%s8171_s19 + $0x6e4] sm:$0xf0]  ;;  %v7388_v13 = vld [vmem:[%s8171_s19 + $0x79c] sm:$0xf] }
 0x215   : > { %v6436_v4 = vld [vmem:[%s8171_s19 + $0x7a4] sm:$0xf0] }
 0x216   : > { %4559 = vmatmul.bf16.vlgmr.msrb.gmra.mxu1 %v9046_v3  ;;  %4572 = vmatmul.bf16.vlgmr.msrb.gmra.mxu2 %v9150_v39  ;;  %v6439_v51 = vor.u32 %v7388_v13, %v6436_v4  ;;  %v6880_v13 = vld [vmem:[%s8171_s19 + $0xb1c] sm:$0xf0] }
 0x217   : > { %4603 = vmatpush.bf16.msra.mxu1 %v6223_v42  ;;  %4616 = vmatpush.bf16.msra.mxu2 %v6319_v45  ;;  %v4313_v42 = vpop.f32.mrf.mxu2  ;;  %v7346_v45 = vld [vmem:[%s8171_s19 + $0x64c] sm:$0xf]  ;;  %v4302_v36 = vpop.f32.mrf.mxu1 }
 0x218   : > { %4629 = vmatpush.bf16.msra.mxu3 %v6415_v17  ;;  %4642 = vmatpush.bf16.msrb.mxu0 %v6511_v22  ;;  %v4314_v17 = vadd.f32 %v4313_v42, %v4301_v49  ;;  %v4326_v22 = vpop.f32.mrf.mxu3  ;;  %v6271_v56 = vor.u32 %v7346_v45, %v6268_v55  ;;  %v7337_v42 = vld [vmem:[%s8171_s19 + $0x604] sm:$0xf]  ;;  %v6232_v45 = vld [vmem:[%s8171_s19 + $0x60c] sm:$0xf0]  ;;  %v6604_v36 = vld [vmem:[%s8171_s19 + $0x8f4] sm:$0xf0] }
 0x219   : > { %4585 = vmatmul.bf16.vlgmr.msrb.gmra.mxu3 %v9157_v26  ;;  %4598 = vmatmul.bf16.vlgmr.msra.gmra.mxu0 %v9164_v10  ;;  %v6607_v16 = vor.u32 %v7430_v23, %v6604_v36  ;;  %v7421_v36 = vld [vmem:[%s8171_s19 + $0x8a4] sm:$0xf] }
 0x21a   : > { %v4327_v5 = vadd.f32 %v4326_v22, %v4314_v17  ;;  %v7361_v17 = vld [vmem:[%s8171_s19 + $0x6c4] sm:$0xf]  ;;  %v6328_v22 = vld [vmem:[%s8171_s19 + $0x6cc] sm:$0xf0] }
 0x21b   : > { %4604 = vmatpush.bf16.msra.mxu1 %v6211_v15  ;;  %4617 = vmatpush.bf16.msra.mxu2 %v6307_v8  ;;  %v4341_v15 = vpop.f32.mrf.mxu0  ;;  %v7319_v8 = vld [vmem:[%s8171_s19 + $0x574] sm:$0xf] }
 0x21c   : > { %4630 = vmatpush.bf16.msra.mxu3 %v6403_v48  ;;  %4643 = vmatpush.bf16.msrb.mxu0 %v6499_v59  ;;  %v7343_v48 = vld [vmem:[%s8171_s19 + $0x634] sm:$0xf]  ;;  %v6256_v59 = vld [vmem:[%s8171_s19 + $0x63c] sm:$0xf0]  ;;  %v4340_v60 = vadd.f32 %v4339_v44, %v4327_v5  ;;  %v7364_v44 = vld [vmem:[%s8171_s19 + $0x6dc] sm:$0xf] }
 0x21d   : > { %v6343_v55 = vor.u32 %v7364_v44, %v6340_v43  ;;  %v7454_v5 = vld [vmem:[%s8171_s19 + $0x9ac] sm:$0xf]  ;;  %v7499_v43 = vld [vmem:[%s8171_s19 + $0xb14] sm:$0xf] }
 0x21f   : > { %4605 = vmatpush.bf16.msra.mxu1 %v6199_v62  ;;  %4618 = vmatpush.bf16.msra.mxu2 %v6295_v6  ;;  %v6163_v62 = vor.u32 %v7319_v8, %v6160_v2  ;;  %v6259_v6 = vor.u32 %v7343_v48, %v6256_v59  ;;  %v4352_v49 = vpop.f32.mrf.mxu1  ;;  %v6235_v8 = vor.u32 %v7337_v42, %v6232_v45  ;;  %v6796_v2 = vld [vmem:[%s8171_s19 + $0xa74] sm:$0xf0]  ;;  %v7448_v42 = vld [vmem:[%s8171_s19 + $0x97c] sm:$0xf]  ;;  %v6676_v45 = vld [vmem:[%s8171_s19 + $0x984] sm:$0xf0] }
 0x220   : > { %4631 = vmatpush.bf16.msra.mxu3 %v6391_v30  ;;  %4644 = vmatpush.bf16.msrb.mxu0 %v6487_v52  ;;  %v6451_v30 = vor.u32 %v7391_v27, %v6448_v21  ;;  %v4315_v52 = vpop.f32.mrf.mxu2  ;;  %v4328_v20 = vpop.f32.mrf.mxu3  ;;  %v4353_v1 = vadd.f32 %v4352_v49, %v4340_v60  ;;  %v6331_v48 = vor.u32 %v7361_v17, %v6328_v22  ;;  %v7496_v17 = vld [vmem:[%s8171_s19 + $0xafc] sm:$0xf]  ;;  %v6868_v22 = vld [vmem:[%s8171_s19 + $0xb04] sm:$0xf0] }
 0x221   : > { %v6427_v59 = vor.u32 %v7385_v61, %v6424_v33  ;;  %v6688_v52 = vld [vmem:[%s8171_s19 + $0x99c] sm:$0xf0]  ;;  %v6679_v33 = vor.u32 %v7448_v42, %v6676_v45 }
 0x222   : > { %v6784_v20 = vld [vmem:[%s8171_s19 + $0xa5c] sm:$0xf0] }
 0x223   : > { %4606 = vmatpush.bf16.msra.mxu1 %v6187_v14  ;;  %4619 = vmatpush.bf16.msra.mxu2 %v6283_v19  ;;  %v7313_v14 = vld [vmem:[%s8171_s19 + $0x544] sm:$0xf]  ;;  %v6151_v19 = vor.u32 %v7316_v29, %v6148_v53  ;;  %v6736_v45 = vld [vmem:[%s8171_s19 + $0x9fc] sm:$0xf0] }
 0x224   : > { %4632 = vmatpush.bf16.msra.mxu3 %v6379_v34  ;;  %4645 = vmatpush.bf16.msrb.mxu0 %v6475_v58  ;;  %v4391_v34 = vpop.f32.mrf.mxu0  ;;  %v6136_v58 = vld [vmem:[%s8171_s19 + $0x54c] sm:$0xf0] }
 0x225   : > { %v6139_v15 = vor.u32 %v7313_v14, %v6136_v58  ;;  %v7424_v14 = vld [vmem:[%s8171_s19 + $0x8bc] sm:$0xf]  ;;  %v6883_v58 = vor.u32 %v7499_v43, %v6880_v13  ;;  %v7415_v43 = vld [vmem:[%s8171_s19 + $0x874] sm:$0xf]  ;;  %v6544_v13 = vld [vmem:[%s8171_s19 + $0x87c] sm:$0xf0] }
 0x227   : > { %4607 = vmatpush.bf16.msra.mxu1 %v6175_v7  ;;  %4620 = vmatpush.bf16.msra.mxu2 %v6271_v56  ;;  %v6700_v7 = vld [vmem:[%s8171_s19 + $0x9b4] sm:$0xf0]  ;;  %v7478_v56 = vld [vmem:[%s8171_s19 + $0xa6c] sm:$0xf] }
 0x228   : > { %4633 = vmatpush.bf16.msra.mxu3 %v6367_v47  ;;  %4646 = vmatpush.bf16.msrb.mxu0 %v6463_v31  ;;  %v7502_v47 = vld [vmem:[%s8171_s19 + $0xb2c] sm:$0xf]  ;;  %v6892_v31 = vld [vmem:[%s8171_s19 + $0xb34] sm:$0xf0]  ;;  %v4365_v41 = vpop.f32.mrf.mxu2  ;;  %v6703_v27 = vor.u32 %v7454_v5, %v6700_v7  ;;  %v4378_v60 = vpop.f32.mrf.mxu3  ;;  %v6799_v29 = vor.u32 %v7478_v56, %v6796_v2  ;;  %v6568_v5 = vld [vmem:[%s8171_s19 + $0x8ac] sm:$0xf0]  ;;  %v6871_v56 = vor.u32 %v7496_v17, %v6868_v22 }
 0x229   : > { %v4366_v21 = vadd.f32 %v4365_v41, %v4353_v1  ;;  %v6895_v53 = vor.u32 %v7502_v47, %v6892_v31  ;;  %v6787_v1 = vor.u32 %v7475_v57, %v6784_v20  ;;  %v7469_v2 = vld [vmem:[%s8171_s19 + $0xa24] sm:$0xf]  ;;  %v6760_v47 = vld [vmem:[%s8171_s19 + $0xa2c] sm:$0xf0]  ;;  %v7490_v57 = vld [vmem:[%s8171_s19 + $0xacc] sm:$0xf] }
 0x22a   : > { %v7493_v31 = vld [vmem:[%s8171_s19 + $0xae4] sm:$0xf] }
 0x22b   : > { %4608 = vmatpush.bf16.msra.mxu1 %v6163_v62  ;;  %4621 = vmatpush.bf16.msra.mxu2 %v6259_v6  ;;  %v7427_v62 = vld [vmem:[%s8171_s19 + $0x8d4] sm:$0xf]  ;;  %v6592_v6 = vld [vmem:[%s8171_s19 + $0x8dc] sm:$0xf0]  ;;  %v4379_v35 = vadd.f32 %v4378_v60, %v4366_v21  ;;  %v7418_v60 = vld [vmem:[%s8171_s19 + $0x88c] sm:$0xf] }
 0x22c   : > { %4634 = vmatpush.bf16.msra.mxu3 %v6355_v24  ;;  %4647 = vmatpush.bf16.msrb.mxu0 %v6451_v30  ;;  %v4354_v24 = vpop.f32.mrf.mxu1  ;;  %v7451_v30 = vld [vmem:[%s8171_s19 + $0x994] sm:$0xf]  ;;  %v4393_v44 = vpop.f32.mrf.mxu0  ;;  %v6595_v4 = vor.u32 %v7427_v62, %v6592_v6  ;;  %v6556_v62 = vld [vmem:[%s8171_s19 + $0x894] sm:$0xf0]  ;;  %v6763_v6 = vor.u32 %v7469_v2, %v6760_v47  ;;  %v6724_v2 = vld [vmem:[%s8171_s19 + $0x9e4] sm:$0xf0] }
 0x22d   : > { %v6691_v49 = vor.u32 %v7451_v30, %v6688_v52  ;;  %v6652_v24 = vld [vmem:[%s8171_s19 + $0x954] sm:$0xf0]  ;;  %v7466_v30 = vld [vmem:[%s8171_s19 + $0xa0c] sm:$0xf]  ;;  %v6559_v44 = vor.u32 %v7418_v60, %v6556_v62  ;;  %v7484_v47 = vld [vmem:[%s8171_s19 + $0xa9c] sm:$0xf] }
 0x22e   : > { %v6748_v52 = vld [vmem:[%s8171_s19 + $0xa14] sm:$0xf0]  ;;  %v7433_v60 = vld [vmem:[%s8171_s19 + $0x904] sm:$0xf]  ;;  %v6616_v62 = vld [vmem:[%s8171_s19 + $0x90c] sm:$0xf0] }
 0x22f   : > { %4609 = vmatpush.bf16.msra.mxu1 %v6151_v19  ;;  %4622 = vmatpush.bf16.msra.mxu2 %v6247_v25  ;;  %v6580_v19 = vld [vmem:[%s8171_s19 + $0x8c4] sm:$0xf0]  ;;  %v4392_v25 = vadd.f32 %v4391_v34, %v4379_v35  ;;  %v6844_v35 = vld [vmem:[%s8171_s19 + $0xad4] sm:$0xf0] }
 0x230   : > { %4635 = vmatpush.bf16.msra.mxu3 %v6343_v55  ;;  %4648 = vmatpush.bf16.msrb.mxu0 %v6439_v51  ;;  %v7472_v55 = vld [vmem:[%s8171_s19 + $0xa3c] sm:$0xf]  ;;  %v6772_v51 = vld [vmem:[%s8171_s19 + $0xa44] sm:$0xf0]  ;;  %v4367_v34 = vpop.f32.mrf.mxu2  ;;  %v6583_v61 = vor.u32 %v7424_v14, %v6580_v19  ;;  %v4380_v23 = vpop.f32.mrf.mxu3  ;;  %v7439_v19 = vld [vmem:[%s8171_s19 + $0x934] sm:$0xf] }
 0x231   : > { %v6775_v7 = vor.u32 %v7472_v55, %v6772_v51  ;;  %v7487_v55 = vld [vmem:[%s8171_s19 + $0xab4] sm:$0xf]  ;;  %v6832_v51 = vld [vmem:[%s8171_s19 + $0xabc] sm:$0xf0]  ;;  %v7412_v23 = vld [vmem:[%s8171_s19 + $0x85c] sm:$0xf] }
 0x233   : > { %4610 = vmatpush.bf16.msra.mxu1 %v6139_v15  ;;  %4623 = vmatpush.bf16.msra.mxu2 %v6235_v8  ;;  %v7445_v15 = vld [vmem:[%s8171_s19 + $0x964] sm:$0xf]  ;;  %v6664_v8 = vld [vmem:[%s8171_s19 + $0x96c] sm:$0xf0] }
 0x234   : > { %4636 = vmatpush.bf16.msra.mxu3 %v6331_v48  ;;  %4649 = vmatpush.bf16.msrb.mxu0 %v6427_v59  ;;  %v6856_v48 = vld [vmem:[%s8171_s19 + $0xaec] sm:$0xf0]  ;;  %v4404_v59 = vpop.f32.mrf.mxu1  ;;  %v6667_v21 = vor.u32 %v7445_v15, %v6664_v8  ;;  %v6628_v15 = vld [vmem:[%s8171_s19 + $0x924] sm:$0xf0]  ;;  %v7460_v8 = vld [vmem:[%s8171_s19 + $0x9dc] sm:$0xf] }
 0x235   : > { %v4405_v41 = vadd.f32 %v4404_v59, %v4392_v25  ;;  %v6640_v25 = vld [vmem:[%s8171_s19 + $0x93c] sm:$0xf0]  ;;  %v7409_v59 = vld [vmem:[%s8171_s19 + $0x844] sm:$0xf] }
 0x236   : > { %4611 = vmatmul.bf16.vlgmr.msra.gmra.mxu1 %v9159_v50  ;;  %4624 = vmatmul.bf16.vlgmr.msra.gmra.mxu2 %v9218_v40 }
 0x237   : > { %4655 = vmatpush.bf16.msrb.mxu1 %v6607_v16  ;;  %4668 = vmatpush.bf16.msrb.mxu2 %v6703_v27  ;;  %v4443_v16 = vpop.f32.mrf.mxu0  ;;  %v6571_v27 = vor.u32 %v7421_v36, %v6568_v5  ;;  %v6532_v36 = vld [vmem:[%s8171_s19 + $0x864] sm:$0xf0] }
 0x238   : > { %4681 = vmatpush.bf16.msrb.mxu3 %v6799_v29  ;;  %4694 = vmatpush.bf16.msra.mxu0 %v6895_v53  ;;  %v6859_v29 = vor.u32 %v7493_v31, %v6856_v48  ;;  %v7442_v53 = vld [vmem:[%s8171_s19 + $0x94c] sm:$0xf]  ;;  %v6820_v31 = vld [vmem:[%s8171_s19 + $0xaa4] sm:$0xf0] }
 0x239   : > { %4637 = vmatmul.bf16.vlgmr.msra.gmra.mxu3 %v9220_v38  ;;  %4650 = vmatmul.bf16.vlgmr.msrb.gmra.mxu0 %v9225_v37  ;;  %v6655_v20 = vor.u32 %v7442_v53, %v6652_v24  ;;  %v4417_v14 = vpop.f32.mrf.mxu2  ;;  %v7457_v53 = vld [vmem:[%s8171_s19 + $0x9c4] sm:$0xf]  ;;  %v6712_v24 = vld [vmem:[%s8171_s19 + $0x9cc] sm:$0xf0] }
 0x23b   : > { %4656 = vmatpush.bf16.msrb.mxu1 %v6595_v4  ;;  %4669 = vmatpush.bf16.msrb.mxu2 %v6691_v49  ;;  %v6751_v4 = vor.u32 %v7466_v30, %v6748_v52  ;;  %v6847_v49 = vor.u32 %v7490_v57, %v6844_v35  ;;  %v7481_v30 = vld [vmem:[%s8171_s19 + $0xa84] sm:$0xf]  ;;  %v6808_v57 = vld [vmem:[%s8171_s19 + $0xa8c] sm:$0xf0]  ;;  %v7526_v35 = vld [vmem:[%s8171_s19 + $0xbec] sm:$0xf] }
 0x23c   : > { %4682 = vmatpush.bf16.msrb.mxu3 %v6787_v1  ;;  %4695 = vmatpush.bf16.msra.mxu0 %v6883_v58  ;;  %v7463_v1 = vld [vmem:[%s8171_s19 + $0x9f4] sm:$0xf]  ;;  %v4418_v58 = vadd.f32 %v4417_v14, %v4405_v41  ;;  %v4430_v42 = vpop.f32.mrf.mxu3  ;;  %v4406_v17 = vpop.f32.mrf.mxu1  ;;  %v6535_v41 = vor.u32 %v7412_v23, %v6532_v36  ;;  %v7168_v14 = vld [vmem:[%s8171_s19 + $0xb8] sm:$0xf0]  ;;  %v7165_v23 = vld [vmem:[%s8171_s19 + $0xa0] sm:$0xf0] }
 0x23d   : > { %v6739_v5 = vor.u32 %v7463_v1, %v6736_v45  ;;  %v6715_v1 = vor.u32 %v7457_v53, %v6712_v24  ;;  %v5638_v36 = vld [vmem:[%s8171_s19 + $0x158] sm:$0xf] }
 0x23e   : > { %v4431_v22 = vadd.f32 %v4430_v42, %v4418_v58  ;;  %v6811_v58 = vor.u32 %v7481_v30, %v6808_v57  ;;  %v7541_v30 = vld [vmem:[%s8171_s19 + $0xc64] sm:$0xf]  ;;  %v5518_v57 = vld [vmem:[%s8171_s19 + $0x68] sm:$0xf] }
 0x23f   : > { %4657 = vmatpush.bf16.msrb.mxu1 %v6583_v61  ;;  %4670 = vmatpush.bf16.msrb.mxu2 %v6679_v33  ;;  %v4445_v34 = vpop.f32.mrf.mxu0  ;;  %v6547_v61 = vor.u32 %v7415_v43, %v6544_v13  ;;  %v6643_v33 = vor.u32 %v7439_v19, %v6640_v25  ;;  %v7084_v43 = vld [vmem:[%s8171_s19 + $0xcb4] sm:$0xf0]  ;;  %v5554_v13 = vld [vmem:[%s8171_s19 + $0xb0] sm:$0xf]  ;;  %v7192_v25 = vld [vmem:[%s8171_s19 + $0x178] sm:$0xf0] }
 0x240   : > { %4683 = vmatpush.bf16.msrb.mxu3 %v6775_v7  ;;  %4696 = vmatpush.bf16.msra.mxu0 %v6871_v56  ;;  %v6835_v7 = vor.u32 %v7487_v55, %v6832_v51  ;;  %v7436_v56 = vld [vmem:[%s8171_s19 + $0x91c] sm:$0xf]  ;;  %v9591_v48 = vadd.f32 %v4443_v16, %v4431_v22  ;;  %v6823_v16 = vor.u32 %v7484_v47, %v6820_v31  ;;  %v5650_v19 = vld [vmem:[%s8171_s19 + $0x170] sm:$0xf]  ;;  %v7523_v55 = vld [vmem:[%s8171_s19 + $0xbd4] sm:$0xf] }
 0x241   : > { %v6976_v51 = vld [vmem:[%s8171_s19 + $0xbdc] sm:$0xf0]  ;;  %v5555_v17 = vor.u32 %v7168_v14, %v5554_v13  ;;  %v5651_v22 = vor.u32 %v7192_v25, %v5650_v19  ;;  %v7547_v34 = vld [vmem:[%s8171_s19 + $0xc94] sm:$0xf]  ;;  %v7544_v31 = vld [vmem:[%s8171_s19 + $0xc7c] sm:$0xf] }
 0x242   : > { %v7514_v19 = vld [vmem:[%s8171_s19 + $0xb8c] sm:$0xf]  ;;  %v6940_v25 = vld [vmem:[%s8171_s19 + $0xb94] sm:$0xf0] }
 0x243   : > { %4658 = vmatpush.bf16.msrb.mxu1 %v6571_v27  ;;  %4671 = vmatpush.bf16.msrb.mxu2 %v6667_v21  ;;  %v6631_v27 = vor.u32 %v7436_v56, %v6628_v15  ;;  %v6520_v21 = vld [vmem:[%s8171_s19 + $0x84c] sm:$0xf0]  ;;  %v7520_v15 = vld [vmem:[%s8171_s19 + $0xbbc] sm:$0xf] }
 0x244   : > { %4684 = vmatpush.bf16.msrb.mxu3 %v6763_v6  ;;  %4697 = vmatpush.bf16.msra.mxu0 %v6859_v29  ;;  %v6727_v6 = vor.u32 %v7460_v8, %v6724_v2  ;;  %v4419_v29 = vpop.f32.mrf.mxu2  ;;  %v4432_v52 = vpop.f32.mrf.mxu3  ;;  %v6964_v8 = vld [vmem:[%s8171_s19 + $0xbc4] sm:$0xf0] }
 0x245   : > { %v6952_v29 = vld [vmem:[%s8171_s19 + $0xbac] sm:$0xf0] }
 0x246   : > { %v7048_v52 = vld [vmem:[%s8171_s19 + $0xc6c] sm:$0xf0] }
 0x247   : > { %4659 = vmatpush.bf16.msrb.mxu1 %v6559_v44  ;;  %4672 = vmatpush.bf16.msrb.mxu2 %v6655_v20  ;;  %v6988_v44 = vld [vmem:[%s8171_s19 + $0xbf4] sm:$0xf0]  ;;  %v7550_v20 = vld [vmem:[%s8171_s19 + $0xcac] sm:$0xf]  ;;  %v7051_v14 = vor.u32 %v7541_v30, %v7048_v52  ;;  %v7012_v30 = vld [vmem:[%s8171_s19 + $0xc24] sm:$0xf0] }
 0x248   : > { %4685 = vmatpush.bf16.msrb.mxu3 %v6751_v4  ;;  %4698 = vmatpush.bf16.msra.mxu0 %v6847_v49  ;;  %v6523_v4 = vor.u32 %v7409_v59, %v6520_v21  ;;  %v6619_v49 = vor.u32 %v7433_v60, %v6616_v62  ;;  %v6991_v42 = vor.u32 %v7526_v35, %v6988_v44  ;;  %v7060_v59 = vld [vmem:[%s8171_s19 + $0xc84] sm:$0xf0]  ;;  %v5626_v21 = vld [vmem:[%s8171_s19 + $0x140] sm:$0xf]  ;;  %v7186_v60 = vld [vmem:[%s8171_s19 + $0x148] sm:$0xf0] }
 0x249   : > { %v7087_v45 = vor.u32 %v7550_v20, %v7084_v43  ;;  %v6967_v62 = vor.u32 %v7520_v15, %v6964_v8  ;;  %v5627_v24 = vor.u32 %v7186_v60, %v5626_v21  ;;  %v7159_v35 = vld [vmem:[%s8171_s19 + $0x70] sm:$0xf0]  ;;  %v5614_v44 = vld [vmem:[%s8171_s19 + $0x128] sm:$0xf]  ;;  %v5494_v15 = vld [vmem:[%s8171_s19 + $0x38] sm:$0xf] }
 0x24a   : > { %v7183_v20 = vld [vmem:[%s8171_s19 + $0x130] sm:$0xf0]  ;;  %v5482_v52 = vld [vmem:[%s8171_s19 + $0x20] sm:$0xf] }
 0x24b   : > { %4660 = vmatpush.bf16.msrb.mxu1 %v6547_v61  ;;  %4673 = vmatpush.bf16.msrb.mxu2 %v6643_v33  ;;  %v7072_v61 = vld [vmem:[%s8171_s19 + $0xc9c] sm:$0xf0]  ;;  %v5542_v33 = vld [vmem:[%s8171_s19 + $0x98] sm:$0xf] }
 0x24c   : > { %4686 = vmatpush.bf16.msrb.mxu3 %v6739_v5  ;;  %4699 = vmatpush.bf16.msra.mxu0 %v6835_v7  ;;  %v7189_v5 = vld [vmem:[%s8171_s19 + $0x160] sm:$0xf0]  ;;  %v6979_v7 = vor.u32 %v7523_v55, %v6976_v51  ;;  %v7075_v56 = vor.u32 %v7547_v34, %v7072_v61  ;;  %v5543_v2 = vor.u32 %v7165_v23, %v5542_v33  ;;  %v5506_v55 = vld [vmem:[%s8171_s19 + $0x50] sm:$0xf]  ;;  %v7156_v51 = vld [vmem:[%s8171_s19 + $0x58] sm:$0xf0] }
 0x24d   : > { %v5639_v47 = vor.u32 %v7189_v5, %v5638_v36  ;;  %v7511_v61 = vld [vmem:[%s8171_s19 + $0xb74] sm:$0xf]  ;;  %v6928_v33 = vld [vmem:[%s8171_s19 + $0xb7c] sm:$0xf0]  ;;  %v5507_v23 = vor.u32 %v7156_v51, %v5506_v55  ;;  %v5566_v55 = vld [vmem:[%s8171_s19 + $0xc8] sm:$0xf] }
 0x24e   : > { %v6931_v60 = vor.u32 %v7511_v61, %v6928_v33  ;;  %v7240_v61 = vld [vmem:[%s8171_s19 + $0x2f8] sm:$0xf0]  ;;  %v5938_v33 = vld [vmem:[%s8171_s19 + $0x3b0] sm:$0xf] }
 0x24f   : > { %4661 = vmatpush.bf16.msrb.mxu1 %v6535_v41  ;;  %4674 = vmatpush.bf16.msrb.mxu2 %v6631_v27  ;;  %v5530_v41 = vld [vmem:[%s8171_s19 + $0x80] sm:$0xf]  ;;  %v7162_v27 = vld [vmem:[%s8171_s19 + $0x88] sm:$0xf0] }
 0x250   : > { %4687 = vmatpush.bf16.msrb.mxu3 %v6727_v6  ;;  %4700 = vmatpush.bf16.msra.mxu0 %v6823_v16  ;;  %v7063_v6 = vor.u32 %v7544_v31, %v7060_v59  ;;  %v7517_v16 = vld [vmem:[%s8171_s19 + $0xba4] sm:$0xf]  ;;  %v5531_v53 = vor.u32 %v7162_v27, %v5530_v41  ;;  %v5590_v31 = vld [vmem:[%s8171_s19 + $0xf8] sm:$0xf] }
 0x251   : > { %v7177_v59 = vld [vmem:[%s8171_s19 + $0x100] sm:$0xf0] }
 0x253   : > { %4662 = vmatpush.bf16.msrb.mxu1 %v6523_v4  ;;  %4675 = vmatpush.bf16.msrb.mxu2 %v6619_v49  ;;  %v4456_v43 = vpop.f32.mrf.mxu1  ;;  %v6955_v49 = vor.u32 %v7517_v16, %v6952_v29  ;;  %v6916_v16 = vld [vmem:[%s8171_s19 + $0xb64] sm:$0xf0] }
 0x254   : > { %4688 = vmatpush.bf16.msrb.mxu3 %v6715_v1  ;;  %4701 = vmatpush.bf16.msra.mxu0 %v6811_v58  ;;  %v4457_v13 = vadd.f32 %v4456_v43, %v9591_v48  ;;  %v5519_v1 = vor.u32 %v7159_v35, %v5518_v57  ;;  %v5615_v58 = vor.u32 %v7183_v20, %v5614_v44  ;;  %v7180_v48 = vld [vmem:[%s8171_s19 + $0x118] sm:$0xf0]  ;;  %v7150_v57 = vld [vmem:[%s8171_s19 + $0x28] sm:$0xf0]  ;;  %v5578_v35 = vld [vmem:[%s8171_s19 + $0xe0] sm:$0xf] }
 0x255   : > { %v7174_v44 = vld [vmem:[%s8171_s19 + $0xe8] sm:$0xf0]  ;;  %v7505_v43 = vld [vmem:[%s8171_s19 + $0xb44] sm:$0xf] }
 0x256   : > { %4663 = vmatmul.bf16.vlgmr.msrb.gmra.mxu1 %v9227_v32  ;;  %4676 = vmatmul.bf16.vlgmr.msrb.gmra.mxu2 %v9317_v46  ;;  %v4495_v4 = vpop.f32.mrf.mxu0 }
 0x257   : > { %4707 = vmatpush.bf16.msra.mxu1 %v6991_v42  ;;  %4720 = vmatpush.bf16.msra.mxu2 %v7087_v45  ;;  %v7538_v42 = vld [vmem:[%s8171_s19 + $0xc4c] sm:$0xf]  ;;  %v7036_v45 = vld [vmem:[%s8171_s19 + $0xc54] sm:$0xf0] }
 0x258   : > { %4733 = vmatpush.bf16.msra.mxu3 %v5555_v17  ;;  %4746 = vmatpush.bf16.msrb.mxu0 %v5651_v22  ;;  %v5602_v17 = vld [vmem:[%s8171_s19 + $0x110] sm:$0xf]  ;;  %v6943_v22 = vor.u32 %v7514_v19, %v6940_v25  ;;  %v7039_v34 = vor.u32 %v7538_v42, %v7036_v45  ;;  %v7529_v19 = vld [vmem:[%s8171_s19 + $0xc04] sm:$0xf]  ;;  %v5470_v42 = vld [vmem:[%s8171_s19 + $0x8] sm:$0xf] }
 0x259   : > { %4689 = vmatmul.bf16.vlgmr.msrb.gmra.mxu3 %v9327_v18  ;;  %4702 = vmatmul.bf16.vlgmr.msra.gmra.mxu0 %v9331_v12  ;;  %v5603_v36 = vor.u32 %v7180_v48, %v5602_v17  ;;  %v4469_v5 = vpop.f32.mrf.mxu2  ;;  %v7000_v25 = vld [vmem:[%s8171_s19 + $0xc0c] sm:$0xf0]  ;;  %v7147_v45 = vld [vmem:[%s8171_s19 + $0x10] sm:$0xf0] }
 0x25a   : > { %v4470_v8 = vadd.f32 %v4469_v5, %v4457_v13  ;;  %v7171_v17 = vld [vmem:[%s8171_s19 + $0xd0] sm:$0xf0]  ;;  %v5746_v48 = vld [vmem:[%s8171_s19 + $0x230] sm:$0xf]  ;;  %v7264_v5 = vld [vmem:[%s8171_s19 + $0x3b8] sm:$0xf0] }
 0x25b   : > { %4708 = vmatpush.bf16.msra.mxu1 %v6979_v7  ;;  %4721 = vmatpush.bf16.msra.mxu2 %v7075_v56  ;;  %v7535_v7 = vld [vmem:[%s8171_s19 + $0xc34] sm:$0xf]  ;;  %v7024_v56 = vld [vmem:[%s8171_s19 + $0xc3c] sm:$0xf0]  ;;  %v4458_v41 = vpop.f32.mrf.mxu1 }
 0x25c   : > { %4734 = vmatpush.bf16.msra.mxu3 %v5543_v2  ;;  %4747 = vmatpush.bf16.msrb.mxu0 %v5639_v47  ;;  %v4482_v2 = vpop.f32.mrf.mxu3  ;;  %v7153_v47 = vld [vmem:[%s8171_s19 + $0x40] sm:$0xf0]  ;;  %v5939_v41 = vor.u32 %v7264_v5, %v5938_v33  ;;  %v7204_v5 = vld [vmem:[%s8171_s19 + $0x1d8] sm:$0xf0] }
 0x25d   : > { %v4483_v27 = vadd.f32 %v4482_v2, %v4470_v8  ;;  %v5495_v29 = vor.u32 %v7153_v47, %v5494_v15  ;;  %v5471_v15 = vor.u32 %v7147_v45, %v5470_v42  ;;  %v5567_v8 = vor.u32 %v7171_v17, %v5566_v55  ;;  %v5806_v55 = vld [vmem:[%s8171_s19 + $0x2a8] sm:$0xf]  ;;  %v7255_v17 = vld [vmem:[%s8171_s19 + $0x370] sm:$0xf0] }
 0x25e   : > { %v4497_v21 = vpop.f32.mrf.mxu0 }
 0x25f   : > { %4709 = vmatpush.bf16.msra.mxu1 %v6967_v62  ;;  %4722 = vmatpush.bf16.msra.mxu2 %v7063_v6  ;;  %v7027_v62 = vor.u32 %v7535_v7, %v7024_v56  ;;  %v7508_v6 = vld [vmem:[%s8171_s19 + $0xb5c] sm:$0xf]  ;;  %v9662_v20 = vadd.f32 %v4495_v4, %v4483_v27  ;;  %v5579_v4 = vor.u32 %v7174_v44, %v5578_v35  ;;  %v6034_v7 = vld [vmem:[%s8171_s19 + $0x470] sm:$0xf]  ;;  %v5830_v21 = vld [vmem:[%s8171_s19 + $0x2d8] sm:$0xf] }
 0x260   : > { %4735 = vmatpush.bf16.msra.mxu3 %v5531_v53  ;;  %4748 = vmatpush.bf16.msrb.mxu0 %v5627_v24  ;;  %v5591_v53 = vor.u32 %v7177_v59, %v5590_v31  ;;  %v7532_v24 = vld [vmem:[%s8171_s19 + $0xc1c] sm:$0xf]  ;;  %v6919_v13 = vor.u32 %v7508_v6, %v6916_v16  ;;  %v5734_v31 = vld [vmem:[%s8171_s19 + $0x218] sm:$0xf]  ;;  %v7213_v59 = vld [vmem:[%s8171_s19 + $0x220] sm:$0xf0] }
 0x261   : > { %v7288_v56 = vld [vmem:[%s8171_s19 + $0x478] sm:$0xf0]  ;;  %v7261_v6 = vld [vmem:[%s8171_s19 + $0x3a0] sm:$0xf0]  ;;  %v6022_v16 = vld [vmem:[%s8171_s19 + $0x458] sm:$0xf] }
 0x262   : > { %v6035_v27 = vor.u32 %v7288_v56, %v6034_v7  ;;  %v5818_v44 = vld [vmem:[%s8171_s19 + $0x2c0] sm:$0xf]  ;;  %v5794_v7 = vld [vmem:[%s8171_s19 + $0x290] sm:$0xf] }
 0x263   : > { %4710 = vmatpush.bf16.msra.mxu1 %v6955_v49  ;;  %4723 = vmatpush.bf16.msra.mxu2 %v7051_v14  ;;  %v7015_v49 = vor.u32 %v7532_v24, %v7012_v30  ;;  %v6904_v14 = vld [vmem:[%s8171_s19 + $0xb4c] sm:$0xf0]  ;;  %v5722_v30 = vld [vmem:[%s8171_s19 + $0x200] sm:$0xf] }
 0x264   : > { %4736 = vmatpush.bf16.msra.mxu3 %v5519_v1  ;;  %4749 = vmatpush.bf16.msrb.mxu0 %v5615_v58  ;;  %v5483_v1 = vor.u32 %v7150_v57, %v5482_v52  ;;  %v4471_v58 = vpop.f32.mrf.mxu2  ;;  %v4484_v51 = vpop.f32.mrf.mxu3  ;;  %v7210_v52 = vld [vmem:[%s8171_s19 + $0x208] sm:$0xf0] }
 0x265   : > { %v7207_v58 = vld [vmem:[%s8171_s19 + $0x1f0] sm:$0xf0] }
 0x266   : > { %v7231_v51 = vld [vmem:[%s8171_s19 + $0x2b0] sm:$0xf0] }
 0x267   : > { %4711 = vmatpush.bf16.msra.mxu1 %v6943_v22  ;;  %4724 = vmatpush.bf16.msra.mxu2 %v7039_v34  ;;  %v7216_v22 = vld [vmem:[%s8171_s19 + $0x238] sm:$0xf0]  ;;  %v5842_v34 = vld [vmem:[%s8171_s19 + $0x2f0] sm:$0xf] }
 0x268   : > { %4737 = vmatpush.bf16.msra.mxu3 %v5507_v23  ;;  %4750 = vmatpush.bf16.msrb.mxu0 %v5603_v36  ;;  %v6907_v23 = vor.u32 %v7505_v43, %v6904_v14  ;;  %v7003_v36 = vor.u32 %v7529_v19, %v7000_v25  ;;  %v5747_v2 = vor.u32 %v7216_v22, %v5746_v48  ;;  %v7234_v43 = vld [vmem:[%s8171_s19 + $0x2c8] sm:$0xf0]  ;;  %v6010_v14 = vld [vmem:[%s8171_s19 + $0x440] sm:$0xf]  ;;  %v5998_v48 = vld [vmem:[%s8171_s19 + $0x428] sm:$0xf] }
 0x269   : > { %v5843_v47 = vor.u32 %v7240_v61, %v5842_v34  ;;  %v7282_v19 = vld [vmem:[%s8171_s19 + $0x448] sm:$0xf0]  ;;  %v5723_v25 = vor.u32 %v7210_v52, %v5722_v30  ;;  %v7249_v52 = vld [vmem:[%s8171_s19 + $0x340] sm:$0xf0] }
 0x26a   : > { %v6011_v45 = vor.u32 %v7282_v19, %v6010_v14  ;;  %v5674_v19 = vld [vmem:[%s8171_s19 + $0x1a0] sm:$0xf] }
 0x26b   : > { %4712 = vmatpush.bf16.msra.mxu1 %v6931_v60  ;;  %4725 = vmatpush.bf16.msra.mxu2 %v7027_v62  ;;  %v7237_v60 = vld [vmem:[%s8171_s19 + $0x2e0] sm:$0xf0]  ;;  %v5926_v62 = vld [vmem:[%s8171_s19 + $0x398] sm:$0xf] }
 0x26c   : > { %4738 = vmatpush.bf16.msra.mxu3 %v5495_v29  ;;  %4751 = vmatpush.bf16.msrb.mxu0 %v5591_v53  ;;  %v7285_v29 = vld [vmem:[%s8171_s19 + $0x460] sm:$0xf0]  ;;  %v5735_v53 = vor.u32 %v7213_v59, %v5734_v31  ;;  %v5831_v24 = vor.u32 %v7237_v60, %v5830_v21  ;;  %v5927_v57 = vor.u32 %v7261_v6, %v5926_v62  ;;  %v5986_v31 = vld [vmem:[%s8171_s19 + $0x410] sm:$0xf]  ;;  %v2110_v59 = vperm.slane %v9481_v9, 1 }
 0x26d   : > { %v6023_v35 = vor.u32 %v7285_v29, %v6022_v16  ;;  %v5686_v21 = vld [vmem:[%s8171_s19 + $0x1b8] sm:$0xf]  ;;  %v7201_v60 = vld [vmem:[%s8171_s19 + $0x1c0] sm:$0xf0] }
 0x26e   : > { %v5782_v29 = vld [vmem:[%s8171_s19 + $0x278] sm:$0xf] }
 0x26f   : > { %4713 = vmatpush.bf16.msra.mxu1 %v6919_v13  ;;  %4726 = vmatpush.bf16.msra.mxu2 %v7015_v49  ;;  %v5914_v13 = vld [vmem:[%s8171_s19 + $0x380] sm:$0xf]  ;;  %v7258_v49 = vld [vmem:[%s8171_s19 + $0x388] sm:$0xf0] }
 0x270   : > { %4739 = vmatpush.bf16.msra.mxu3 %v5483_v1  ;;  %4752 = vmatpush.bf16.msrb.mxu0 %v5579_v4  ;;  %v5819_v1 = vor.u32 %v7234_v43, %v5818_v44  ;;  %v5710_v4 = vld [vmem:[%s8171_s19 + $0x1e8] sm:$0xf]  ;;  %v5915_v42 = vor.u32 %v7258_v49, %v5914_v13  ;;  %v5687_v49 = vor.u32 %v7201_v60, %v5686_v21 }
 0x271   : > { %v5711_v33 = vor.u32 %v7207_v58, %v5710_v4  ;;  %v5770_v58 = vld [vmem:[%s8171_s19 + $0x260] sm:$0xf] }
 0x273   : > { %4714 = vmatpush.bf16.msra.mxu1 %v6907_v23  ;;  %4727 = vmatpush.bf16.msra.mxu2 %v7003_v36  ;;  %v4508_v22 = vpop.f32.mrf.mxu1  ;;  %v5807_v23 = vor.u32 %v7231_v51, %v5806_v55  ;;  %v5698_v36 = vld [vmem:[%s8171_s19 + $0x1d0] sm:$0xf]  ;;  %v7246_v55 = vld [vmem:[%s8171_s19 + $0x328] sm:$0xf0]  ;;  %v5962_v51 = vld [vmem:[%s8171_s19 + $0x3e0] sm:$0xf] }
 0x274   : > { %4740 = vmatpush.bf16.msra.mxu3 %v5471_v15  ;;  %4753 = vmatpush.bf16.msrb.mxu0 %v5567_v8  ;;  %v9709_v34 = vadd.f32 %v4508_v22, %v9662_v20  ;;  %v7228_v8 = vld [vmem:[%s8171_s19 + $0x298] sm:$0xf0] }
 0x275   : > { %v7276_v20 = vld [vmem:[%s8171_s19 + $0x418] sm:$0xf0] }
 0x276   : > { %4715 = vmatmul.bf16.vlgmr.msra.gmra.mxu1 %v9333_v54  ;;  %4728 = vmatmul.bf16.vlgmr.msra.gmra.mxu2 %v9405_v0  ;;  %v4547_v61 = vpop.f32.mrf.mxu0  ;;  %v5987_v6 = vor.u32 %v7276_v20, %v5986_v31  ;;  %v6130_v31 = vld [vmem:[%s8171_s19 + $0x530] sm:$0xf]  ;;  %v7312_v20 = vld [vmem:[%s8171_s19 + $0x538] sm:$0xf0] }
 0x277   : > { %4759 = vmatpush.bf16.msrb.mxu1 %v5747_v2  ;;  %4772 = vmatpush.bf16.msrb.mxu2 %v5843_v47  ;;  %v5890_v2 = vld [vmem:[%s8171_s19 + $0x350] sm:$0xf]  ;;  %v7252_v47 = vld [vmem:[%s8171_s19 + $0x358] sm:$0xf0] }
 0x278   : > { %4785 = vmatpush.bf16.msrb.mxu3 %v5939_v41  ;;  %4798 = vmatpush.bf16.msra.mxu0 %v6035_v27  ;;  %v5699_v41 = vor.u32 %v7204_v5, %v5698_v36  ;;  %v5795_v27 = vor.u32 %v7228_v8, %v5794_v7  ;;  %v5891_v62 = vor.u32 %v7252_v47, %v5890_v2  ;;  %v7219_v36 = vld [vmem:[%s8171_s19 + $0x250] sm:$0xf0]  ;;  %v5950_v8 = vld [vmem:[%s8171_s19 + $0x3c8] sm:$0xf] }
 0x279   : > { %4741 = vmatmul.bf16.vlgmr.msra.gmra.mxu3 %v9013_v63  ;;  %4754 = vmatmul.bf16.vlgmr.msrb.gmra.mxu0 %v9021_v28  ;;  %v5902_v63 = vld [vmem:[%s8171_s19 + $0x368] sm:$0xf]  ;;  %v7279_v28 = vld [vmem:[%s8171_s19 + $0x430] sm:$0xf0]  ;;  %v4521_v16 = vpop.f32.mrf.mxu2 }
 0x27a   : > { %v5903_v56 = vor.u32 %v7255_v17, %v5902_v63  ;;  %v5999_v15 = vor.u32 %v7279_v28, %v5998_v48  ;;  %v4522_v9 = vadd.f32 %v4521_v16, %v2110_v59  ;;  %v7270_v63 = vld [vmem:[%s8171_s19 + $0x3e8] sm:$0xf0]  ;;  %v5662_v48 = vld [vmem:[%s8171_s19 + $0x188] sm:$0xf]  ;;  %v7267_v47 = vld [vmem:[%s8171_s19 + $0x3d0] sm:$0xf0] }
 0x27b   : > { %4760 = vmatpush.bf16.msrb.mxu1 %v5735_v53  ;;  %4773 = vmatpush.bf16.msrb.mxu2 %v5831_v24  ;;  %v7225_v53 = vld [vmem:[%s8171_s19 + $0x280] sm:$0xf0]  ;;  %v5878_v24 = vld [vmem:[%s8171_s19 + $0x338] sm:$0xf]  ;;  %v4510_v44 = vpop.f32.mrf.mxu1  ;;  %v6226_v59 = vld [vmem:[%s8171_s19 + $0x5f0] sm:$0xf] }
 0x27c   : > { %4786 = vmatpush.bf16.msrb.mxu3 %v5927_v57  ;;  %4799 = vmatpush.bf16.msra.mxu0 %v6023_v35  ;;  %v4534_v30 = vpop.f32.mrf.mxu3  ;;  %v5974_v57 = vld [vmem:[%s8171_s19 + $0x3f8] sm:$0xf]  ;;  %v7273_v35 = vld [vmem:[%s8171_s19 + $0x400] sm:$0xf0]  ;;  %v5783_v14 = vor.u32 %v7225_v53, %v5782_v29  ;;  %v7384_v16 = vld [vmem:[%s8171_s19 + $0x778] sm:$0xf0]  ;;  %v5951_v53 = vor.u32 %v7267_v47, %v5950_v8 }
 0x27d   : > { %v4535_v43 = vadd.f32 %v4534_v30, %v4522_v9  ;;  %v5975_v4 = vor.u32 %v7273_v35, %v5974_v57  ;;  %v6118_v30 = vld [vmem:[%s8171_s19 + $0x518] sm:$0xf] }
 0x27e   : > { %v4549_v13 = vpop.f32.mrf.mxu0  ;;  %v6214_v44 = vld [vmem:[%s8171_s19 + $0x5d8] sm:$0xf] }
 0x27f   : > { %4761 = vmatpush.bf16.msrb.mxu1 %v5723_v25  ;;  %4774 = vmatpush.bf16.msrb.mxu2 %v5819_v1  ;;  %v7198_v25 = vld [vmem:[%s8171_s19 + $0x1a8] sm:$0xf0]  ;;  %v5879_v1 = vor.u32 %v7249_v52, %v5878_v24  ;;  %v9736_v17 = vadd.f32 %v4547_v61, %v4535_v43  ;;  %v5963_v61 = vor.u32 %v7270_v63, %v5962_v51  ;;  %v7309_v52 = vld [vmem:[%s8171_s19 + $0x520] sm:$0xf0]  ;;  %v6310_v13 = vld [vmem:[%s8171_s19 + $0x698] sm:$0xf] }
 0x280   : > { %4787 = vmatpush.bf16.msrb.mxu3 %v5915_v42  ;;  %4800 = vmatpush.bf16.msra.mxu0 %v6011_v45  ;;  %v7222_v42 = vld [vmem:[%s8171_s19 + $0x268] sm:$0xf0]  ;;  %v5866_v45 = vld [vmem:[%s8171_s19 + $0x320] sm:$0xf]  ;;  %v5675_v28 = vor.u32 %v7198_v25, %v5674_v19  ;;  %v6131_v24 = vor.u32 %v7312_v20, %v6130_v31  ;;  %v7333_v43 = vld [vmem:[%s8171_s19 + $0x5e0] sm:$0xf0]  ;;  %v6119_v25 = vor.u32 %v7309_v52, %v6118_v30 }
 0x281   : > { %v5771_v22 = vor.u32 %v7222_v42, %v5770_v58  ;;  %v5867_v5 = vor.u32 %v7246_v55, %v5866_v45  ;;  %v4523_v7 = vpop.f32.mrf.mxu2  ;;  %v7381_v19 = vld [vmem:[%s8171_s19 + $0x760] sm:$0xf0]  ;;  %v7306_v58 = vld [vmem:[%s8171_s19 + $0x508] sm:$0xf0]  ;;  %v6202_v55 = vld [vmem:[%s8171_s19 + $0x5c0] sm:$0xf] }
 0x282   : > { %v7330_v51 = vld [vmem:[%s8171_s19 + $0x5c8] sm:$0xf0]  ;;  %v6298_v63 = vld [vmem:[%s8171_s19 + $0x680] sm:$0xf]  ;;  %v7327_v7 = vld [vmem:[%s8171_s19 + $0x5b0] sm:$0xf0] }
 0x283   : > { %4762 = vmatpush.bf16.msrb.mxu1 %v5711_v33  ;;  %4775 = vmatpush.bf16.msrb.mxu2 %v5807_v23  ;;  %v7195_v33 = vld [vmem:[%s8171_s19 + $0x190] sm:$0xf0]  ;;  %v5758_v23 = vld [vmem:[%s8171_s19 + $0x248] sm:$0xf]  ;;  %v7297_v30 = vld [vmem:[%s8171_s19 + $0x4c0] sm:$0xf0] }
 0x284   : > { %4788 = vmatpush.bf16.msrb.mxu3 %v5903_v56  ;;  %4801 = vmatpush.bf16.msra.mxu0 %v5999_v15  ;;  %v5854_v56 = vld [vmem:[%s8171_s19 + $0x308] sm:$0xf]  ;;  %v7243_v15 = vld [vmem:[%s8171_s19 + $0x310] sm:$0xf0]  ;;  %v4536_v2 = vpop.f32.mrf.mxu3  ;;  %v5663_v21 = vor.u32 %v7195_v33, %v5662_v48  ;;  %v5759_v60 = vor.u32 %v7219_v36, %v5758_v23  ;;  %v7354_v48 = vld [vmem:[%s8171_s19 + $0x688] sm:$0xf0]  ;;  %v6203_v23 = vor.u32 %v7330_v51, %v6202_v55 }
 0x285   : > { %v5855_v29 = vor.u32 %v7243_v15, %v5854_v56  ;;  %v7303_v36 = vld [vmem:[%s8171_s19 + $0x4f0] sm:$0xf0]  ;;  %v6286_v56 = vld [vmem:[%s8171_s19 + $0x668] sm:$0xf]  ;;  %v6058_v51 = vld [vmem:[%s8171_s19 + $0x4a0] sm:$0xf] }
 0x286   : > { %v6382_v15 = vld [vmem:[%s8171_s19 + $0x728] sm:$0xf] }
 0x287   : > { %4763 = vmatpush.bf16.msrb.mxu1 %v5699_v41  ;;  %4776 = vmatpush.bf16.msrb.mxu2 %v5795_v27  ;;  %v7336_v41 = vld [vmem:[%s8171_s19 + $0x5f8] sm:$0xf0]  ;;  %v6322_v27 = vld [vmem:[%s8171_s19 + $0x6b0] sm:$0xf] }
 0x288   : > { %4789 = vmatpush.bf16.msrb.mxu3 %v5891_v62  ;;  %4802 = vmatpush.bf16.msra.mxu0 %v5987_v6  ;;  %v7360_v62 = vld [vmem:[%s8171_s19 + $0x6b8] sm:$0xf0]  ;;  %v6418_v6 = vld [vmem:[%s8171_s19 + $0x770] sm:$0xf]  ;;  %v6227_v9 = vor.u32 %v7336_v41, %v6226_v59 }
 0x289   : > { %v6323_v57 = vor.u32 %v7360_v62, %v6322_v27  ;;  %v6419_v35 = vor.u32 %v7384_v16, %v6418_v6  ;;  %v6082_v59 = vld [vmem:[%s8171_s19 + $0x4d0] sm:$0xf]  ;;  %v7300_v41 = vld [vmem:[%s8171_s19 + $0x4d8] sm:$0xf0] }
 0x28a   : > { %v7324_v62 = vld [vmem:[%s8171_s19 + $0x598] sm:$0xf0]  ;;  %v6274_v6 = vld [vmem:[%s8171_s19 + $0x650] sm:$0xf] }
 0x28b   : > { %4764 = vmatpush.bf16.msrb.mxu1 %v5687_v49  ;;  %4777 = vmatpush.bf16.msrb.mxu2 %v5783_v14  ;;  %v7357_v49 = vld [vmem:[%s8171_s19 + $0x6a0] sm:$0xf0]  ;;  %v6406_v14 = vld [vmem:[%s8171_s19 + $0x758] sm:$0xf]  ;;  %v7348_v16 = vld [vmem:[%s8171_s19 + $0x658] sm:$0xf0] }
 0x28c   : > { %4790 = vmatpush.bf16.msrb.mxu3 %v5879_v1  ;;  %4803 = vmatpush.bf16.msra.mxu0 %v5975_v4  ;;  %v6215_v1 = vor.u32 %v7333_v43, %v6214_v44  ;;  %v6106_v4 = vld [vmem:[%s8171_s19 + $0x500] sm:$0xf]  ;;  %v6311_v42 = vor.u32 %v7357_v49, %v6310_v13  ;;  %v6407_v45 = vor.u32 %v7381_v19, %v6406_v14  ;;  %v6166_v44 = vld [vmem:[%s8171_s19 + $0x578] sm:$0xf]  ;;  %v7321_v43 = vld [vmem:[%s8171_s19 + $0x580] sm:$0xf0] }
 0x28d   : > { %v6107_v33 = vor.u32 %v7306_v58, %v6106_v4  ;;  %v6275_v52 = vor.u32 %v7348_v16, %v6274_v6  ;;  %v6262_v13 = vld [vmem:[%s8171_s19 + $0x638] sm:$0xf]  ;;  %v7345_v19 = vld [vmem:[%s8171_s19 + $0x640] sm:$0xf0]  ;;  %v6167_v55 = vor.u32 %v7321_v43, %v6166_v44  ;;  %v7432_v6 = vld [vmem:[%s8171_s19 + $0x8f8] sm:$0xf0] }
 0x28e   : > { %v6706_v16 = vld [vmem:[%s8171_s19 + $0x9b0] sm:$0xf]  ;;  %v6502_v44 = vld [vmem:[%s8171_s19 + $0x818] sm:$0xf]  ;;  %v7405_v43 = vld [vmem:[%s8171_s19 + $0x820] sm:$0xf0] }
 0x28f   : > { %4765 = vmatpush.bf16.msrb.mxu1 %v5675_v28  ;;  %4778 = vmatpush.bf16.msrb.mxu2 %v5771_v22  ;;  %v6394_v28 = vld [vmem:[%s8171_s19 + $0x740] sm:$0xf]  ;;  %v7378_v22 = vld [vmem:[%s8171_s19 + $0x748] sm:$0xf0] }
 0x290   : > { %4791 = vmatpush.bf16.msrb.mxu3 %v5867_v5  ;;  %4804 = vmatpush.bf16.msra.mxu0 %v5963_v61  ;;  %v6395_v5 = vor.u32 %v7378_v22, %v6394_v28  ;;  %v6190_v61 = vld [vmem:[%s8171_s19 + $0x5a8] sm:$0xf]  ;;  %v6154_v22 = vld [vmem:[%s8171_s19 + $0x560] sm:$0xf] }
 0x291   : > { %v6191_v20 = vor.u32 %v7327_v7, %v6190_v61  ;;  %v6046_v61 = vld [vmem:[%s8171_s19 + $0x488] sm:$0xf] }
 0x293   : > { %4766 = vmatpush.bf16.msrb.mxu1 %v5663_v21  ;;  %4779 = vmatpush.bf16.msrb.mxu2 %v5759_v60  ;;  %v4560_v8 = vpop.f32.mrf.mxu1  ;;  %v6178_v60 = vld [vmem:[%s8171_s19 + $0x590] sm:$0xf] }
 0x294   : > { %4792 = vmatpush.bf16.msrb.mxu3 %v5855_v29  ;;  %4805 = vmatpush.bf16.msra.mxu0 %v5951_v53  ;;  %v4561_v2 = vadd.f32 %v4560_v8, %v9736_v17  ;;  %v6370_v29 = vld [vmem:[%s8171_s19 + $0x710] sm:$0xf]  ;;  %v7372_v17 = vld [vmem:[%s8171_s19 + $0x718] sm:$0xf0]  ;;  %v6083_v53 = vor.u32 %v7300_v41, %v6082_v59  ;;  %v6334_v59 = vld [vmem:[%s8171_s19 + $0x6c8] sm:$0xf] }
 0x296   : > { %4767 = vmatmul.bf16.vlgmr.msrb.gmra.mxu1 %v9036_v11  ;;  %4780 = vmatmul.bf16.vlgmr.msrb.gmra.mxu2 %v9046_v3  ;;  %v6094_v11 = vld [vmem:[%s8171_s19 + $0x4e8] sm:$0xf]  ;;  %v6299_v3 = vor.u32 %v7354_v48, %v6298_v63  ;;  %v4599_v47 = vpop.f32.mrf.mxu0  ;;  %v7294_v63 = vld [vmem:[%s8171_s19 + $0x4a8] sm:$0xf0]  ;;  %v6263_v48 = vor.u32 %v7345_v19, %v6262_v13  ;;  %v7429_v19 = vld [vmem:[%s8171_s19 + $0x8e0] sm:$0xf0] }
 0x297   : > { %4811 = vmatpush.bf16.msra.mxu1 %v6131_v24  ;;  %4824 = vmatpush.bf16.msra.mxu2 %v6227_v9  ;;  %v6095_v31 = vor.u32 %v7303_v36, %v6094_v11  ;;  %v6179_v24 = vor.u32 %v7324_v62, %v6178_v60  ;;  %v6070_v9 = vld [vmem:[%s8171_s19 + $0x4b8] sm:$0xf]  ;;  %v7342_v11 = vld [vmem:[%s8171_s19 + $0x628] sm:$0xf0]  ;;  %v6346_v36 = vld [vmem:[%s8171_s19 + $0x6e0] sm:$0xf]  ;;  %v6059_v7 = vor.u32 %v7294_v63, %v6058_v51 }
 0x298   : > { %4837 = vmatpush.bf16.msra.mxu3 %v6323_v57  ;;  %4850 = vmatpush.bf16.msrb.mxu0 %v6419_v35  ;;  %v6371_v57 = vor.u32 %v7372_v17, %v6370_v29  ;;  %v7408_v60 = vld [vmem:[%s8171_s19 + $0x838] sm:$0xf0]  ;;  %v6610_v62 = vld [vmem:[%s8171_s19 + $0x8f0] sm:$0xf]  ;;  %v7402_v51 = vld [vmem:[%s8171_s19 + $0x808] sm:$0xf0] }
 0x299   : > { %4793 = vmatmul.bf16.vlgmr.msrb.gmra.mxu3 %v9150_v39  ;;  %4806 = vmatmul.bf16.vlgmr.msra.gmra.mxu0 %v9157_v26  ;;  %v7351_v39 = vld [vmem:[%s8171_s19 + $0x670] sm:$0xf0]  ;;  %v4573_v35 = vpop.f32.mrf.mxu2 }
 0x29a   : > { %v7375_v26 = vld [vmem:[%s8171_s19 + $0x730] sm:$0xf0]  ;;  %v6287_v27 = vor.u32 %v7351_v39, %v6286_v56  ;;  %v4574_v49 = vadd.f32 %v4573_v35, %v4561_v2  ;;  %v6611_v35 = vor.u32 %v7432_v6, %v6610_v62  ;;  %v6562_v62 = vld [vmem:[%s8171_s19 + $0x890] sm:$0xf]  ;;  %v7420_v6 = vld [vmem:[%s8171_s19 + $0x898] sm:$0xf0] }
 0x29b   : > { %4812 = vmatpush.bf16.msra.mxu1 %v6119_v25  ;;  %4825 = vmatpush.bf16.msra.mxu2 %v6215_v1  ;;  %v6383_v21 = vor.u32 %v7375_v26, %v6382_v15  ;;  %v6358_v25 = vld [vmem:[%s8171_s19 + $0x6f8] sm:$0xf]  ;;  %v7369_v1 = vld [vmem:[%s8171_s19 + $0x700] sm:$0xf0]  ;;  %v4562_v4 = vpop.f32.mrf.mxu1  ;;  %v7291_v39 = vld [vmem:[%s8171_s19 + $0x490] sm:$0xf0] }
 0x29c   : > { %4838 = vmatpush.bf16.msra.mxu3 %v6311_v42  ;;  %4851 = vmatpush.bf16.msrb.mxu0 %v6407_v45  ;;  %v4586_v14 = vpop.f32.mrf.mxu3  ;;  %v6071_v45 = vor.u32 %v7297_v30, %v6070_v9  ;;  %v6359_v28 = vor.u32 %v7369_v1, %v6358_v25  ;;  %v6142_v15 = vld [vmem:[%s8171_s19 + $0x548] sm:$0xf]  ;;  %v7315_v26 = vld [vmem:[%s8171_s19 + $0x550] sm:$0xf0]  ;;  %v6047_v29 = vor.u32 %v7291_v39, %v6046_v61  ;;  %v7480_v9 = vld [vmem:[%s8171_s19 + $0xa78] sm:$0xf0] }
 0x29d   : > { %v4587_v58 = vadd.f32 %v4586_v14, %v4574_v49  ;;  %v6143_v17 = vor.u32 %v7315_v26, %v6142_v15  ;;  %v6598_v14 = vld [vmem:[%s8171_s19 + $0x8d8] sm:$0xf]  ;;  %v7453_v1 = vld [vmem:[%s8171_s19 + $0x9a0] sm:$0xf0]  ;;  %v6574_v39 = vld [vmem:[%s8171_s19 + $0x8a8] sm:$0xf] }
 0x29e   : > { %v4601_v42 = vpop.f32.mrf.mxu0  ;;  %v6694_v25 = vld [vmem:[%s8171_s19 + $0x998] sm:$0xf]  ;;  %v7423_v15 = vld [vmem:[%s8171_s19 + $0x8b0] sm:$0xf0]  ;;  %v6670_v26 = vld [vmem:[%s8171_s19 + $0x968] sm:$0xf] }
 0x29f   : > { %4813 = vmatpush.bf16.msra.mxu1 %v6107_v33  ;;  %4826 = vmatpush.bf16.msra.mxu2 %v6203_v23  ;;  %v7318_v33 = vld [vmem:[%s8171_s19 + $0x568] sm:$0xf0]  ;;  %v6250_v23 = vld [vmem:[%s8171_s19 + $0x620] sm:$0xf]  ;;  %v6790_v4 = vld [vmem:[%s8171_s19 + $0xa58] sm:$0xf]  ;;  %v6503_v42 = vor.u32 %v7405_v43, %v6502_v44  ;;  %v6695_v63 = vor.u32 %v7453_v1, %v6694_v25 }
 0x2a0   : > { %4839 = vmatpush.bf16.msra.mxu3 %v6299_v3  ;;  %4852 = vmatpush.bf16.msrb.mxu0 %v6395_v5  ;;  %v7366_v3 = vld [vmem:[%s8171_s19 + $0x6e8] sm:$0xf0]  ;;  %v9807_v5 = vadd.f32 %v4599_v47, %v4587_v58  ;;  %v6155_v56 = vor.u32 %v7318_v33, %v6154_v22  ;;  %v6251_v8 = vor.u32 %v7342_v11, %v6250_v23  ;;  %v7477_v58 = vld [vmem:[%s8171_s19 + $0xa60] sm:$0xf0]  ;;  %v6682_v33 = vld [vmem:[%s8171_s19 + $0x980] sm:$0xf] }
 0x2a1   : > { %v6347_v2 = vor.u32 %v7366_v3, %v6346_v36  ;;  %v4575_v47 = vpop.f32.mrf.mxu2  ;;  %v7426_v22 = vld [vmem:[%s8171_s19 + $0x8c8] sm:$0xf0]  ;;  %v6778_v11 = vld [vmem:[%s8171_s19 + $0xa40] sm:$0xf]  ;;  %v6550_v44 = vld [vmem:[%s8171_s19 + $0x878] sm:$0xf] }
 0x2a2   : > { %v7450_v23 = vld [vmem:[%s8171_s19 + $0x988] sm:$0xf0]  ;;  %v7417_v43 = vld [vmem:[%s8171_s19 + $0x880] sm:$0xf0]  ;;  %v6742_v25 = vld [vmem:[%s8171_s19 + $0x9f8] sm:$0xf] }
 0x2a3   : > { %4814 = vmatpush.bf16.msra.mxu1 %v6095_v31  ;;  %4827 = vmatpush.bf16.msra.mxu2 %v6191_v20  ;;  %v6238_v31 = vld [vmem:[%s8171_s19 + $0x608] sm:$0xf]  ;;  %v7339_v20 = vld [vmem:[%s8171_s19 + $0x610] sm:$0xf0]  ;;  %v7474_v36 = vld [vmem:[%s8171_s19 + $0xa48] sm:$0xf0] }
 0x2a4   : > { %4840 = vmatpush.bf16.msra.mxu3 %v6287_v27  ;;  %4853 = vmatpush.bf16.msrb.mxu0 %v6383_v21  ;;  %v4588_v41 = vpop.f32.mrf.mxu3  ;;  %v7363_v27 = vld [vmem:[%s8171_s19 + $0x6d0] sm:$0xf0]  ;;  %v6514_v21 = vld [vmem:[%s8171_s19 + $0x830] sm:$0xf]  ;;  %v6239_v30 = vor.u32 %v7339_v20, %v6238_v31  ;;  %v7465_v1 = vld [vmem:[%s8171_s19 + $0xa00] sm:$0xf0] }
 0x2a5   : > { %v6466_v41 = vld [vmem:[%s8171_s19 + $0x7d0] sm:$0xf] }
 0x2a7   : > { %4815 = vmatpush.bf16.msra.mxu1 %v6083_v53  ;;  %4828 = vmatpush.bf16.msra.mxu2 %v6179_v24  ;;  %v7456_v53 = vld [vmem:[%s8171_s19 + $0x9b8] sm:$0xf0]  ;;  %v6802_v24 = vld [vmem:[%s8171_s19 + $0xa70] sm:$0xf] }
 0x2a8   : > { %4841 = vmatpush.bf16.msra.mxu3 %v6275_v52  ;;  %4854 = vmatpush.bf16.msrb.mxu0 %v6371_v57  ;;  %v6335_v52 = vor.u32 %v7363_v27, %v6334_v59  ;;  %v6515_v57 = vor.u32 %v7408_v60, %v6514_v21  ;;  %v6707_v13 = vor.u32 %v7456_v53, %v6706_v16  ;;  %v7396_v27 = vld [vmem:[%s8171_s19 + $0x7d8] sm:$0xf0]  ;;  %v6658_v16 = vld [vmem:[%s8171_s19 + $0x950] sm:$0xf] }
 0x2a9   : > { %v6803_v49 = vor.u32 %v7480_v9, %v6802_v24  ;;  %v6575_v59 = vor.u32 %v7423_v15, %v6574_v39  ;;  %v6467_v53 = vor.u32 %v7396_v27, %v6466_v41  ;;  %v6563_v24 = vor.u32 %v7420_v6, %v6562_v62  ;;  %v6454_v9 = vld [vmem:[%s8171_s19 + $0x7b8] sm:$0xf]  ;;  %v6526_v39 = vld [vmem:[%s8171_s19 + $0x848] sm:$0xf]  ;;  %v7504_v41 = vld [vmem:[%s8171_s19 + $0xb38] sm:$0xf0] }
 0x2aa   : > { %v6994_v27 = vld [vmem:[%s8171_s19 + $0xbf0] sm:$0xf] }
 0x2ab   : > { %4816 = vmatpush.bf16.msra.mxu1 %v6071_v45  ;;  %4829 = vmatpush.bf16.msra.mxu2 %v6167_v55  ;;  %v6599_v45 = vor.u32 %v7429_v19, %v6598_v14  ;;  %v6490_v55 = vld [vmem:[%s8171_s19 + $0x800] sm:$0xf]  ;;  %v7441_v19 = vld [vmem:[%s8171_s19 + $0x940] sm:$0xf0]  ;;  %v7090_v6 = vld [vmem:[%s8171_s19 + $0xcb0] sm:$0xf] }
 0x2ac   : > { %4842 = vmatpush.bf16.msra.mxu3 %v6263_v48  ;;  %4855 = vmatpush.bf16.msrb.mxu0 %v6359_v28  ;;  %v6791_v48 = vor.u32 %v7477_v58, %v6790_v4  ;;  %v6586_v28 = vld [vmem:[%s8171_s19 + $0x8c0] sm:$0xf]  ;;  %v6491_v3 = vor.u32 %v7402_v51, %v6490_v55  ;;  %v6551_v55 = vor.u32 %v7417_v43, %v6550_v44  ;;  %v7549_v44 = vld [vmem:[%s8171_s19 + $0xca0] sm:$0xf0] }
 0x2ad   : > { %v6587_v61 = vor.u32 %v7426_v22, %v6586_v28  ;;  %v6442_v51 = vld [vmem:[%s8171_s19 + $0x7a0] sm:$0xf]  ;;  %v6743_v28 = vor.u32 %v7465_v1, %v6742_v25  ;;  %v7522_v1 = vld [vmem:[%s8171_s19 + $0xbc8] sm:$0xf0] }
 0x2ae   : > { %v6538_v22 = vld [vmem:[%s8171_s19 + $0x860] sm:$0xf] }
 0x2af   : > { %4817 = vmatpush.bf16.msra.mxu1 %v6059_v7  ;;  %4830 = vmatpush.bf16.msra.mxu2 %v6155_v56  ;;  %v7399_v7 = vld [vmem:[%s8171_s19 + $0x7f0] sm:$0xf0]  ;;  %v6779_v56 = vor.u32 %v7474_v36, %v6778_v11  ;;  %v7438_v11 = vld [vmem:[%s8171_s19 + $0x928] sm:$0xf0]  ;;  %v6730_v36 = vld [vmem:[%s8171_s19 + $0x9e0] sm:$0xf] }
 0x2b0   : > { %4843 = vmatpush.bf16.msra.mxu3 %v6251_v8  ;;  %4856 = vmatpush.bf16.msrb.mxu0 %v6347_v2  ;;  %v6766_v8 = vld [vmem:[%s8171_s19 + $0xa28] sm:$0xf]  ;;  %v6970_v25 = vld [vmem:[%s8171_s19 + $0xbc0] sm:$0xf] }
 0x2b3   : > { %4818 = vmatpush.bf16.msra.mxu1 %v6047_v29  ;;  %4831 = vmatpush.bf16.msra.mxu2 %v6143_v17  ;;  %v4612_v2 = vpop.f32.mrf.mxu1  ;;  %v7444_v29 = vld [vmem:[%s8171_s19 + $0x958] sm:$0xf0]  ;;  %v6754_v17 = vld [vmem:[%s8171_s19 + $0xa10] sm:$0xf] }
 0x2b4   : > { %4844 = vmatpush.bf16.msra.mxu3 %v6239_v30  ;;  %4857 = vmatpush.bf16.msrb.mxu0 %v6335_v52  ;;  %v4613_v47 = vadd.f32 %v4612_v2, %v9807_v5  ;;  %v7468_v5 = vld [vmem:[%s8171_s19 + $0xa18] sm:$0xf0]  ;;  %v7393_v30 = vld [vmem:[%s8171_s19 + $0x7c0] sm:$0xf0]  ;;  %v6659_v52 = vor.u32 %v7444_v29, %v6658_v16  ;;  %v7435_v2 = vld [vmem:[%s8171_s19 + $0x910] sm:$0xf0] }
 0x2b5   : > { %v7552_v16 = vld [vmem:[%s8171_s19 + $0xcb8] sm:$0xf0] }
 0x2b6   : > { %4819 = vmatmul.bf16.vlgmr.msra.gmra.mxu1 %v9164_v10  ;;  %4832 = vmatmul.bf16.vlgmr.msra.gmra.mxu2 %v9159_v50  ;;  %v6478_v10 = vld [vmem:[%s8171_s19 + $0x7e8] sm:$0xf]  ;;  %v6683_v50 = vor.u32 %v7450_v23, %v6682_v33  ;;  %v4651_v31 = vpop.f32.mrf.mxu0  ;;  %v7414_v33 = vld [vmem:[%s8171_s19 + $0x868] sm:$0xf0]  ;;  %v6634_v23 = vld [vmem:[%s8171_s19 + $0x920] sm:$0xf] }
 0x2b7   : > { %4863 = vmatpush.bf16.msrb.mxu1 %v6515_v57  ;;  %4876 = vmatpush.bf16.msrb.mxu2 %v6611_v35  ;;  %v6479_v20 = vor.u32 %v7399_v7, %v6478_v10  ;;  %v6755_v57 = vor.u32 %v7468_v5, %v6754_v17  ;;  %v6539_v7 = vor.u32 %v7414_v33, %v6538_v22  ;;  %v7543_v22 = vld [vmem:[%s8171_s19 + $0xc70] sm:$0xf0] }
 0x2b8   : > { %4889 = vmatpush.bf16.msrb.mxu3 %v6707_v13  ;;  %4902 = vmatpush.bf16.msra.mxu0 %v6803_v49  ;;  %v6646_v13 = vld [vmem:[%s8171_s19 + $0x938] sm:$0xf]  ;;  %v6635_v15 = vor.u32 %v7438_v11, %v6634_v23 }
 0x2b9   : > { %4845 = vmatmul.bf16.vlgmr.msra.gmra.mxu3 %v9218_v40  ;;  %4858 = vmatmul.bf16.vlgmr.msrb.gmra.mxu0 %v9220_v38  ;;  %v7447_v40 = vld [vmem:[%s8171_s19 + $0x970] sm:$0xf0]  ;;  %v4625_v35 = vpop.f32.mrf.mxu2 }
 0x2ba   : > { %v7471_v38 = vld [vmem:[%s8171_s19 + $0xa30] sm:$0xf0]  ;;  %v6671_v21 = vor.u32 %v7447_v40, %v6670_v26  ;;  %v4626_v49 = vadd.f32 %v4625_v35, %v4613_v47  ;;  %v7078_v35 = vld [vmem:[%s8171_s19 + $0xc98] sm:$0xf] }
 0x2bb   : > { %4864 = vmatpush.bf16.msrb.mxu1 %v6503_v42  ;;  %4877 = vmatpush.bf16.msrb.mxu2 %v6599_v45  ;;  %v6767_v60 = vor.u32 %v7471_v38, %v6766_v8  ;;  %v4614_v4 = vpop.f32.mrf.mxu1  ;;  %v6455_v45 = vor.u32 %v7393_v30, %v6454_v9  ;;  %v7411_v8 = vld [vmem:[%s8171_s19 + $0x850] sm:$0xf0]  ;;  %v6622_v38 = vld [vmem:[%s8171_s19 + $0x908] sm:$0xf]  ;;  %v7091_v9 = vor.u32 %v7552_v16, %v7090_v6  ;;  %v7501_v30 = vld [vmem:[%s8171_s19 + $0xb20] sm:$0xf0] }
 0x2bc   : > { %4890 = vmatpush.bf16.msrb.mxu3 %v6695_v63  ;;  %4903 = vmatpush.bf16.msra.mxu0 %v6791_v48  ;;  %v4638_v14 = vpop.f32.mrf.mxu3  ;;  %v7390_v63 = vld [vmem:[%s8171_s19 + $0x7a8] sm:$0xf0]  ;;  %v6647_v48 = vor.u32 %v7441_v19, %v6646_v13  ;;  %v6527_v62 = vor.u32 %v7411_v8, %v6526_v39  ;;  %v6623_v29 = vor.u32 %v7435_v2, %v6622_v38  ;;  %v4954_v4 = vrot.slane %v9709_v34, 4  ;;  %v6838_v8 = vld [vmem:[%s8171_s19 + $0xab8] sm:$0xf] }
 0x2bd   : > { %v4639_v58 = vadd.f32 %v4638_v14, %v4626_v49  ;;  %v6443_v10 = vor.u32 %v7390_v63, %v6442_v51  ;;  %v6874_v49 = vld [vmem:[%s8171_s19 + $0xb00] sm:$0xf]  ;;  %v7079_v14 = vor.u32 %v7549_v44, %v7078_v35  ;;  %v7498_v19 = vld [vmem:[%s8171_s19 + $0xb08] sm:$0xf0]  ;;  %v7495_v63 = vld [vmem:[%s8171_s19 + $0xaf0] sm:$0xf0] }
 0x2be   : > { %v4653_v42 = vpop.f32.mrf.mxu0  ;;  %v7534_v35 = vld [vmem:[%s8171_s19 + $0xc28] sm:$0xf0] }
 0x2bf   : > { %4865 = vmatpush.bf16.msrb.mxu1 %v6491_v3  ;;  %4878 = vmatpush.bf16.msrb.mxu2 %v6587_v61  ;;  %v7462_v3 = vld [vmem:[%s8171_s19 + $0x9e8] sm:$0xf0]  ;;  %v9878_v61 = vadd.f32 %v4651_v31, %v4639_v58  ;;  %v6718_v31 = vld [vmem:[%s8171_s19 + $0x9c8] sm:$0xf]  ;;  %v7066_v58 = vld [vmem:[%s8171_s19 + $0xc80] sm:$0xf] }
 0x2c0   : > { %4891 = vmatpush.bf16.msrb.mxu3 %v6683_v50  ;;  %4904 = vmatpush.bf16.msra.mxu0 %v6779_v56  ;;  %v6430_v50 = vld [vmem:[%s8171_s19 + $0x788] sm:$0xf]  ;;  %v7387_v56 = vld [vmem:[%s8171_s19 + $0x790] sm:$0xf0]  ;;  %v6731_v26 = vor.u32 %v7462_v3, %v6730_v36  ;;  %v7546_v42 = vld [vmem:[%s8171_s19 + $0xc88] sm:$0xf0] }
 0x2c1   : > { %v4627_v40 = vpop.f32.mrf.mxu2  ;;  %v7067_v51 = vor.u32 %v7546_v42, %v7066_v58  ;;  %v6850_v3 = vld [vmem:[%s8171_s19 + $0xad0] sm:$0xf] }
 0x2c3   : > { %4866 = vmatpush.bf16.msrb.mxu1 %v6479_v20  ;;  %4879 = vmatpush.bf16.msrb.mxu2 %v6575_v59  ;;  %v7459_v20 = vld [vmem:[%s8171_s19 + $0x9d0] sm:$0xf0]  ;;  %v6898_v59 = vld [vmem:[%s8171_s19 + $0xb30] sm:$0xf] }
 0x2c4   : > { %4892 = vmatpush.bf16.msrb.mxu3 %v6671_v21  ;;  %4905 = vmatpush.bf16.msra.mxu0 %v6767_v60  ;;  %v4640_v47 = vpop.f32.mrf.mxu3  ;;  %v7528_v21 = vld [vmem:[%s8171_s19 + $0xbf8] sm:$0xf0]  ;;  %v6431_v60 = vor.u32 %v7387_v56, %v6430_v50  ;;  %v6719_v17 = vor.u32 %v7459_v20, %v6718_v31  ;;  %v6899_v5 = vor.u32 %v7504_v41, %v6898_v59  ;;  %v6946_v50 = vld [vmem:[%s8171_s19 + $0xb90] sm:$0xf]  ;;  %v6934_v31 = vld [vmem:[%s8171_s19 + $0xb78] sm:$0xf] }
 0x2c5   : > { %v7516_v56 = vld [vmem:[%s8171_s19 + $0xb98] sm:$0xf0]  ;;  %v7489_v47 = vld [vmem:[%s8171_s19 + $0xac0] sm:$0xf0] }
 0x2c6   : > { %v6947_v40 = vor.u32 %v7516_v56, %v6946_v50  ;;  %v7513_v20 = vld [vmem:[%s8171_s19 + $0xb80] sm:$0xf0] }
 0x2c7   : > { %4867 = vmatpush.bf16.msrb.mxu1 %v6467_v53  ;;  %4880 = vmatpush.bf16.msrb.mxu2 %v6563_v24  ;;  %v6995_v53 = vor.u32 %v7528_v21, %v6994_v27  ;;  %v6886_v24 = vld [vmem:[%s8171_s19 + $0xb18] sm:$0xf] }
 0x2c8   : > { %4893 = vmatpush.bf16.msrb.mxu3 %v6659_v52  ;;  %4906 = vmatpush.bf16.msra.mxu0 %v6755_v57  ;;  %v6982_v52 = vld [vmem:[%s8171_s19 + $0xbd8] sm:$0xf]  ;;  %v7525_v57 = vld [vmem:[%s8171_s19 + $0xbe0] sm:$0xf0]  ;;  %v6887_v43 = vor.u32 %v7501_v30, %v6886_v24  ;;  %v7486_v24 = vld [vmem:[%s8171_s19 + $0xaa8] sm:$0xf0] }
 0x2c9   : > { %v6983_v13 = vor.u32 %v7525_v57, %v6982_v52  ;;  %v7030_v21 = vld [vmem:[%s8171_s19 + $0xc38] sm:$0xf]  ;;  %v7510_v30 = vld [vmem:[%s8171_s19 + $0xb68] sm:$0xf0]  ;;  %v7018_v57 = vld [vmem:[%s8171_s19 + $0xc20] sm:$0xf] }
 0x2cb   : > { %4868 = vmatpush.bf16.msrb.mxu1 %v6455_v45  ;;  %4881 = vmatpush.bf16.msrb.mxu2 %v6551_v55  ;;  %v6971_v45 = vor.u32 %v7522_v1, %v6970_v25  ;;  %v6862_v55 = vld [vmem:[%s8171_s19 + $0xae8] sm:$0xf]  ;;  %v7483_v25 = vld [vmem:[%s8171_s19 + $0xa90] sm:$0xf0] }
 0x2cc   : > { %4894 = vmatpush.bf16.msrb.mxu3 %v6647_v48  ;;  %4907 = vmatpush.bf16.msra.mxu0 %v6743_v28  ;;  %v6958_v48 = vld [vmem:[%s8171_s19 + $0xba8] sm:$0xf]  ;;  %v6863_v11 = vor.u32 %v7495_v63, %v6862_v55 }
 0x2cd   : > { %v7054_v28 = vld [vmem:[%s8171_s19 + $0xc68] sm:$0xf] }
 0x2ce   : > { %v6910_v1 = vld [vmem:[%s8171_s19 + $0xb48] sm:$0xf] }
 0x2cf   : > { %4869 = vmatpush.bf16.msrb.mxu1 %v6443_v10  ;;  %4882 = vmatpush.bf16.msrb.mxu2 %v6539_v7  ;;  %v7055_v10 = vor.u32 %v7543_v22, %v7054_v28  ;;  %v7492_v7 = vld [vmem:[%s8171_s19 + $0xad8] sm:$0xf0] }
 0x2d0   : > { %4895 = vmatpush.bf16.msrb.mxu3 %v6635_v15  ;;  %4908 = vmatpush.bf16.msra.mxu0 %v6731_v26  ;;  %v7042_v15 = vld [vmem:[%s8171_s19 + $0xc50] sm:$0xf]  ;;  %v7540_v26 = vld [vmem:[%s8171_s19 + $0xc58] sm:$0xf0] }
 0x2d1   : > { %v7043_v38 = vor.u32 %v7540_v26, %v7042_v15 }
 0x2d3   : > { %4870 = vmatpush.bf16.msrb.mxu1 %v6431_v60  ;;  %4883 = vmatpush.bf16.msrb.mxu2 %v6527_v62  ;;  %v7537_v60 = vld [vmem:[%s8171_s19 + $0xc40] sm:$0xf0] }
 0x2d4   : > { %4896 = vmatpush.bf16.msrb.mxu3 %v6623_v29  ;;  %4909 = vmatpush.bf16.msra.mxu0 %v6719_v17  ;;  %v6839_v29 = vor.u32 %v7489_v47, %v6838_v8  ;;  %v6935_v17 = vor.u32 %v7513_v20, %v6934_v31 }
 0x2d6   : > { %4871 = vmatmul.bf16.vlgmr.msrb.gmra.mxu1 %v9225_v37  ;;  %4884 = vmatmul.bf16.vlgmr.msrb.gmra.mxu2 %v9227_v32  ;;  %v6875_v37 = vor.u32 %v7498_v19, %v6874_v49  ;;  %v7519_v32 = vld [vmem:[%s8171_s19 + $0xbb0] sm:$0xf0]  ;;  %v4703_v23 = vpop.f32.mrf.mxu0  ;;  %v6814_v49 = vld [vmem:[%s8171_s19 + $0xa88] sm:$0xf] }
 0x2d7   : > { %4915 = vmatpush.bf16.msra.mxu1 %v6899_v5  ;;  %4928 = vmatpush.bf16.msra.mxu2 %v6995_v53  ;;  %v6959_v36 = vor.u32 %v7519_v32, %v6958_v48  ;;  %v6826_v5 = vld [vmem:[%s8171_s19 + $0xaa0] sm:$0xf]  ;;  %v7031_v53 = vor.u32 %v7537_v60, %v7030_v21  ;;  %v6815_v55 = vor.u32 %v7483_v25, %v6814_v49 }
 0x2d8   : > { %4941 = vmatpush.bf16.msra.mxu3 %v7091_v9  ;;  %4910 = vmatmul.bf16.vlgmr.msra.gmra.mxu0 %v9327_v18  ;;  %v4664_v18 = vpop.f32.mrf.mxu1  ;;  %v6922_v9 = vld [vmem:[%s8171_s19 + $0xb60] sm:$0xf] }
 0x2d9   : > { %4897 = vmatmul.bf16.vlgmr.msrb.gmra.mxu3 %v9317_v46  ;;  %v4955_v46 = vadd.f32 %v4954_v4, %v9709_v34  ;;  %v4665_v33 = vadd.f32 %v4664_v18, %v9878_v61  ;;  %v6851_v61 = vor.u32 %v7492_v7, %v6850_v3  ;;  %v4677_v2 = vpop.f32.mrf.mxu2  ;;  %v7507_v4 = vld [vmem:[%s8171_s19 + $0xb50] sm:$0xf0] }
 0x2db   : > { %4916 = vmatpush.bf16.msra.mxu1 %v6887_v43  ;;  %4929 = vmatpush.bf16.msra.mxu2 %v6983_v13  ;;  %v4956_v39 = vrot.slane %v4955_v46, 2  ;;  %v4678_v41 = vadd.f32 %v4677_v2, %v4665_v33  ;;  %v6827_v43 = vor.u32 %v7486_v24, %v6826_v5  ;;  %v6923_v13 = vor.u32 %v7510_v30, %v6922_v9 }
 0x2dc   : > { %4942 = vmatpush.bf16.msra.mxu3 %v7079_v14  ;;  %v4690_v27 = vpop.f32.mrf.mxu3  ;;  %v7019_v14 = vor.u32 %v7534_v35, %v7018_v57 }
 0x2dd   : > { %v4957_v59 = vadd.f32 %v4956_v39, %v4955_v46  ;;  %v4691_v6 = vadd.f32 %v4690_v27, %v4678_v41 }
 0x2de   : > { %v4705_v16 = vpop.f32.mrf.mxu0 }
 0x2df   : > { %4917 = vmatpush.bf16.msra.mxu1 %v6875_v37  ;;  %4930 = vmatpush.bf16.msra.mxu2 %v6971_v45  ;;  %v4958_v52 = vrot.slane %v4957_v59, 1  ;;  %v4704_v44 = vadd.f32 %v4703_v23, %v4691_v6  ;;  %v7006_v37 = vld [vmem:[%s8171_s19 + $0xc08] sm:$0xf]  ;;  %v7531_v45 = vld [vmem:[%s8171_s19 + $0xc10] sm:$0xf0] }
 0x2e0   : > { %4943 = vmatpush.bf16.msra.mxu3 %v7067_v51  ;;  %v4666_v62 = vpop.f32.mrf.mxu1  ;;  %v6911_v51 = vor.u32 %v7507_v4, %v6910_v1  ;;  %v7007_v63 = vor.u32 %v7531_v45, %v7006_v37  ;;  %v7695_v23 = vld [vmem:[%s8178_s14] ss:$8 sm:$0x7] }
 0x2e1   : > { %v4679_v19 = vpop.f32.mrf.mxu2  ;;  %v4959_v58 = vadd.f32 %v4958_v52, %v4957_v59 }
 0x2e3   : > { %4918 = vmatpush.bf16.msra.mxu1 %v6863_v11  ;;  %4931 = vmatpush.bf16.msra.mxu2 %v6959_v36  ;;  %v4972_v48 = vmul.f32 0.125, %v4959_v58  ;;  %v2111_v11 = vperm.slane %v7695_v23, 2 }
 0x2e4   : > { %4944 = vmatpush.bf16.msra.mxu3 %v7055_v10  ;;  %v4692_v42 = vpop.f32.mrf.mxu3 }
 0x2e5   : > { %v9944_v32 = vsub.f32 %v9709_v34, %v4972_v48 }
 0x2e7   : > { %4919 = vmatpush.bf16.msra.mxu1 %v6851_v61  ;;  %4932 = vmatpush.bf16.msra.mxu2 %v6947_v40  ;;  %v4978_v46 = vmul.f32 %v9944_v32, %v9944_v32 }
 0x2e8   : > { %4945 = vmatpush.bf16.msra.mxu3 %v7043_v38 }
 0x2e9   : > { %v4981_v22 = vrot.slane %v4978_v46, 4 }
 0x2eb   : > { %4920 = vmatpush.bf16.msra.mxu1 %v6839_v29  ;;  %4933 = vmatpush.bf16.msra.mxu2 %v6935_v17  ;;  %v4982_v36 = vadd.f32 %v4981_v22, %v4978_v46 }
 0x2ec   : > { %4946 = vmatpush.bf16.msra.mxu3 %v7031_v53 }
 0x2ef   : > { %4921 = vmatpush.bf16.msra.mxu1 %v6827_v43  ;;  %4934 = vmatpush.bf16.msra.mxu2 %v6923_v13 }
 0x2f0   : > { %4947 = vmatpush.bf16.msra.mxu3 %v7019_v14 }
 0x2f3   : > { %4922 = vmatpush.bf16.msra.mxu1 %v6815_v55  ;;  %4935 = vmatpush.bf16.msra.mxu2 %v6911_v51  ;;  %v4716_v28 = vpop.f32.mrf.mxu1 }
 0x2f4   : > { %4948 = vmatpush.bf16.msra.mxu3 %v7007_v63  ;;  %v4717_v18 = vadd.f32 %v4716_v28, %v4704_v44 }
 0x2f6   : > { %4923 = vmatmul.bf16.vlgmr.msra.gmra.mxu1 %v9331_v12  ;;  %4936 = vmatmul.bf16.vlgmr.msra.gmra.mxu2 %v9333_v54  ;;  %v4755_v33 = vpop.f32.mrf.mxu0  ;;  %v4983_v12 = vrot.slane %v4982_v36, 2 }
 0x2f7   : > { %4949 = vmatmul.bf16.vlgmr.msra.gmra.mxu3 %v9405_v0 }
 0x2f8   : > { %v4984_v15 = vadd.f32 %v4983_v12, %v4982_v36 }
 0x2f9   : > { %v4729_v3 = vpop.f32.mrf.mxu2 }
 0x2fa   : > { %v4730_v10 = vadd.f32 %v4729_v3, %v4717_v18  ;;  %v4985_v38 = vrot.slane %v4984_v15, 1 }
 0x2fb   : > { %v4718_v50 = vpop.f32.mrf.mxu1 }
 0x2fc   : > { %v4742_v34 = vpop.f32.mrf.mxu3  ;;  %v4960_v56 = vrot.slane %v4730_v10, 4  ;;  %v4986_v31 = vadd.f32 %v4985_v38, %v4984_v15 }
 0x2fd   : > { %v4743_v7 = vadd.f32 %v4742_v34, %v2111_v11 }
 0x2fe   : > { %v4757_v54 = vpop.f32.mrf.mxu0  ;;  %v4961_v0 = vadd.f32 %v4960_v56, %v4730_v10  ;;  %v4999_v41 = vmul.f32 0.125, %v4986_v31 }
 0x2ff   : > { %v4756_v39 = vadd.f32 %v4755_v33, %v4743_v7 }
 0x300   : > { %v4962_v26 = vrot.slane %v4961_v0, 2  ;;  %v5002_v60 = vadd.f32 1e-05, %v4999_v41 }
 0x301   : > { %v4731_v61 = vpop.f32.mrf.mxu2 }
 0x302   : > { %v4963_v40 = vadd.f32 %v4962_v26, %v4961_v0  ;;  %7689 = vrsqrt.f32 %v5002_v60  ;;  %vm5011_vm14 = vweird.f32 %v5002_v60 }
 0x304   : > { %v4744_v8 = vpop.f32.mrf.mxu3  ;;  %v4964_v2 = vrot.slane %v4963_v40, 1 }
 0x306   : > { %v4965_v47 = vadd.f32 %v4964_v2, %v4963_v40 }
 0x308   : > { %v4973_v20 = vmul.f32 0.125, %v4965_v47  ;;  %v7690_v35 = vpop.eup %7689 }
 0x309   : > { %v5006_v19 = vmul.f32 %v7690_v35, %v5002_v60  ;;  %vm5012_vm12 = vweird.f32 %v7690_v35 }
 0x30a   : > { %v9952_v59 = vsub.f32 %v4730_v10, %v4973_v20  ;;  %vm5013_vm5 = vmor %vm5011_vm14, %vm5012_vm12 }
 0x30b   : > { %v5007_v4 = vmul.f32 %v7690_v35, %v5006_v19 }
 0x30c   : > { %v4979_v27 = vmul.f32 %v9952_v59, %v9952_v59 }
 0x30d   : > { %v5008_v42 = vmul.f32 0.5, %v5007_v4 }
 0x30e   : > { %v4987_v21 = vrot.slane %v4979_v27, 4 }
 0x30f   : > { %v5009_v55 = vsub.f32 1.5, %v5008_v42  ;;  %v7094_v42 = vld [vmem:[%s8181_s7] sm:$0xf] }
 0x310   : > { %v4988_v62 = vadd.f32 %v4987_v21, %v4979_v27 }
 0x311   : > { %v5010_v46 = vmul.f32 %v7690_v35, %v5009_v55 }
 0x312   : > { %v4989_v16 = vrot.slane %v4988_v62, 2 }
 0x313   : > { %v4768_v6 = vpop.f32.mrf.mxu1  ;;  %v5014_v23 = vsel %vm5013_vm5, %v7690_v35, %v5010_v46  ;;  %v7096_v46 = vld [vmem:[%s8181_s7 + $0xc] sm:$0xf0] }
 0x314   : > { %v4769_v29 = vadd.f32 %v4768_v6, %v4756_v39  ;;  %v4990_v5 = vadd.f32 %v4989_v16, %v4988_v62 }
 0x316   : > { %v4807_v17 = vpop.f32.mrf.mxu0  ;;  %v4991_v53 = vrot.slane %v4990_v5, 1 }
 0x318   : > { %v4992_v9 = vadd.f32 %v4991_v53, %v4990_v5 }
 0x319   : > { %v4781_v24 = vpop.f32.mrf.mxu2 }
 0x31a   : > { %v4782_v30 = vadd.f32 %v4781_v24, %v4769_v29  ;;  %v5000_v44 = vmul.f32 0.125, %v4992_v9 }
 0x31b   : > { %v4770_v57 = vpop.f32.mrf.mxu1 }
 0x31c   : > { %v4794_v52 = vpop.f32.mrf.mxu3  ;;  %v5003_v49 = vadd.f32 1e-05, %v5000_v44 }
 0x31d   : > { %v4795_v43 = vadd.f32 %v4794_v52, %v4782_v30 }
 0x31e   : > { %v4809_v13 = vpop.f32.mrf.mxu0  ;;  %7691 = vrsqrt.f32 %v5003_v49  ;;  %vm5021_vm9 = vweird.f32 %v5003_v49 }
 0x31f   : > { %v4808_v14 = vadd.f32 %v4807_v17, %v4795_v43 }
 0x321   : > { %v4783_v25 = vpop.f32.mrf.mxu2 }
 0x324   : > { %v4796_v1 = vpop.f32.mrf.mxu3  ;;  %v7692_v58 = vpop.eup %7691 }
 0x325   : > { %v5016_v37 = vmul.f32 %v7692_v58, %v5003_v49  ;;  %vm5022_vm11 = vweird.f32 %v7692_v58 }
 0x326   : > { %vm5023_vm13 = vmor %vm5021_vm9, %vm5022_vm11 }
 0x327   : > { %v5017_v45 = vmul.f32 %v7692_v58, %v5016_v37  ;;  %v7554_v37 = vld [vmem:[%s8181_s7 + $0x8] sm:$0xf0] }
 0x328   : > { %v7095_v55 = vor.u32 %v7554_v37, %v7094_v42 }
 0x329   : > { %v5018_v51 = vmul.f32 0.5, %v5017_v45  ;;  %v7102_v45 = vld [vmem:[%s8181_s7 + $0x8] sm:$0xf] }
 0x32a   : > { %5097 = vmatpush.bf16.xpose.msrb.mxu0 %v7095_v55 }
 0x32b   : > { %v5019_v63 = vsub.f32 1.5, %v5018_v51  ;;  %v7555_v51 = vld [vmem:[%s8181_s7 + $0x10] sm:$0xf0] }
 0x32d   : > { %v5020_v48 = vmul.f32 %v7692_v58, %v5019_v63  ;;  %v7103_v63 = vor.u32 %v7555_v51, %v7102_v45 }
 0x32f   : > { %v5024_v22 = vsel %vm5023_vm13, %v7692_v58, %v5020_v48  ;;  %v7553_v48 = vld [vmem:[%s8181_s7 + $0x4] sm:$0xf]  ;;  %5123 = vmatpush.bf16.xpose.msrb.mxu1 %v7103_v63 }
 0x330   : > { %v5038_v33 = vrot.slane %v5024_v22, 7 }
 0x332   : > { %v9957_v11 = vsel %vm1391_vm3, %v5014_v23, %v5038_v33 }
 0x333   : > { %v4820_v28 = vpop.f32.mrf.mxu1 }
 0x334   : > { %v4821_v26 = vadd.f32 %v4820_v28, %v4808_v14  ;;  %v7099_v28 = vor.u32 %v7553_v48, %v7096_v46 }
 0x336   : > { %v4859_v18 = vpop.f32.mrf.mxu0  ;;  %5110 = vmatpush.bf16.xpose.msra.mxu0 %v7099_v28 }
 0x339   : > { %v4833_v36 = vpop.f32.mrf.mxu2 }
 0x33a   : > { %v4834_v61 = vadd.f32 %v4833_v36, %v4821_v26 }
 0x33b   : > { %v4822_v10 = vpop.f32.mrf.mxu1 }
 0x33c   : > { %v4846_v3 = vpop.f32.mrf.mxu3 }
 0x33d   : > { %v4847_v38 = vadd.f32 %v4846_v3, %v4834_v61 }
 0x33e   : > { %v4861_v34 = vpop.f32.mrf.mxu0 }
 0x33f   : > { %v4860_v2 = vadd.f32 %v4859_v18, %v4847_v38  ;;  %v5458_v34 = vld [vmem:[%s8178_s14 + $0x1] ss:$8 sm:$0x7] }
 0x341   : > { %v4835_v7 = vpop.f32.mrf.mxu2 }
 0x344   : > { %v4848_v50 = vpop.f32.mrf.mxu3 }
 0x345   : > { %v5459_v50 = vld [vmem:[%s8178_s14 + $0x2] ss:$8 sm:$0x7] }
 0x353   : > { %v4872_v12 = vpop.f32.mrf.mxu1 }
 0x354   : > { %v4873_v47 = vadd.f32 %v4872_v12, %v4860_v2 }
 0x355   : > { %v4911_v56 = vpop.f32.mrf.mxu0 }
 0x359   : > { %v4885_v54 = vpop.f32.mrf.mxu2 }
 0x35a   : > { %v4886_v31 = vadd.f32 %v4885_v54, %v4873_v47  ;;  %v5057_v54 = vperm.slane %v5459_v50, 2 }
 0x35b   : > { %v4874_v0 = vpop.f32.mrf.mxu1 }
 0x35c   : > { %v4898_v39 = vpop.f32.mrf.mxu3 }
 0x35d   : > { %v4913_v15 = vpop.f32.mrf.mxu0  ;;  %v4899_v20 = vadd.f32 %v4898_v39, %v4886_v31 }
 0x35e   : > { %v5055_v15 = vperm.slane %v5459_v50, 0 }
 0x35f   : > { %v4912_v27 = vadd.f32 %v4911_v56, %v4899_v20 }
 0x361   : > { %v4887_v40 = vpop.f32.mrf.mxu2 }
 0x364   : > { %v4900_v8 = vpop.f32.mrf.mxu3 }
 0x373   : > { %v4924_v41 = vpop.f32.mrf.mxu1 }
 0x374   : > { %v4925_v21 = vadd.f32 %v4924_v41, %v4912_v27 }
 0x379   : > { %v4937_v60 = vpop.f32.mrf.mxu2 }
 0x37a   : > { %v4938_v62 = vadd.f32 %v4937_v60, %v4925_v21  ;;  %v4950_v6 = vpop.f32.mrf.mxu3 }
 0x37b   : > { %v4926_v16 = vpop.f32.mrf.mxu1 }
 0x37c   : > { %v4951_v29 = vadd.f32 %v4950_v6, %v4938_v62 }
 0x37e   : > { %v4966_v17 = vrot.slane %v4951_v29, 4 }
 0x380   : > { %v4967_v5 = vadd.f32 %v4966_v17, %v4951_v29 }
 0x381   : > { %v4939_v53 = vpop.f32.mrf.mxu2 }
 0x382   : > { %v4968_v24 = vrot.slane %v4967_v5, 2  ;;  %v4952_v9 = vpop.f32.mrf.mxu3 }
 0x384   : > { %v4969_v30 = vadd.f32 %v4968_v24, %v4967_v5 }
 0x386   : > { %v4970_v52 = vrot.slane %v4969_v30, 1 }
 0x388   : > { %v4971_v57 = vadd.f32 %v4970_v52, %v4969_v30 }
 0x38a   : > { %v4974_v35 = vmul.f32 0.125, %v4971_v57 }
 0x38c   : > { %v4977_v44 = vsub.f32 %v4951_v29, %v4974_v35 }
 0x38e   : > { %v4980_v43 = vmul.f32 %v4977_v44, %v4977_v44 }
 0x390   : > { %v4993_v13 = vrot.slane %v4980_v43, 4 }
 0x392   : > { %v4994_v49 = vadd.f32 %v4993_v13, %v4980_v43 }
 0x394   : > { %v4995_v14 = vrot.slane %v4994_v49, 2 }
 0x396   : > { %v4996_v19 = vadd.f32 %v4995_v14, %v4994_v49 }
 0x398   : > { %v4997_v25 = vrot.slane %v4996_v19, 1 }
 0x39a   : > { %v4998_v1 = vadd.f32 %v4997_v25, %v4996_v19 }
 0x39c   : > { %v5001_v4 = vmul.f32 0.125, %v4998_v1 }
 0x39e   : > { %v5004_v58 = vadd.f32 1e-05, %v5001_v4 }
 0x3a0   : > { %7693 = vrsqrt.f32 %v5004_v58  ;;  %vm5031_vm2 = vweird.f32 %v5004_v58 }
 0x3a6   : > { %v7694_v22 = vpop.eup %7693 }
 0x3a7   : > { %v5026_v18 = vmul.f32 %v7694_v22, %v5004_v58  ;;  %vm5032_vm3 = vweird.f32 %v7694_v22 }
 0x3a8   : > { %vm5033_vm4 = vmor %vm5031_vm2, %vm5032_vm3 }
 0x3a9   : > { %v5027_v33 = vmul.f32 %v7694_v22, %v5026_v18 }
 0x3ab   : > { %v5028_v23 = vmul.f32 0.5, %v5027_v33 }
 0x3ad   : > { %v5029_v36 = vsub.f32 1.5, %v5028_v23 }
 0x3af   : > { %v5030_v3 = vmul.f32 %v7694_v22, %v5029_v36 }
 0x3b1   : > { %v5034_v10 = vsel %vm5033_vm4, %v7694_v22, %v5030_v3 }
 0x3b2   : > { %v5039_v7 = vrot.slane %v5034_v10, 6 }
 0x3b4   : > { %v5041_v12 = vsel %vm1395_vm10, %v9957_v11, %v5039_v7  ;;  %v5056_v11 = vperm.slane %v5459_v50, 1  ;;  %vm5129_vm10 = vcmask 130048  }
 0x3b5   : > { %v5043_v56 = vmul.f32 %v5458_v34, %v5041_v12 }
 0x3b7   : > { %v5047_v39 = vperm.slane %v5043_v56, 2  ;;  %v5045_v0 = vperm.slane %v5043_v56, 0  ;;  %v5046_v26 = vperm.slane %v5043_v56, 1 }
 0x3b9   : > { %v5053_v61 = vmul.f32 %v5047_v39, %v4977_v44  ;;  %v5051_v40 = vmul.f32 %v5045_v0, %v9944_v32  ;;  %v5052_v8 = vmul.f32 %v5046_v26, %v9952_v59 }
 0x3bb   : > { %v5063_v38 = vadd.f32 %v5057_v54, %v5053_v61  ;;  %v5061_v2 = vadd.f32 %v5055_v15, %v5051_v40  ;;  %v5062_v27 = vadd.f32 %v5056_v11, %v5052_v8 }
 0x3bd   : > { %v5066_v47 = vmax.f32 %v5063_v38, 0.0  ;;  %v5064_v31 = vmax.f32 %v5061_v2, 0.0  ;;  %v5065_v21 = vmax.f32 %v5062_v27, 0.0 }
 0x3bf   : > { %v5069_v20 = vpack.c.bf16 %v5066_v47, %v5066_v47  ;;  %v5067_v41 = vpack.c.bf16 %v5064_v31, %v5064_v31  ;;  %v5068_v60 = vpack.c.bf16 %v5065_v21, %v5065_v21 }
 0x3c1   : > { %5098 = vmatmul.bf16.vlgmr.msrb.gmra.mxu0 %v5067_v41  ;;  %5124 = vmatmul.bf16.vlgmr.msrb.gmra.mxu1 %v5069_v20 }
 0x3d1   : > { %5111 = vmatmul.bf16.vlgmr.msra.gmra.mxu0 %v5068_v60 }
 0x43e   : > { %v5099_v62 = vpop.f32.mrf.mxu0  ;;  %v5125_v6 = vpop.f32.mrf.mxu1 }
 0x446   : > { %v5101_v32 = vpop.f32.mrf.mxu0  ;;  %v5127_v59 = vpop.f32.mrf.mxu1 }
 0x44e   : > { %v5112_v16 = vpop.f32.mrf.mxu0 }
 0x44f   : > { %v5113_v29 = vadd.f32 %v5112_v16, %v5099_v62 }
 0x451   : > { %v5126_v17 = vadd.f32 %v5125_v6, %v5113_v29 }
 0x453   : > { %5130 = vst.msk [vmem:[%s396_s11] sm:$0xff] %vm5129_vm10, %v5126_v17 }
 0x454   : > { %7903 = shalt.err (!%p7900_p12)
}
 0x455   : > { %7579 = dma.vmem_to_hbm [thread:$0]  (%p8071_p5), %s5145_s29, 128, %s5147_s21, %s5132_s16  }
 0x456   : > { %v5114_v5 = vpop.f32.mrf.mxu0 }
 0x457 PF: > { %s10060_s23 = sld [smem:[#allocation19_spill]]  ;;  %p7612_p13 = scmp.ge.s32.totalorder %s7954_s24, 2 }
 0x459   : > { %p7602_p9 = pnand %p7612_p13, %p8034_p6 }
 0x45b   : > { %p7603_p0 = pneg %p7602_p9 }
 0x45d   : > { %s5158_s19 = sand.u32 1, %s10060_s23  }
 0x45e   : > { %s5159_s10 = scalar_lea.sflag [#allocation4], %s5158_s19 }
 0x45f   : > { %7937 = dma.done.wait (%p7603_p0), %s5159_s10, 128  }
 0x460   : > { %7939 = vsyncadd (%p7603_p0), %s5159_s10, 4294967168  ;;  %s10062_s24 = sld [smem:[#allocation22_spill]]  ;;  %s10065_s21 = smov %s7946_s22 }
 0x461   : > { %s10063_s14 = sld [smem:[#allocation20_spill]] }
 0x462   : > { %s10064_s23 = sld [smem:[#allocation23_spill]] }
 0x466   : > { %p24_p3 = scmp.ge.s32.totalorder %s10062_s24, 8  }
 0x467   : > { %s10066_s22 = smov %s10063_s14 }
 0x468   :  { %26 = sbr.rel (!%p24_p3) target bundleno = 12 (0xc), region = 136 }
 0x46d   :  { %5165 = vsyncpa [#allocation3], 1 }
 0x46e   :  { %5167 = vsyncpa [#allocation3 + $0x1], 1 }
 0x46f   :  { %5168 = vsyncpa [#allocation6], 1 }
 0x470   :  { %5169 = vsyncpa [#allocation9], 1 }
 0x471   :  { %5171 = vsyncpa [#allocation9 + $0x1], 1 }
 0x472   :  { %5172 = vsyncpa [#allocation12], 1 }
 0x473   :  { %5174 = vsyncpa [#allocation12 + $0x1], 1 }
 0x474   :  { %5175 = vsyncpa [#allocation4], 1 }
 0x475   :  { %5177 = vsyncpa [#allocation4 + $0x1], 1 }

</bundles_post_ra>
